<compile_context>
chip_gen: v5e
topology: v5e:2x2
jax: 0.10.0
libtpu: 0.0.40
codegen_flags: <defaults>
</compile_context>

<pallas_src>
import functools

import jax
import jax.numpy as jnp
from jax import lax
from jax.experimental import pallas as pl
from jax.experimental.pallas import tpu as pltpu

SUB = 16      # batch-tile sublane multiple (bf16 packs 2 rows / sublane)
LANE = 128    # lane width


# ----------------------------- Pallas kernel --------------------------------
def bilstm_fc_kernel(x_ref,                          # (Tt*Bt, Ep) bf16, t-major
                     wih_f_ref, whh_f_ref, b_f_ref,  # (Ep,4Hp),(Hp,4Hp) bf16, (1,4Hp) f32
                     wih_b_ref, b_b_ref,             # reverse (i,g,o): (Ep,3Hp) bf16, (1,3Hp) f32
                     wfc_f_ref, wfc_b_ref, bfc_ref,  # (Hp,Lp) bf16 x2, (1,Lp) f32
                     out_ref,                        # (Bt, Lp) f32
                     h_sc, c_sc, gx_sc):             # VMEM f32: (Bt,Hp),(Bt,Hp),(Tt*Bt,4Hp)
    Bt, Hp = h_sc.shape
    rows = gx_sc.shape[0]
    Tt = rows // Bt

    t_chunk = pl.program_id(1)                       # inner, serial T axis
    last_chunk = pl.num_programs(1) - 1

    @pl.when(t_chunk == 0)
    def _init():                                     # fresh (h, c) per batch block
        h_sc[...] = jnp.zeros_like(h_sc)
        c_sc[...] = jnp.zeros_like(c_sc)

    x_chunk = x_ref[...]                             # (Tt*Bt, Ep)

    # Hoisted input projection: one MXU matmul per chunk (bf16 in, f32 acc),
    # forward-direction bias folded in once.
    gx_sc[...] = (jnp.dot(x_chunk, wih_f_ref[...],
                          preferred_element_type=jnp.float32)
                  + b_f_ref[...])
    # TODO(synk): store gx_sc in bf16 to halve the dominant scratch (needs a
    # precision re-validation first).

    def sigmoid(v):                                  # one EUP op per gate
        return 0.5 * (jnp.tanh(0.5 * v) + 1.0)

    def step(t, carry):
        h, c = carry                                 # f32 (Bt, Hp) in vregs
        row0 = pl.multiple_of(t * Bt, Bt)            # aligned sublane slice
        # NOTE: h is cast to bf16 for the MXU each step (matches the tested
        # bf16-mirrored reference); switch to f32 if long-T drift matters.
        # TODO(synk): weight-stationary MXU (push Whh once per chunk) for the
        # small-batch regime.
        gates = gx_sc[pl.ds(row0, Bt), :] + jnp.dot(
            h.astype(jnp.bfloat16), whh_f_ref[...],
            preferred_element_type=jnp.float32)
        i = sigmoid(gates[:, 0 * Hp:1 * Hp])
        f = sigmoid(gates[:, 1 * Hp:2 * Hp])
        g = jnp.tanh(gates[:, 2 * Hp:3 * Hp])
        o = sigmoid(gates[:, 3 * Hp:4 * Hp])
        c_new = f * c + i * g
        h_new = o * jnp.tanh(c_new)
        return h_new, c_new

    # Bounded unroll: fully unrolling wide gates would spill the 64-vreg file.
    unroll = min(Tt, 8) if Hp >= 512 else min(Tt, 32)
    h_fin, c_fin = lax.fori_loop(0, Tt, step, (h_sc[...], c_sc[...]),
                                 unroll=unroll)
    h_sc[...] = h_fin                                # persist across T chunks
    c_sc[...] = c_fin

    @pl.when(t_chunk == last_chunk)
    def _finish():
        # Reverse direction at t = T-1 is its FIRST step from a zero state:
        # recurrent term and forget gate drop out, only (i, g, o) columns kept.
        x_last = x_chunk[(Tt - 1) * Bt:Tt * Bt, :]   # (Bt, Ep), static slice
        gb = (jnp.dot(x_last, wih_b_ref[...],
                      preferred_element_type=jnp.float32)
              + b_b_ref[...])
        i_b = sigmoid(gb[:, 0 * Hp:1 * Hp])
        g_b = jnp.tanh(gb[:, 1 * Hp:2 * Hp])
        o_b = sigmoid(gb[:, 2 * Hp:3 * Hp])
        h_bwd = o_b * jnp.tanh(i_b * g_b)

        # concat(h_fwd, h_bwd) @ Wfc == h_fwd @ Wfc_top + h_bwd @ Wfc_bot.
        out_ref[...] = (
            jnp.dot(h_fin.astype(jnp.bfloat16), wfc_f_ref[...],
                    preferred_element_type=jnp.float32)
            + jnp.dot(h_bwd.astype(jnp.bfloat16), wfc_b_ref[...],
                      preferred_element_type=jnp.float32)
            + bfc_ref[...])


# ------------------------------- wrapper -------------------------------------
def _round_up(x, m):
    return ((x + m - 1) // m) * m


def _cdiv(a, b):
    return -(-a // b)


def _largest_divisor_leq(n, cap):
    cap = max(1, min(n, cap))
    for d in range(cap, 0, -1):
        if n % d == 0:
            return d
    return 1


@functools.lru_cache(maxsize=1)
def _vmem_capacity_bytes():
    try:
        return int(pltpu.get_tpu_info().vmem_capacity_bytes)
    except Exception:
        return 64 * 1024 * 1024        # conservative default (v7x per-core VMEM)


@functools.partial(jax.jit,
                   static_argnames=("max_chunk", "single_buffer_residents"))
def bilstm_classifier_forward(hidden_states, params, *, max_chunk=128,
                              single_buffer_residents=True):
    """hidden_states: (B, T, E) f32 (== transformer(...).last_hidden_state)."""
    B, T, E = hidden_states.shape
    H = params["whh_f"].shape[0]                    # (H, 4H)
    L = params["wfc"].shape[1]                      # (2H, L)

    # ---- padded / tiled sizes ------------------------------------------------
    n_b = 2 if B >= 32 else 1    # >=2 batch blocks => v7x megacore parallelism
    # TODO(synk): split into more batch blocks for very large B.
    Bt = _round_up(_cdiv(B, n_b), SUB)
    Bp = n_b * Bt
    Ep = _round_up(E, LANE)
    Hp = _round_up(H, LANE)
    Lp = _round_up(L, LANE)

    # ---- explicit VMEM budget -> chunk size + vmem_limit_bytes ---------------
    w_buf = 1 if single_buffer_residents else 2     # resident weight buffers
    fixed = w_buf * (Ep * 4 * Hp * 2                # wih_f (bf16)
                     + Hp * 4 * Hp * 2              # whh_f (bf16)
                     + Ep * 3 * Hp * 2              # wih_b (i,g,o only, bf16)
                     + 2 * Hp * Lp * 2              # wfc halves (bf16)
                     + (4 * Hp + 3 * Hp + Lp) * 4)  # f32 biases
    fixed += 2 * Bt * Hp * 4                        # h, c scratch (f32)
    fixed += 2 * Bt * Lp * 4                        # double-buffered output
    per_t = Bt * (2 * Ep * 2                        # x chunk (bf16, 2 buffers)
                  + 4 * Hp * 4)                     # gx scratch (f32)

    vmem_cap = _vmem_capacity_bytes()
    target = min(100 * 1024 * 1024, int(0.75 * vmem_cap))
    row_cap = 2048 if vmem_cap >= 96 * 1024 * 1024 else 512   # v5e/v6e vs v7x
    budget_tt = max(1, (target - fixed) // per_t) if target > fixed else 1
    tt_cap = max(1, min(max_chunk, max(1, row_cap // Bt), budget_tt))
    Tt = _largest_divisor_leq(T, tt_cap)
    n_t = T // Tt
    rows = Tt * Bt

    budget = fixed + Tt * per_t
    vmem_limit = int(min(0.9 * vmem_cap,
                         max(32 * 1024 * 1024, budget * 1.25 + (4 << 20))))

    # ---- x layout: (n_b, T*Bt, Ep), time-major within each batch block -------
    # TODO(synk): this transpose/pad is one extra HBM relayout pass of x;
    # produce time-major activations upstream to eliminate it for large T*E.
    x = jnp.transpose(hidden_states, (1, 0, 2))                  # (T, B, E)
    x = jnp.pad(x, ((0, 0), (0, Bp - B), (0, Ep - E)))
    x = x.reshape(T, n_b, Bt, Ep).transpose(1, 0, 2, 3)          # (n_b,T,Bt,Ep)
    x = x.reshape(n_b, T * Bt, Ep).astype(jnp.bfloat16)

    # ---- weights: per-gate padding so gate k occupies lanes [k*Hp,(k+1)*Hp) --
    ALL_GATES = (0, 1, 2, 3)     # PyTorch gate order: i, f, g, o
    REV_GATES = (0, 2, 3)        # reverse first step never uses the f gate

    def prep_gate_w(w, rows_p, gate_idx):           # w: (rows, 4H) f32
        r = w.shape[0]
        wg = jnp.take(w.reshape(r, 4, H), jnp.array(gate_idx), axis=1)
        wg = jnp.pad(wg, ((0, rows_p - r), (0, 0), (0, Hp - H)))
        return wg.reshape(rows_p, len(gate_idx) * Hp).astype(jnp.bfloat16)

    def prep_gate_b(b, gate_idx):                   # b: (1, 4H) f32
        bg = jnp.take(b.reshape(4, H), jnp.array(gate_idx), axis=0)
        bg = jnp.pad(bg, ((0, 0), (0, Hp - H)))
        return bg.reshape(1, len(gate_idx) * Hp)    # stays f32

    wih_f = prep_gate_w(params["wih_f"], Ep, ALL_GATES)
    whh_f = prep_gate_w(params["whh_f"], Hp, ALL_GATES)
    b_f = prep_gate_b(params["b_f"], ALL_GATES)
    wih_b = prep_gate_w(params["wih_b"], Ep, REV_GATES)
    b_b = prep_gate_b(params["b_b"], REV_GATES)
    # whh_b is provably unused: the reverse hidden at t=T-1 starts from zeros.

    wfc = params["wfc"]                             # (2H, L)
    wfc_f = jnp.pad(wfc[:H], ((0, Hp - H), (0, Lp - L))).astype(jnp.bfloat16)
    wfc_b = jnp.pad(wfc[H:], ((0, Hp - H), (0, Lp - L))).astype(jnp.bfloat16)
    bfc = jnp.pad(params["bfc"], ((0, 0), (0, Lp - L)))          # (1, Lp) f32

    def resident(shape):
        zero_map = lambda b, t: (0,) * len(shape)
        if single_buffer_residents:
            # Constant-index operands need only ONE VMEM buffer.
            return pl.BlockSpec(shape, zero_map, pipeline_mode=pl.Buffered(1))
        return pl.BlockSpec(shape, zero_map)

    out_p = pl.pallas_call(
        bilstm_fc_kernel,
        out_shape=jax.ShapeDtypeStruct((Bp, Lp), jnp.float32),
        grid=(n_b, n_t),
        in_specs=[
            pl.BlockSpec((None, rows, Ep), lambda b, t: (b, t, 0)),   # x stream
            resident((Ep, 4 * Hp)),                                   # wih_f
            resident((Hp, 4 * Hp)),                                   # whh_f
            resident((1, 4 * Hp)),                                    # b_f
            resident((Ep, 3 * Hp)),                                   # wih_b
            resident((1, 3 * Hp)),                                    # b_b
            resident((Hp, Lp)),                                       # wfc fwd
            resident((Hp, Lp)),                                       # wfc bwd
            resident((1, Lp)),                                        # bfc
        ],
        out_specs=pl.BlockSpec((Bt, Lp), lambda b, t: (b, 0)),
        scratch_shapes=[
            pltpu.VMEM((Bt, Hp), jnp.float32),            # h carry (per b block)
            pltpu.VMEM((Bt, Hp), jnp.float32),            # c carry
            pltpu.VMEM((rows, 4 * Hp), jnp.float32),      # hoisted x@Wih + b
        ],
        compiler_params=pltpu.CompilerParams(
            dimension_semantics=("parallel", "arbitrary"),
            vmem_limit_bytes=vmem_limit),
    )(x, wih_f, whh_f, b_f, wih_b, b_b, wfc_f, wfc_b, bfc)

    return out_p[:B, :L]


# ------------------------- pure-JAX reference -------------------------------
def reference_forward(hidden_states, params, matmul_dtype=jnp.float32):
    """f32 reference; matmul_dtype=bf16 mirrors the kernel's MXU input precision."""
    B, T, E = hidden_states.shape
    H = params["whh_f"].shape[0]

    def mm(a, b):
        return jnp.dot(a.astype(matmul_dtype), b.astype(matmul_dtype),
                       preferred_element_type=jnp.float32)

    def cell(x_t, h, c, wih, whh, b):
        g = mm(x_t, wih) + mm(h, whh) + b
        i = jax.nn.sigmoid(g[:, 0 * H:1 * H])
        f = jax.nn.sigmoid(g[:, 1 * H:2 * H])
        gg = jnp.tanh(g[:, 2 * H:3 * H])
        o = jax.nn.sigmoid(g[:, 3 * H:4 * H])
        c = f * c + i * gg
        h = o * jnp.tanh(c)
        return h, c

    h = jnp.zeros((B, H), jnp.float32)
    c = jnp.zeros((B, H), jnp.float32)
    for t in range(T):
        h, c = cell(hidden_states[:, t, :], h, c,
                    params["wih_f"], params["whh_f"], params["b_f"])
    h_fwd = h
    zero = jnp.zeros((B, H), jnp.float32)
    h_bwd, _ = cell(hidden_states[:, T - 1, :], zero, zero,
                    params["wih_b"], params["whh_b"], params["b_b"])
    feat = jnp.concatenate([h_fwd, h_bwd], axis=1)
    return mm(feat, params["wfc"]) + params["bfc"]


# ------------------------- deterministic param init -------------------------
def init_params(key, embed_dim, hidden_dim, num_labels):
    E, H, L = embed_dim, hidden_dim, num_labels
    k = 1.0 / jnp.sqrt(jnp.float32(H))
    keys = jax.random.split(key, 12)

    def u(kk, shape):
        return jax.random.uniform(kk, shape, jnp.float32, minval=-k, maxval=k)

    # PyTorch nn.LSTM weights: weight_ih (4H, E), weight_hh (4H, H), biases (4H,)
    wih_f = u(keys[0], (4 * H, E));  whh_f = u(keys[1], (4 * H, H))
    bih_f = u(keys[2], (4 * H,));    bhh_f = u(keys[3], (4 * H,))
    wih_b = u(keys[4], (4 * H, E));  whh_b = u(keys[5], (4 * H, H))
    bih_b = u(keys[6], (4 * H,));    bhh_b = u(keys[7], (4 * H,))
    # nn.Linear: weight (L, 2H), bias (L,)
    wfc = u(keys[8], (L, 2 * H));    bfc = u(keys[9], (L,))

    # Pre-transpose for `x @ W`; fold the two LSTM biases together.
    return {
        "wih_f": wih_f.T, "whh_f": whh_f.T, "b_f": (bih_f + bhh_f)[None, :],
        "wih_b": wih_b.T, "whh_b": whh_b.T, "b_b": (bih_b + bhh_b)[None, :],
        "wfc": wfc.T, "bfc": bfc[None, :],
    }


if __name__ == "__main__":
    key = jax.random.PRNGKey(0)
    k_x1, k_x2, k_p = jax.random.split(key, 3)

    B, T, E = 2, 8, 32            # batch, seq len, transformer hidden size
    H, L = 32, 4                  # LSTM hidden_dim, num_labels
    params = init_params(k_p, E, H, L)

    def run(hs, **kw):
        try:
            return bilstm_classifier_forward(hs, params, **kw)
        except Exception:
            # If this JAX version lacks BlockSpec(pipeline_mode=pl.Buffered(1)),
            # fall back to default double-buffered resident weights.
            return bilstm_classifier_forward(
                hs, params, single_buffer_residents=False, **kw)

    # Case 1: tiny shapes, two T chunks (exercises the cross-chunk h/c carry).
    hs1 = jax.random.normal(k_x1, (B, T, E), jnp.float32)
    logits1 = jax.block_until_ready(run(hs1, max_chunk=4))
    assert logits1.shape == (B, L)
    ref1_bf16 = reference_forward(hs1, params, matmul_dtype=jnp.bfloat16)
    assert jnp.allclose(logits1, ref1_bf16, atol=2e-3, rtol=2e-3), (logits1, ref1_bf16)
    ref1_f32 = reference_forward(hs1, params, matmul_dtype=jnp.float32)
    assert jnp.allclose(logits1, ref1_f32, atol=1e-1, rtol=1e-1), (logits1, ref1_f32)

    # Case 2: B=32 -> two batch blocks on the leading "parallel" grid axis.
    B2 = 32
    hs2 = jax.random.normal(k_x2, (B2, T, E), jnp.float32)
    logits2 = jax.block_until_ready(run(hs2, max_chunk=8))
    assert logits2.shape == (B2, L)
    ref2_bf16 = reference_forward(hs2, params, matmul_dtype=jnp.bfloat16)
    assert jnp.allclose(logits2, ref2_bf16, atol=2e-3, rtol=2e-3), (logits2, ref2_bf16)

    print("KERNEL_OK")
</pallas_src>

<mosaic_0001>
module attributes {stable_mosaic.version = 11 : i64} {
  func.func @bilstm_fc_kernel(%arg0: i32, %arg1: i32, %arg2: memref<1x64x128xbf16, #tpu.memory_space<vmem>>, %arg3: memref<128x512xbf16, #tpu.memory_space<vmem>>, %arg4: memref<128x512xbf16, #tpu.memory_space<vmem>>, %arg5: memref<1x512xf32, #tpu.memory_space<vmem>>, %arg6: memref<128x384xbf16, #tpu.memory_space<vmem>>, %arg7: memref<1x384xf32, #tpu.memory_space<vmem>>, %arg8: memref<128x128xbf16, #tpu.memory_space<vmem>>, %arg9: memref<128x128xbf16, #tpu.memory_space<vmem>>, %arg10: memref<1x128xf32, #tpu.memory_space<vmem>>, %arg11: memref<16x128xf32, #tpu.memory_space<vmem>>, %arg12: memref<16x128xf32, #tpu.memory_space<vmem>>, %arg13: memref<16x128xf32, #tpu.memory_space<vmem>>, %arg14: memref<64x512xf32, #tpu.memory_space<vmem>>) attributes {dimension_semantics = [#tpu.dimension_semantics<parallel>, #tpu.dimension_semantics<arbitrary>], iteration_bounds = array<i64: 1, 2>, scalar_prefetch = 0 : i64, scratch_operands = 3 : i64, tpu.core_type = #tpu.core_type<tc>, window_params = [{transform_indices = @transform_0, window_bounds = array<i64: 1, 64, 128>}, {pipeline_mode = #tpu.pipeline_mode<synchronous>, transform_indices = @transform_1, window_bounds = array<i64: 128, 512>}, {pipeline_mode = #tpu.pipeline_mode<synchronous>, transform_indices = @transform_2, window_bounds = array<i64: 128, 512>}, {pipeline_mode = #tpu.pipeline_mode<synchronous>, transform_indices = @transform_3, window_bounds = array<i64: 1, 512>}, {pipeline_mode = #tpu.pipeline_mode<synchronous>, transform_indices = @transform_4, window_bounds = array<i64: 128, 384>}, {pipeline_mode = #tpu.pipeline_mode<synchronous>, transform_indices = @transform_5, window_bounds = array<i64: 1, 384>}, {pipeline_mode = #tpu.pipeline_mode<synchronous>, transform_indices = @transform_6, window_bounds = array<i64: 128, 128>}, {pipeline_mode = #tpu.pipeline_mode<synchronous>, transform_indices = @transform_7, window_bounds = array<i64: 128, 128>}, {pipeline_mode = #tpu.pipeline_mode<synchronous>, transform_indices = @transform_8, window_bounds = array<i64: 1, 128>}, {transform_indices = @transform_9, window_bounds = array<i64: 16, 128>}]} {
    %c0_i32 = arith.constant 0 : i32
    %0 = arith.cmpi eq, %arg1, %c0_i32 : i32
    %1 = arith.extui %0 : i1 to i32
    %c0_i32_0 = arith.constant 0 : i32
    %2 = arith.cmpi ne, %1, %c0_i32_0 : i32
    scf.if %2 {
      %cst_75 = arith.constant 0.000000e+00 : f32
      %174 = vector.broadcast %cst_75 : f32 to vector<16x128xf32>
      %c0_76 = arith.constant 0 : index
      %c0_77 = arith.constant 0 : index
      %175 = vector.load %arg12[%c0_76, %c0_77] : memref<16x128xf32, #tpu.memory_space<vmem>>, vector<16x128xf32>
      tpu.vector_store %arg12[%c0_76, %c0_77], %174 {strides = array<i32>} : memref<16x128xf32, #tpu.memory_space<vmem>>, vector<16x128xf32>,
      %cst_78 = arith.constant 0.000000e+00 : f32
      %176 = vector.broadcast %cst_78 : f32 to vector<16x128xf32>
      %c0_79 = arith.constant 0 : index
      %c0_80 = arith.constant 0 : index
      %177 = vector.load %arg13[%c0_79, %c0_80] : memref<16x128xf32, #tpu.memory_space<vmem>>, vector<16x128xf32>
      tpu.vector_store %arg13[%c0_79, %c0_80], %176 {strides = array<i32>} : memref<16x128xf32, #tpu.memory_space<vmem>>, vector<16x128xf32>,
    } else {
    }
    %c0 = arith.constant 0 : index
    %c0_1 = arith.constant 0 : index
    %c0_2 = arith.constant 0 : index
    %3 = vector.load %arg2[%c0, %c0_1, %c0_2] : memref<1x64x128xbf16, #tpu.memory_space<vmem>>, vector<1x64x128xbf16>
    %4 = vector.shape_cast %3 : vector<1x64x128xbf16> to vector<64x128xbf16>
    %c0_3 = arith.constant 0 : index
    %c0_4 = arith.constant 0 : index
    %5 = vector.load %arg3[%c0_3, %c0_4] : memref<128x512xbf16, #tpu.memory_space<vmem>>, vector<128x512xbf16>
    %cst = arith.constant dense<0.000000e+00> : vector<64x512xf32>
    %6 = tpu.matmul %4, %5, %cst {dimension_numbers = #tpu.dot_dimension_numbers<[1], [0], [0], [1], [0, 0, 1, 1], [], []>} : vector<64x128xbf16>, vector<128x512xbf16>, vector<64x512xf32> -> vector<64x512xf32>
    %c0_5 = arith.constant 0 : index
    %c0_6 = arith.constant 0 : index
    %7 = vector.load %arg5[%c0_5, %c0_6] : memref<1x512xf32, #tpu.memory_space<vmem>>, vector<1x512xf32>
    %8 = vector.broadcast %7 : vector<1x512xf32> to vector<64x512xf32>
    %9 = arith.addf %6, %8 : vector<64x512xf32>
    %c0_7 = arith.constant 0 : index
    %c0_8 = arith.constant 0 : index
    %10 = vector.load %arg14[%c0_7, %c0_8] : memref<64x512xf32, #tpu.memory_space<vmem>>, vector<64x512xf32>
    tpu.vector_store %arg14[%c0_7, %c0_8], %9 {strides = array<i32>} : memref<64x512xf32, #tpu.memory_space<vmem>>, vector<64x512xf32>,
    %c0_9 = arith.constant 0 : index
    %c0_10 = arith.constant 0 : index
    %11 = vector.load %arg12[%c0_9, %c0_10] : memref<16x128xf32, #tpu.memory_space<vmem>>, vector<16x128xf32>
    %c0_11 = arith.constant 0 : index
    %c0_12 = arith.constant 0 : index
    %12 = vector.load %arg13[%c0_11, %c0_12] : memref<16x128xf32, #tpu.memory_space<vmem>>, vector<16x128xf32>
    %c0_i32_13 = arith.constant 0 : i32
    %c16_i32 = arith.constant 16 : i32
    %13 = arith.muli %c0_i32_13, %c16_i32 : i32
    %14 = tpu.assume_multiple %13, 16 : i32
    %15 = arith.index_cast %14 : i32 to index
    %c0_14 = arith.constant 0 : index
    %16 = vector.load %arg14[%15, %c0_14] : memref<64x512xf32, #tpu.memory_space<vmem>>, vector<16x512xf32>
    %17 = arith.truncf %11 : vector<16x128xf32> to vector<16x128xbf16>
    %c0_15 = arith.constant 0 : index
    %c0_16 = arith.constant 0 : index
    %18 = vector.load %arg4[%c0_15, %c0_16] : memref<128x512xbf16, #tpu.memory_space<vmem>>, vector<128x512xbf16>
    %cst_17 = arith.constant dense<0.000000e+00> : vector<16x512xf32>
    %19 = tpu.matmul %17, %18, %cst_17 {dimension_numbers = #tpu.dot_dimension_numbers<[1], [0], [0], [1], [0, 0, 1, 1], [], []>} : vector<16x128xbf16>, vector<128x512xbf16>, vector<16x512xf32> -> vector<16x512xf32>
    %20 = arith.addf %16, %19 : vector<16x512xf32>
    %21 = vector.extract_strided_slice %20 {offsets = [0, 0], sizes = [16, 128], strides = [1, 1]} : vector<16x512xf32> to vector<16x128xf32>
    %cst_18 = arith.constant 5.000000e-01 : f32
    %22 = vector.broadcast %cst_18 : f32 to vector<16x128xf32>
    %23 = arith.mulf %22, %21 : vector<16x128xf32>
    %24 = math.tanh %23 : vector<16x128xf32>
    %cst_19 = arith.constant 1.000000e+00 : f32
    %25 = vector.broadcast %cst_19 : f32 to vector<16x128xf32>
    %26 = arith.addf %24, %25 : vector<16x128xf32>
    %cst_20 = arith.constant 5.000000e-01 : f32
    %27 = vector.broadcast %cst_20 : f32 to vector<16x128xf32>
    %28 = arith.mulf %27, %26 : vector<16x128xf32>
    %29 = vector.extract_strided_slice %20 {offsets = [0, 128], sizes = [16, 128], strides = [1, 1]} : vector<16x512xf32> to vector<16x128xf32>
    %cst_21 = arith.constant 5.000000e-01 : f32
    %30 = vector.broadcast %cst_21 : f32 to vector<16x128xf32>
    %31 = arith.mulf %30, %29 : vector<16x128xf32>
    %32 = math.tanh %31 : vector<16x128xf32>
    %cst_22 = arith.constant 1.000000e+00 : f32
    %33 = vector.broadcast %cst_22 : f32 to vector<16x128xf32>
    %34 = arith.addf %32, %33 : vector<16x128xf32>
    %cst_23 = arith.constant 5.000000e-01 : f32
    %35 = vector.broadcast %cst_23 : f32 to vector<16x128xf32>
    %36 = arith.mulf %35, %34 : vector<16x128xf32>
    %37 = vector.extract_strided_slice %20 {offsets = [0, 256], sizes = [16, 128], strides = [1, 1]} : vector<16x512xf32> to vector<16x128xf32>
    %38 = math.tanh %37 : vector<16x128xf32>
    %39 = vector.extract_strided_slice %20 {offsets = [0, 384], sizes = [16, 128], strides = [1, 1]} : vector<16x512xf32> to vector<16x128xf32>
    %cst_24 = arith.constant 5.000000e-01 : f32
    %40 = vector.broadcast %cst_24 : f32 to vector<16x128xf32>
    %41 = arith.mulf %40, %39 : vector<16x128xf32>
    %42 = math.tanh %41 : vector<16x128xf32>
    %cst_25 = arith.constant 1.000000e+00 : f32
    %43 = vector.broadcast %cst_25 : f32 to vector<16x128xf32>
    %44 = arith.addf %42, %43 : vector<16x128xf32>
    %cst_26 = arith.constant 5.000000e-01 : f32
    %45 = vector.broadcast %cst_26 : f32 to vector<16x128xf32>
    %46 = arith.mulf %45, %44 : vector<16x128xf32>
    %47 = arith.mulf %36, %12 : vector<16x128xf32>
    %48 = arith.mulf %28, %38 : vector<16x128xf32>
    %49 = arith.addf %47, %48 : vector<16x128xf32>
    %50 = math.tanh %49 : vector<16x128xf32>
    %51 = arith.mulf %46, %50 : vector<16x128xf32>
    %c1_i32 = arith.constant 1 : i32
    %c16_i32_27 = arith.constant 16 : i32
    %52 = arith.muli %c1_i32, %c16_i32_27 : i32
    %53 = tpu.assume_multiple %52, 16 : i32
    %54 = arith.index_cast %53 : i32 to index
    %c0_28 = arith.constant 0 : index
    %55 = vector.load %arg14[%54, %c0_28] : memref<64x512xf32, #tpu.memory_space<vmem>>, vector<16x512xf32>
    %56 = arith.truncf %51 : vector<16x128xf32> to vector<16x128xbf16>
    %c0_29 = arith.constant 0 : index
    %c0_30 = arith.constant 0 : index
    %57 = vector.load %arg4[%c0_29, %c0_30] : memref<128x512xbf16, #tpu.memory_space<vmem>>, vector<128x512xbf16>
    %cst_31 = arith.constant dense<0.000000e+00> : vector<16x512xf32>
    %58 = tpu.matmul %56, %57, %cst_31 {dimension_numbers = #tpu.dot_dimension_numbers<[1], [0], [0], [1], [0, 0, 1, 1], [], []>} : vector<16x128xbf16>, vector<128x512xbf16>, vector<16x512xf32> -> vector<16x512xf32>
    %59 = arith.addf %55, %58 : vector<16x512xf32>
    %60 = vector.extract_strided_slice %59 {offsets = [0, 0], sizes = [16, 128], strides = [1, 1]} : vector<16x512xf32> to vector<16x128xf32>
    %cst_32 = arith.constant 5.000000e-01 : f32
    %61 = vector.broadcast %cst_32 : f32 to vector<16x128xf32>
    %62 = arith.mulf %61, %60 : vector<16x128xf32>
    %63 = math.tanh %62 : vector<16x128xf32>
    %cst_33 = arith.constant 1.000000e+00 : f32
    %64 = vector.broadcast %cst_33 : f32 to vector<16x128xf32>
    %65 = arith.addf %63, %64 : vector<16x128xf32>
    %cst_34 = arith.constant 5.000000e-01 : f32
    %66 = vector.broadcast %cst_34 : f32 to vector<16x128xf32>
    %67 = arith.mulf %66, %65 : vector<16x128xf32>
    %68 = vector.extract_strided_slice %59 {offsets = [0, 128], sizes = [16, 128], strides = [1, 1]} : vector<16x512xf32> to vector<16x128xf32>
    %cst_35 = arith.constant 5.000000e-01 : f32
    %69 = vector.broadcast %cst_35 : f32 to vector<16x128xf32>
    %70 = arith.mulf %69, %68 : vector<16x128xf32>
    %71 = math.tanh %70 : vector<16x128xf32>
    %cst_36 = arith.constant 1.000000e+00 : f32
    %72 = vector.broadcast %cst_36 : f32 to vector<16x128xf32>
    %73 = arith.addf %71, %72 : vector<16x128xf32>
    %cst_37 = arith.constant 5.000000e-01 : f32
    %74 = vector.broadcast %cst_37 : f32 to vector<16x128xf32>
    %75 = arith.mulf %74, %73 : vector<16x128xf32>
    %76 = vector.extract_strided_slice %59 {offsets = [0, 256], sizes = [16, 128], strides = [1, 1]} : vector<16x512xf32> to vector<16x128xf32>
    %77 = math.tanh %76 : vector<16x128xf32>
    %78 = vector.extract_strided_slice %59 {offsets = [0, 384], sizes = [16, 128], strides = [1, 1]} : vector<16x512xf32> to vector<16x128xf32>
    %cst_38 = arith.constant 5.000000e-01 : f32
    %79 = vector.broadcast %cst_38 : f32 to vector<16x128xf32>
    %80 = arith.mulf %79, %78 : vector<16x128xf32>
    %81 = math.tanh %80 : vector<16x128xf32>
    %cst_39 = arith.constant 1.000000e+00 : f32
    %82 = vector.broadcast %cst_39 : f32 to vector<16x128xf32>
    %83 = arith.addf %81, %82 : vector<16x128xf32>
    %cst_40 = arith.constant 5.000000e-01 : f32
    %84 = vector.broadcast %cst_40 : f32 to vector<16x128xf32>
    %85 = arith.mulf %84, %83 : vector<16x128xf32>
    %86 = arith.mulf %75, %49 : vector<16x128xf32>
    %87 = arith.mulf %67, %77 : vector<16x128xf32>
    %88 = arith.addf %86, %87 : vector<16x128xf32>
    %89 = math.tanh %88 : vector<16x128xf32>
    %90 = arith.mulf %85, %89 : vector<16x128xf32>
    %c2_i32 = arith.constant 2 : i32
    %c16_i32_41 = arith.constant 16 : i32
    %91 = arith.muli %c2_i32, %c16_i32_41 : i32
    %92 = tpu.assume_multiple %91, 16 : i32
    %93 = arith.index_cast %92 : i32 to index
    %c0_42 = arith.constant 0 : index
    %94 = vector.load %arg14[%93, %c0_42] : memref<64x512xf32, #tpu.memory_space<vmem>>, vector<16x512xf32>
    %95 = arith.truncf %90 : vector<16x128xf32> to vector<16x128xbf16>
    %c0_43 = arith.constant 0 : index
    %c0_44 = arith.constant 0 : index
    %96 = vector.load %arg4[%c0_43, %c0_44] : memref<128x512xbf16, #tpu.memory_space<vmem>>, vector<128x512xbf16>
    %cst_45 = arith.constant dense<0.000000e+00> : vector<16x512xf32>
    %97 = tpu.matmul %95, %96, %cst_45 {dimension_numbers = #tpu.dot_dimension_numbers<[1], [0], [0], [1], [0, 0, 1, 1], [], []>} : vector<16x128xbf16>, vector<128x512xbf16>, vector<16x512xf32> -> vector<16x512xf32>
    %98 = arith.addf %94, %97 : vector<16x512xf32>
    %99 = vector.extract_strided_slice %98 {offsets = [0, 0], sizes = [16, 128], strides = [1, 1]} : vector<16x512xf32> to vector<16x128xf32>
    %cst_46 = arith.constant 5.000000e-01 : f32
    %100 = vector.broadcast %cst_46 : f32 to vector<16x128xf32>
    %101 = arith.mulf %100, %99 : vector<16x128xf32>
    %102 = math.tanh %101 : vector<16x128xf32>
    %cst_47 = arith.constant 1.000000e+00 : f32
    %103 = vector.broadcast %cst_47 : f32 to vector<16x128xf32>
    %104 = arith.addf %102, %103 : vector<16x128xf32>
    %cst_48 = arith.constant 5.000000e-01 : f32
    %105 = vector.broadcast %cst_48 : f32 to vector<16x128xf32>
    %106 = arith.mulf %105, %104 : vector<16x128xf32>
    %107 = vector.extract_strided_slice %98 {offsets = [0, 128], sizes = [16, 128], strides = [1, 1]} : vector<16x512xf32> to vector<16x128xf32>
    %cst_49 = arith.constant 5.000000e-01 : f32
    %108 = vector.broadcast %cst_49 : f32 to vector<16x128xf32>
    %109 = arith.mulf %108, %107 : vector<16x128xf32>
    %110 = math.tanh %109 : vector<16x128xf32>
    %cst_50 = arith.constant 1.000000e+00 : f32
    %111 = vector.broadcast %cst_50 : f32 to vector<16x128xf32>
    %112 = arith.addf %110, %111 : vector<16x128xf32>
    %cst_51 = arith.constant 5.000000e-01 : f32
    %113 = vector.broadcast %cst_51 : f32 to vector<16x128xf32>
    %114 = arith.mulf %113, %112 : vector<16x128xf32>
    %115 = vector.extract_strided_slice %98 {offsets = [0, 256], sizes = [16, 128], strides = [1, 1]} : vector<16x512xf32> to vector<16x128xf32>
    %116 = math.tanh %115 : vector<16x128xf32>
    %117 = vector.extract_strided_slice %98 {offsets = [0, 384], sizes = [16, 128], strides = [1, 1]} : vector<16x512xf32> to vector<16x128xf32>
    %cst_52 = arith.constant 5.000000e-01 : f32
    %118 = vector.broadcast %cst_52 : f32 to vector<16x128xf32>
    %119 = arith.mulf %118, %117 : vector<16x128xf32>
    %120 = math.tanh %119 : vector<16x128xf32>
    %cst_53 = arith.constant 1.000000e+00 : f32
    %121 = vector.broadcast %cst_53 : f32 to vector<16x128xf32>
    %122 = arith.addf %120, %121 : vector<16x128xf32>
    %cst_54 = arith.constant 5.000000e-01 : f32
    %123 = vector.broadcast %cst_54 : f32 to vector<16x128xf32>
    %124 = arith.mulf %123, %122 : vector<16x128xf32>
    %125 = arith.mulf %114, %88 : vector<16x128xf32>
    %126 = arith.mulf %106, %116 : vector<16x128xf32>
    %127 = arith.addf %125, %126 : vector<16x128xf32>
    %128 = math.tanh %127 : vector<16x128xf32>
    %129 = arith.mulf %124, %128 : vector<16x128xf32>
    %c3_i32 = arith.constant 3 : i32
    %c16_i32_55 = arith.constant 16 : i32
    %130 = arith.muli %c3_i32, %c16_i32_55 : i32
    %131 = tpu.assume_multiple %130, 16 : i32
    %132 = arith.index_cast %131 : i32 to index
    %c0_56 = arith.constant 0 : index
    %133 = vector.load %arg14[%132, %c0_56] : memref<64x512xf32, #tpu.memory_space<vmem>>, vector<16x512xf32>
    %134 = arith.truncf %129 : vector<16x128xf32> to vector<16x128xbf16>
    %c0_57 = arith.constant 0 : index
    %c0_58 = arith.constant 0 : index
    %135 = vector.load %arg4[%c0_57, %c0_58] : memref<128x512xbf16, #tpu.memory_space<vmem>>, vector<128x512xbf16>
    %cst_59 = arith.constant dense<0.000000e+00> : vector<16x512xf32>
    %136 = tpu.matmul %134, %135, %cst_59 {dimension_numbers = #tpu.dot_dimension_numbers<[1], [0], [0], [1], [0, 0, 1, 1], [], []>} : vector<16x128xbf16>, vector<128x512xbf16>, vector<16x512xf32> -> vector<16x512xf32>
    %137 = arith.addf %133, %136 : vector<16x512xf32>
    %138 = vector.extract_strided_slice %137 {offsets = [0, 0], sizes = [16, 128], strides = [1, 1]} : vector<16x512xf32> to vector<16x128xf32>
    %cst_60 = arith.constant 5.000000e-01 : f32
    %139 = vector.broadcast %cst_60 : f32 to vector<16x128xf32>
    %140 = arith.mulf %139, %138 : vector<16x128xf32>
    %141 = math.tanh %140 : vector<16x128xf32>
    %cst_61 = arith.constant 1.000000e+00 : f32
    %142 = vector.broadcast %cst_61 : f32 to vector<16x128xf32>
    %143 = arith.addf %141, %142 : vector<16x128xf32>
    %cst_62 = arith.constant 5.000000e-01 : f32
    %144 = vector.broadcast %cst_62 : f32 to vector<16x128xf32>
    %145 = arith.mulf %144, %143 : vector<16x128xf32>
    %146 = vector.extract_strided_slice %137 {offsets = [0, 128], sizes = [16, 128], strides = [1, 1]} : vector<16x512xf32> to vector<16x128xf32>
    %cst_63 = arith.constant 5.000000e-01 : f32
    %147 = vector.broadcast %cst_63 : f32 to vector<16x128xf32>
    %148 = arith.mulf %147, %146 : vector<16x128xf32>
    %149 = math.tanh %148 : vector<16x128xf32>
    %cst_64 = arith.constant 1.000000e+00 : f32
    %150 = vector.broadcast %cst_64 : f32 to vector<16x128xf32>
    %151 = arith.addf %149, %150 : vector<16x128xf32>
    %cst_65 = arith.constant 5.000000e-01 : f32
    %152 = vector.broadcast %cst_65 : f32 to vector<16x128xf32>
    %153 = arith.mulf %152, %151 : vector<16x128xf32>
    %154 = vector.extract_strided_slice %137 {offsets = [0, 256], sizes = [16, 128], strides = [1, 1]} : vector<16x512xf32> to vector<16x128xf32>
    %155 = math.tanh %154 : vector<16x128xf32>
    %156 = vector.extract_strided_slice %137 {offsets = [0, 384], sizes = [16, 128], strides = [1, 1]} : vector<16x512xf32> to vector<16x128xf32>
    %cst_66 = arith.constant 5.000000e-01 : f32
    %157 = vector.broadcast %cst_66 : f32 to vector<16x128xf32>
    %158 = arith.mulf %157, %156 : vector<16x128xf32>
    %159 = math.tanh %158 : vector<16x128xf32>
    %cst_67 = arith.constant 1.000000e+00 : f32
    %160 = vector.broadcast %cst_67 : f32 to vector<16x128xf32>
    %161 = arith.addf %159, %160 : vector<16x128xf32>
    %cst_68 = arith.constant 5.000000e-01 : f32
    %162 = vector.broadcast %cst_68 : f32 to vector<16x128xf32>
    %163 = arith.mulf %162, %161 : vector<16x128xf32>
    %164 = arith.mulf %153, %127 : vector<16x128xf32>
    %165 = arith.mulf %145, %155 : vector<16x128xf32>
    %166 = arith.addf %164, %165 : vector<16x128xf32>
    %167 = math.tanh %166 : vector<16x128xf32>
    %168 = arith.mulf %163, %167 : vector<16x128xf32>
    %c4_i32 = arith.constant 4 : i32
    %c0_69 = arith.constant 0 : index
    %c0_70 = arith.constant 0 : index
    %169 = vector.load %arg12[%c0_69, %c0_70] : memref<16x128xf32, #tpu.memory_space<vmem>>, vector<16x128xf32>
    tpu.vector_store %arg12[%c0_69, %c0_70], %168 {strides = array<i32>} : memref<16x128xf32, #tpu.memory_space<vmem>>, vector<16x128xf32>,
    %c0_71 = arith.constant 0 : index
    %c0_72 = arith.constant 0 : index
    %170 = vector.load %arg13[%c0_71, %c0_72] : memref<16x128xf32, #tpu.memory_space<vmem>>, vector<16x128xf32>
    tpu.vector_store %arg13[%c0_71, %c0_72], %166 {strides = array<i32>} : memref<16x128xf32, #tpu.memory_space<vmem>>, vector<16x128xf32>,
    %c1_i32_73 = arith.constant 1 : i32
    %171 = arith.cmpi eq, %arg1, %c1_i32_73 : i32
    %172 = arith.extui %171 : i1 to i32
    %c0_i32_74 = arith.constant 0 : i32
    %173 = arith.cmpi ne, %172, %c0_i32_74 : i32
    scf.if %173 {
      %174 = vector.extract_strided_slice %4 {offsets = [48, 0], sizes = [16, 128], strides = [1, 1]} : vector<64x128xbf16> to vector<16x128xbf16>
      %c0_75 = arith.constant 0 : index
      %c0_76 = arith.constant 0 : index
      %175 = vector.load %arg6[%c0_75, %c0_76] : memref<128x384xbf16, #tpu.memory_space<vmem>>, vector<128x384xbf16>
      %cst_77 = arith.constant dense<0.000000e+00> : vector<16x384xf32>
      %176 = tpu.matmul %174, %175, %cst_77 {dimension_numbers = #tpu.dot_dimension_numbers<[1], [0], [0], [1], [0, 0, 1, 1], [], []>} : vector<16x128xbf16>, vector<128x384xbf16>, vector<16x384xf32> -> vector<16x384xf32>
      %c0_78 = arith.constant 0 : index
      %c0_79 = arith.constant 0 : index
      %177 = vector.load %arg7[%c0_78, %c0_79] : memref<1x384xf32, #tpu.memory_space<vmem>>, vector<1x384xf32>
      %178 = vector.broadcast %177 : vector<1x384xf32> to vector<16x384xf32>
      %179 = arith.addf %176, %178 : vector<16x384xf32>
      %180 = vector.extract_strided_slice %179 {offsets = [0, 0], sizes = [16, 128], strides = [1, 1]} : vector<16x384xf32> to vector<16x128xf32>
      %cst_80 = arith.constant 5.000000e-01 : f32
      %181 = vector.broadcast %cst_80 : f32 to vector<16x128xf32>
      %182 = arith.mulf %181, %180 : vector<16x128xf32>
      %183 = math.tanh %182 : vector<16x128xf32>
      %cst_81 = arith.constant 1.000000e+00 : f32
      %184 = vector.broadcast %cst_81 : f32 to vector<16x128xf32>
      %185 = arith.addf %183, %184 : vector<16x128xf32>
      %cst_82 = arith.constant 5.000000e-01 : f32
      %186 = vector.broadcast %cst_82 : f32 to vector<16x128xf32>
      %187 = arith.mulf %186, %185 : vector<16x128xf32>
      %188 = vector.extract_strided_slice %179 {offsets = [0, 128], sizes = [16, 128], strides = [1, 1]} : vector<16x384xf32> to vector<16x128xf32>
      %189 = math.tanh %188 : vector<16x128xf32>
      %190 = vector.extract_strided_slice %179 {offsets = [0, 256], sizes = [16, 128], strides = [1, 1]} : vector<16x384xf32> to vector<16x128xf32>
      %cst_83 = arith.constant 5.000000e-01 : f32
      %191 = vector.broadcast %cst_83 : f32 to vector<16x128xf32>
      %192 = arith.mulf %191, %190 : vector<16x128xf32>
      %193 = math.tanh %192 : vector<16x128xf32>
      %cst_84 = arith.constant 1.000000e+00 : f32
      %194 = vector.broadcast %cst_84 : f32 to vector<16x128xf32>
      %195 = arith.addf %193, %194 : vector<16x128xf32>
      %cst_85 = arith.constant 5.000000e-01 : f32
      %196 = vector.broadcast %cst_85 : f32 to vector<16x128xf32>
      %197 = arith.mulf %196, %195 : vector<16x128xf32>
      %198 = arith.mulf %187, %189 : vector<16x128xf32>
      %199 = math.tanh %198 : vector<16x128xf32>
      %200 = arith.mulf %197, %199 : vector<16x128xf32>
      %201 = arith.truncf %168 : vector<16x128xf32> to vector<16x128xbf16>
      %c0_86 = arith.constant 0 : index
      %c0_87 = arith.constant 0 : index
      %202 = vector.load %arg8[%c0_86, %c0_87] : memref<128x128xbf16, #tpu.memory_space<vmem>>, vector<128x128xbf16>
      %cst_88 = arith.constant dense<0.000000e+00> : vector<16x128xf32>
      %203 = tpu.matmul %201, %202, %cst_88 {dimension_numbers = #tpu.dot_dimension_numbers<[1], [0], [0], [1], [0, 0, 1, 1], [], []>} : vector<16x128xbf16>, vector<128x128xbf16>, vector<16x128xf32> -> vector<16x128xf32>
      %204 = arith.truncf %200 : vector<16x128xf32> to vector<16x128xbf16>
      %c0_89 = arith.constant 0 : index
      %c0_90 = arith.constant 0 : index
      %205 = vector.load %arg9[%c0_89, %c0_90] : memref<128x128xbf16, #tpu.memory_space<vmem>>, vector<128x128xbf16>
      %cst_91 = arith.constant dense<0.000000e+00> : vector<16x128xf32>
      %206 = tpu.matmul %204, %205, %cst_91 {dimension_numbers = #tpu.dot_dimension_numbers<[1], [0], [0], [1], [0, 0, 1, 1], [], []>} : vector<16x128xbf16>, vector<128x128xbf16>, vector<16x128xf32> -> vector<16x128xf32>
      %207 = arith.addf %203, %206 : vector<16x128xf32>
      %c0_92 = arith.constant 0 : index
      %c0_93 = arith.constant 0 : index
      %208 = vector.load %arg10[%c0_92, %c0_93] : memref<1x128xf32, #tpu.memory_space<vmem>>, vector<1x128xf32>
      %209 = vector.broadcast %208 : vector<1x128xf32> to vector<16x128xf32>
      %210 = arith.addf %207, %209 : vector<16x128xf32>
      %c0_94 = arith.constant 0 : index
      %c0_95 = arith.constant 0 : index
      %211 = vector.load %arg11[%c0_94, %c0_95] : memref<16x128xf32, #tpu.memory_space<vmem>>, vector<16x128xf32>
      tpu.vector_store %arg11[%c0_94, %c0_95], %210 {strides = array<i32>} : memref<16x128xf32, #tpu.memory_space<vmem>>, vector<16x128xf32>,
    } else {
    }
    return
  }
  func.func @transform_0(%arg0: i32, %arg1: i32) -> (i32, i32, i32) {
    %c0_i32 = arith.constant 0 : i32
    %c0_i32_0 = arith.constant 0 : i32
    return %arg0, %arg1, %c0_i32 : i32, i32, i32
  }
  func.func @transform_1(%arg0: i32, %arg1: i32) -> (i32, i32) {
    %c0_i32 = arith.constant 0 : i32
    %c0_i32_0 = arith.constant 0 : i32
    %c0_i32_1 = arith.constant 0 : i32
    return %c0_i32, %c0_i32_0 : i32, i32
  }
  func.func @transform_2(%arg0: i32, %arg1: i32) -> (i32, i32) {
    %c0_i32 = arith.constant 0 : i32
    %c0_i32_0 = arith.constant 0 : i32
    %c0_i32_1 = arith.constant 0 : i32
    return %c0_i32, %c0_i32_0 : i32, i32
  }
  func.func @transform_3(%arg0: i32, %arg1: i32) -> (i32, i32) {
    %c0_i32 = arith.constant 0 : i32
    %c0_i32_0 = arith.constant 0 : i32
    %c0_i32_1 = arith.constant 0 : i32
    return %c0_i32, %c0_i32_0 : i32, i32
  }
  func.func @transform_4(%arg0: i32, %arg1: i32) -> (i32, i32) {
    %c0_i32 = arith.constant 0 : i32
    %c0_i32_0 = arith.constant 0 : i32
    %c0_i32_1 = arith.constant 0 : i32
    return %c0_i32, %c0_i32_0 : i32, i32
  }
  func.func @transform_5(%arg0: i32, %arg1: i32) -> (i32, i32) {
    %c0_i32 = arith.constant 0 : i32
    %c0_i32_0 = arith.constant 0 : i32
    %c0_i32_1 = arith.constant 0 : i32
    return %c0_i32, %c0_i32_0 : i32, i32
  }
  func.func @transform_6(%arg0: i32, %arg1: i32) -> (i32, i32) {
    %c0_i32 = arith.constant 0 : i32
    %c0_i32_0 = arith.constant 0 : i32
    %c0_i32_1 = arith.constant 0 : i32
    return %c0_i32, %c0_i32_0 : i32, i32
  }
  func.func @transform_7(%arg0: i32, %arg1: i32) -> (i32, i32) {
    %c0_i32 = arith.constant 0 : i32
    %c0_i32_0 = arith.constant 0 : i32
    %c0_i32_1 = arith.constant 0 : i32
    return %c0_i32, %c0_i32_0 : i32, i32
  }
  func.func @transform_8(%arg0: i32, %arg1: i32) -> (i32, i32) {
    %c0_i32 = arith.constant 0 : i32
    %c0_i32_0 = arith.constant 0 : i32
    %c0_i32_1 = arith.constant 0 : i32
    return %c0_i32, %c0_i32_0 : i32, i32
  }
  func.func @transform_9(%arg0: i32, %arg1: i32) -> (i32, i32) {
    %c0_i32 = arith.constant 0 : i32
    %c0_i32_0 = arith.constant 0 : i32
    return %arg0, %c0_i32 : i32, i32
  }
}

module attributes {stable_mosaic.version = 11 : i64} {
  func.func @bilstm_fc_kernel(%arg0: i32, %arg1: i32, %arg2: memref<1x64x128xbf16, #tpu.memory_space<vmem>>, %arg3: memref<128x512xbf16, #tpu.memory_space<vmem>>, %arg4: memref<128x512xbf16, #tpu.memory_space<vmem>>, %arg5: memref<1x512xf32, #tpu.memory_space<vmem>>, %arg6: memref<128x384xbf16, #tpu.memory_space<vmem>>, %arg7: memref<1x384xf32, #tpu.memory_space<vmem>>, %arg8: memref<128x128xbf16, #tpu.memory_space<vmem>>, %arg9: memref<128x128xbf16, #tpu.memory_space<vmem>>, %arg10: memref<1x128xf32, #tpu.memory_space<vmem>>, %arg11: memref<16x128xf32, #tpu.memory_space<vmem>>, %arg12: memref<16x128xf32, #tpu.memory_space<vmem>>, %arg13: memref<16x128xf32, #tpu.memory_space<vmem>>, %arg14: memref<64x512xf32, #tpu.memory_space<vmem>>) attributes {dimension_semantics = [#tpu.dimension_semantics<parallel>, #tpu.dimension_semantics<arbitrary>], iteration_bounds = array<i64: 1, 2>, scalar_prefetch = 0 : i64, scratch_operands = 3 : i64, tpu.core_type = #tpu.core_type<tc>, window_params = [{transform_indices = @transform_0, window_bounds = array<i64: 1, 64, 128>}, {pipeline_mode = #tpu.pipeline_mode<synchronous>, transform_indices = @transform_1, window_bounds = array<i64: 128, 512>}, {pipeline_mode = #tpu.pipeline_mode<synchronous>, transform_indices = @transform_2, window_bounds = array<i64: 128, 512>}, {pipeline_mode = #tpu.pipeline_mode<synchronous>, transform_indices = @transform_3, window_bounds = array<i64: 1, 512>}, {pipeline_mode = #tpu.pipeline_mode<synchronous>, transform_indices = @transform_4, window_bounds = array<i64: 128, 384>}, {pipeline_mode = #tpu.pipeline_mode<synchronous>, transform_indices = @transform_5, window_bounds = array<i64: 1, 384>}, {pipeline_mode = #tpu.pipeline_mode<synchronous>, transform_indices = @transform_6, window_bounds = array<i64: 128, 128>}, {pipeline_mode = #tpu.pipeline_mode<synchronous>, transform_indices = @transform_7, window_bounds = array<i64: 128, 128>}, {pipeline_mode = #tpu.pipeline_mode<synchronous>, transform_indices = @transform_8, window_bounds = array<i64: 1, 128>}, {transform_indices = @transform_9, window_bounds = array<i64: 16, 128>}]} {
    %c0_i32 = arith.constant 0 : i32
    %0 = arith.cmpi eq, %arg1, %c0_i32 : i32
    %1 = arith.extui %0 : i1 to i32
    %c0_i32_0 = arith.constant 0 : i32
    %2 = arith.cmpi ne, %1, %c0_i32_0 : i32
    scf.if %2 {
      %cst_75 = arith.constant 0.000000e+00 : f32
      %174 = vector.broadcast %cst_75 : f32 to vector<16x128xf32>
      %c0_76 = arith.constant 0 : index
      %c0_77 = arith.constant 0 : index
      %175 = vector.load %arg12[%c0_76, %c0_77] : memref<16x128xf32, #tpu.memory_space<vmem>>, vector<16x128xf32>
      tpu.vector_store %arg12[%c0_76, %c0_77], %174 {strides = array<i32>} : memref<16x128xf32, #tpu.memory_space<vmem>>, vector<16x128xf32>,
      %cst_78 = arith.constant 0.000000e+00 : f32
      %176 = vector.broadcast %cst_78 : f32 to vector<16x128xf32>
      %c0_79 = arith.constant 0 : index
      %c0_80 = arith.constant 0 : index
      %177 = vector.load %arg13[%c0_79, %c0_80] : memref<16x128xf32, #tpu.memory_space<vmem>>, vector<16x128xf32>
      tpu.vector_store %arg13[%c0_79, %c0_80], %176 {strides = array<i32>} : memref<16x128xf32, #tpu.memory_space<vmem>>, vector<16x128xf32>,
    } else {
    }
    %c0 = arith.constant 0 : index
    %c0_1 = arith.constant 0 : index
    %c0_2 = arith.constant 0 : index
    %3 = vector.load %arg2[%c0, %c0_1, %c0_2] : memref<1x64x128xbf16, #tpu.memory_space<vmem>>, vector<1x64x128xbf16>
    %4 = vector.shape_cast %3 : vector<1x64x128xbf16> to vector<64x128xbf16>
    %c0_3 = arith.constant 0 : index
    %c0_4 = arith.constant 0 : index
    %5 = vector.load %arg3[%c0_3, %c0_4] : memref<128x512xbf16, #tpu.memory_space<vmem>>, vector<128x512xbf16>
    %cst = arith.constant dense<0.000000e+00> : vector<64x512xf32>
    %6 = tpu.matmul %4, %5, %cst {dimension_numbers = #tpu.dot_dimension_numbers<[1], [0], [0], [1], [0, 0, 1, 1], [], []>} : vector<64x128xbf16>, vector<128x512xbf16>, vector<64x512xf32> -> vector<64x512xf32>
    %c0_5 = arith.constant 0 : index
    %c0_6 = arith.constant 0 : index
    %7 = vector.load %arg5[%c0_5, %c0_6] : memref<1x512xf32, #tpu.memory_space<vmem>>, vector<1x512xf32>
    %8 = vector.broadcast %7 : vector<1x512xf32> to vector<64x512xf32>
    %9 = arith.addf %6, %8 : vector<64x512xf32>
    %c0_7 = arith.constant 0 : index
    %c0_8 = arith.constant 0 : index
    %10 = vector.load %arg14[%c0_7, %c0_8] : memref<64x512xf32, #tpu.memory_space<vmem>>, vector<64x512xf32>
    tpu.vector_store %arg14[%c0_7, %c0_8], %9 {strides = array<i32>} : memref<64x512xf32, #tpu.memory_space<vmem>>, vector<64x512xf32>,
    %c0_9 = arith.constant 0 : index
    %c0_10 = arith.constant 0 : index
    %11 = vector.load %arg12[%c0_9, %c0_10] : memref<16x128xf32, #tpu.memory_space<vmem>>, vector<16x128xf32>
    %c0_11 = arith.constant 0 : index
    %c0_12 = arith.constant 0 : index
    %12 = vector.load %arg13[%c0_11, %c0_12] : memref<16x128xf32, #tpu.memory_space<vmem>>, vector<16x128xf32>
    %c0_i32_13 = arith.constant 0 : i32
    %c16_i32 = arith.constant 16 : i32
    %13 = arith.muli %c0_i32_13, %c16_i32 : i32
    %14 = tpu.assume_multiple %13, 16 : i32
    %15 = arith.index_cast %14 : i32 to index
    %c0_14 = arith.constant 0 : index
    %16 = vector.load %arg14[%15, %c0_14] : memref<64x512xf32, #tpu.memory_space<vmem>>, vector<16x512xf32>
    %17 = arith.truncf %11 : vector<16x128xf32> to vector<16x128xbf16>
    %c0_15 = arith.constant 0 : index
    %c0_16 = arith.constant 0 : index
    %18 = vector.load %arg4[%c0_15, %c0_16] : memref<128x512xbf16, #tpu.memory_space<vmem>>, vector<128x512xbf16>
    %cst_17 = arith.constant dense<0.000000e+00> : vector<16x512xf32>
    %19 = tpu.matmul %17, %18, %cst_17 {dimension_numbers = #tpu.dot_dimension_numbers<[1], [0], [0], [1], [0, 0, 1, 1], [], []>} : vector<16x128xbf16>, vector<128x512xbf16>, vector<16x512xf32> -> vector<16x512xf32>
    %20 = arith.addf %16, %19 : vector<16x512xf32>
    %21 = vector.extract_strided_slice %20 {offsets = [0, 0], sizes = [16, 128], strides = [1, 1]} : vector<16x512xf32> to vector<16x128xf32>
    %cst_18 = arith.constant 5.000000e-01 : f32
    %22 = vector.broadcast %cst_18 : f32 to vector<16x128xf32>
    %23 = arith.mulf %22, %21 : vector<16x128xf32>
    %24 = math.tanh %23 : vector<16x128xf32>
    %cst_19 = arith.constant 1.000000e+00 : f32
    %25 = vector.broadcast %cst_19 : f32 to vector<16x128xf32>
    %26 = arith.addf %24, %25 : vector<16x128xf32>
    %cst_20 = arith.constant 5.000000e-01 : f32
    %27 = vector.broadcast %cst_20 : f32 to vector<16x128xf32>
    %28 = arith.mulf %27, %26 : vector<16x128xf32>
    %29 = vector.extract_strided_slice %20 {offsets = [0, 128], sizes = [16, 128], strides = [1, 1]} : vector<16x512xf32> to vector<16x128xf32>
    %cst_21 = arith.constant 5.000000e-01 : f32
    %30 = vector.broadcast %cst_21 : f32 to vector<16x128xf32>
    %31 = arith.mulf %30, %29 : vector<16x128xf32>
    %32 = math.tanh %31 : vector<16x128xf32>
    %cst_22 = arith.constant 1.000000e+00 : f32
    %33 = vector.broadcast %cst_22 : f32 to vector<16x128xf32>
    %34 = arith.addf %32, %33 : vector<16x128xf32>
    %cst_23 = arith.constant 5.000000e-01 : f32
    %35 = vector.broadcast %cst_23 : f32 to vector<16x128xf32>
    %36 = arith.mulf %35, %34 : vector<16x128xf32>
    %37 = vector.extract_strided_slice %20 {offsets = [0, 256], sizes = [16, 128], strides = [1, 1]} : vector<16x512xf32> to vector<16x128xf32>
    %38 = math.tanh %37 : vector<16x128xf32>
    %39 = vector.extract_strided_slice %20 {offsets = [0, 384], sizes = [16, 128], strides = [1, 1]} : vector<16x512xf32> to vector<16x128xf32>
    %cst_24 = arith.constant 5.000000e-01 : f32
    %40 = vector.broadcast %cst_24 : f32 to vector<16x128xf32>
    %41 = arith.mulf %40, %39 : vector<16x128xf32>
    %42 = math.tanh %41 : vector<16x128xf32>
    %cst_25 = arith.constant 1.000000e+00 : f32
    %43 = vector.broadcast %cst_25 : f32 to vector<16x128xf32>
    %44 = arith.addf %42, %43 : vector<16x128xf32>
    %cst_26 = arith.constant 5.000000e-01 : f32
    %45 = vector.broadcast %cst_26 : f32 to vector<16x128xf32>
    %46 = arith.mulf %45, %44 : vector<16x128xf32>
    %47 = arith.mulf %36, %12 : vector<16x128xf32>
    %48 = arith.mulf %28, %38 : vector<16x128xf32>
    %49 = arith.addf %47, %48 : vector<16x128xf32>
    %50 = math.tanh %49 : vector<16x128xf32>
    %51 = arith.mulf %46, %50 : vector<16x128xf32>
    %c1_i32 = arith.constant 1 : i32
    %c16_i32_27 = arith.constant 16 : i32
    %52 = arith.muli %c1_i32, %c16_i32_27 : i32
    %53 = tpu.assume_multiple %52, 16 : i32
    %54 = arith.index_cast %53 : i32 to index
    %c0_28 = arith.constant 0 : index
    %55 = vector.load %arg14[%54, %c0_28] : memref<64x512xf32, #tpu.memory_space<vmem>>, vector<16x512xf32>
    %56 = arith.truncf %51 : vector<16x128xf32> to vector<16x128xbf16>
    %c0_29 = arith.constant 0 : index
    %c0_30 = arith.constant 0 : index
    %57 = vector.load %arg4[%c0_29, %c0_30] : memref<128x512xbf16, #tpu.memory_space<vmem>>, vector<128x512xbf16>
    %cst_31 = arith.constant dense<0.000000e+00> : vector<16x512xf32>
    %58 = tpu.matmul %56, %57, %cst_31 {dimension_numbers = #tpu.dot_dimension_numbers<[1], [0], [0], [1], [0, 0, 1, 1], [], []>} : vector<16x128xbf16>, vector<128x512xbf16>, vector<16x512xf32> -> vector<16x512xf32>
    %59 = arith.addf %55, %58 : vector<16x512xf32>
    %60 = vector.extract_strided_slice %59 {offsets = [0, 0], sizes = [16, 128], strides = [1, 1]} : vector<16x512xf32> to vector<16x128xf32>
    %cst_32 = arith.constant 5.000000e-01 : f32
    %61 = vector.broadcast %cst_32 : f32 to vector<16x128xf32>
    %62 = arith.mulf %61, %60 : vector<16x128xf32>
    %63 = math.tanh %62 : vector<16x128xf32>
    %cst_33 = arith.constant 1.000000e+00 : f32
    %64 = vector.broadcast %cst_33 : f32 to vector<16x128xf32>
    %65 = arith.addf %63, %64 : vector<16x128xf32>
    %cst_34 = arith.constant 5.000000e-01 : f32
    %66 = vector.broadcast %cst_34 : f32 to vector<16x128xf32>
    %67 = arith.mulf %66, %65 : vector<16x128xf32>
    %68 = vector.extract_strided_slice %59 {offsets = [0, 128], sizes = [16, 128], strides = [1, 1]} : vector<16x512xf32> to vector<16x128xf32>
    %cst_35 = arith.constant 5.000000e-01 : f32
    %69 = vector.broadcast %cst_35 : f32 to vector<16x128xf32>
    %70 = arith.mulf %69, %68 : vector<16x128xf32>
    %71 = math.tanh %70 : vector<16x128xf32>
    %cst_36 = arith.constant 1.000000e+00 : f32
    %72 = vector.broadcast %cst_36 : f32 to vector<16x128xf32>
    %73 = arith.addf %71, %72 : vector<16x128xf32>
    %cst_37 = arith.constant 5.000000e-01 : f32
    %74 = vector.broadcast %cst_37 : f32 to vector<16x128xf32>
    %75 = arith.mulf %74, %73 : vector<16x128xf32>
    %76 = vector.extract_strided_slice %59 {offsets = [0, 256], sizes = [16, 128], strides = [1, 1]} : vector<16x512xf32> to vector<16x128xf32>
    %77 = math.tanh %76 : vector<16x128xf32>
    %78 = vector.extract_strided_slice %59 {offsets = [0, 384], sizes = [16, 128], strides = [1, 1]} : vector<16x512xf32> to vector<16x128xf32>
    %cst_38 = arith.constant 5.000000e-01 : f32
    %79 = vector.broadcast %cst_38 : f32 to vector<16x128xf32>
    %80 = arith.mulf %79, %78 : vector<16x128xf32>
    %81 = math.tanh %80 : vector<16x128xf32>
    %cst_39 = arith.constant 1.000000e+00 : f32
    %82 = vector.broadcast %cst_39 : f32 to vector<16x128xf32>
    %83 = arith.addf %81, %82 : vector<16x128xf32>
    %cst_40 = arith.constant 5.000000e-01 : f32
    %84 = vector.broadcast %cst_40 : f32 to vector<16x128xf32>
    %85 = arith.mulf %84, %83 : vector<16x128xf32>
    %86 = arith.mulf %75, %49 : vector<16x128xf32>
    %87 = arith.mulf %67, %77 : vector<16x128xf32>
    %88 = arith.addf %86, %87 : vector<16x128xf32>
    %89 = math.tanh %88 : vector<16x128xf32>
    %90 = arith.mulf %85, %89 : vector<16x128xf32>
    %c2_i32 = arith.constant 2 : i32
    %c16_i32_41 = arith.constant 16 : i32
    %91 = arith.muli %c2_i32, %c16_i32_41 : i32
    %92 = tpu.assume_multiple %91, 16 : i32
    %93 = arith.index_cast %92 : i32 to index
    %c0_42 = arith.constant 0 : index
    %94 = vector.load %arg14[%93, %c0_42] : memref<64x512xf32, #tpu.memory_space<vmem>>, vector<16x512xf32>
    %95 = arith.truncf %90 : vector<16x128xf32> to vector<16x128xbf16>
    %c0_43 = arith.constant 0 : index
    %c0_44 = arith.constant 0 : index
    %96 = vector.load %arg4[%c0_43, %c0_44] : memref<128x512xbf16, #tpu.memory_space<vmem>>, vector<128x512xbf16>
    %cst_45 = arith.constant dense<0.000000e+00> : vector<16x512xf32>
    %97 = tpu.matmul %95, %96, %cst_45 {dimension_numbers = #tpu.dot_dimension_numbers<[1], [0], [0], [1], [0, 0, 1, 1], [], []>} : vector<16x128xbf16>, vector<128x512xbf16>, vector<16x512xf32> -> vector<16x512xf32>
    %98 = arith.addf %94, %97 : vector<16x512xf32>
    %99 = vector.extract_strided_slice %98 {offsets = [0, 0], sizes = [16, 128], strides = [1, 1]} : vector<16x512xf32> to vector<16x128xf32>
    %cst_46 = arith.constant 5.000000e-01 : f32
    %100 = vector.broadcast %cst_46 : f32 to vector<16x128xf32>
    %101 = arith.mulf %100, %99 : vector<16x128xf32>
    %102 = math.tanh %101 : vector<16x128xf32>
    %cst_47 = arith.constant 1.000000e+00 : f32
    %103 = vector.broadcast %cst_47 : f32 to vector<16x128xf32>
    %104 = arith.addf %102, %103 : vector<16x128xf32>
    %cst_48 = arith.constant 5.000000e-01 : f32
    %105 = vector.broadcast %cst_48 : f32 to vector<16x128xf32>
    %106 = arith.mulf %105, %104 : vector<16x128xf32>
    %107 = vector.extract_strided_slice %98 {offsets = [0, 128], sizes = [16, 128], strides = [1, 1]} : vector<16x512xf32> to vector<16x128xf32>
    %cst_49 = arith.constant 5.000000e-01 : f32
    %108 = vector.broadcast %cst_49 : f32 to vector<16x128xf32>
    %109 = arith.mulf %108, %107 : vector<16x128xf32>
    %110 = math.tanh %109 : vector<16x128xf32>
    %cst_50 = arith.constant 1.000000e+00 : f32
    %111 = vector.broadcast %cst_50 : f32 to vector<16x128xf32>
    %112 = arith.addf %110, %111 : vector<16x128xf32>
    %cst_51 = arith.constant 5.000000e-01 : f32
    %113 = vector.broadcast %cst_51 : f32 to vector<16x128xf32>
    %114 = arith.mulf %113, %112 : vector<16x128xf32>
    %115 = vector.extract_strided_slice %98 {offsets = [0, 256], sizes = [16, 128], strides = [1, 1]} : vector<16x512xf32> to vector<16x128xf32>
    %116 = math.tanh %115 : vector<16x128xf32>
    %117 = vector.extract_strided_slice %98 {offsets = [0, 384], sizes = [16, 128], strides = [1, 1]} : vector<16x512xf32> to vector<16x128xf32>
    %cst_52 = arith.constant 5.000000e-01 : f32
    %118 = vector.broadcast %cst_52 : f32 to vector<16x128xf32>
    %119 = arith.mulf %118, %117 : vector<16x128xf32>
    %120 = math.tanh %119 : vector<16x128xf32>
    %cst_53 = arith.constant 1.000000e+00 : f32
    %121 = vector.broadcast %cst_53 : f32 to vector<16x128xf32>
    %122 = arith.addf %120, %121 : vector<16x128xf32>
    %cst_54 = arith.constant 5.000000e-01 : f32
    %123 = vector.broadcast %cst_54 : f32 to vector<16x128xf32>
    %124 = arith.mulf %123, %122 : vector<16x128xf32>
    %125 = arith.mulf %114, %88 : vector<16x128xf32>
    %126 = arith.mulf %106, %116 : vector<16x128xf32>
    %127 = arith.addf %125, %126 : vector<16x128xf32>
    %128 = math.tanh %127 : vector<16x128xf32>
    %129 = arith.mulf %124, %128 : vector<16x128xf32>
    %c3_i32 = arith.constant 3 : i32
    %c16_i32_55 = arith.constant 16 : i32
    %130 = arith.muli %c3_i32, %c16_i32_55 : i32
    %131 = tpu.assume_multiple %130, 16 : i32
    %132 = arith.index_cast %131 : i32 to index
    %c0_56 = arith.constant 0 : index
    %133 = vector.load %arg14[%132, %c0_56] : memref<64x512xf32, #tpu.memory_space<vmem>>, vector<16x512xf32>
    %134 = arith.truncf %129 : vector<16x128xf32> to vector<16x128xbf16>
    %c0_57 = arith.constant 0 : index
    %c0_58 = arith.constant 0 : index
    %135 = vector.load %arg4[%c0_57, %c0_58] : memref<128x512xbf16, #tpu.memory_space<vmem>>, vector<128x512xbf16>
    %cst_59 = arith.constant dense<0.000000e+00> : vector<16x512xf32>
    %136 = tpu.matmul %134, %135, %cst_59 {dimension_numbers = #tpu.dot_dimension_numbers<[1], [0], [0], [1], [0, 0, 1, 1], [], []>} : vector<16x128xbf16>, vector<128x512xbf16>, vector<16x512xf32> -> vector<16x512xf32>
    %137 = arith.addf %133, %136 : vector<16x512xf32>
    %138 = vector.extract_strided_slice %137 {offsets = [0, 0], sizes = [16, 128], strides = [1, 1]} : vector<16x512xf32> to vector<16x128xf32>
    %cst_60 = arith.constant 5.000000e-01 : f32
    %139 = vector.broadcast %cst_60 : f32 to vector<16x128xf32>
    %140 = arith.mulf %139, %138 : vector<16x128xf32>
    %141 = math.tanh %140 : vector<16x128xf32>
    %cst_61 = arith.constant 1.000000e+00 : f32
    %142 = vector.broadcast %cst_61 : f32 to vector<16x128xf32>
    %143 = arith.addf %141, %142 : vector<16x128xf32>
    %cst_62 = arith.constant 5.000000e-01 : f32
    %144 = vector.broadcast %cst_62 : f32 to vector<16x128xf32>
    %145 = arith.mulf %144, %143 : vector<16x128xf32>
    %146 = vector.extract_strided_slice %137 {offsets = [0, 128], sizes = [16, 128], strides = [1, 1]} : vector<16x512xf32> to vector<16x128xf32>
    %cst_63 = arith.constant 5.000000e-01 : f32
    %147 = vector.broadcast %cst_63 : f32 to vector<16x128xf32>
    %148 = arith.mulf %147, %146 : vector<16x128xf32>
    %149 = math.tanh %148 : vector<16x128xf32>
    %cst_64 = arith.constant 1.000000e+00 : f32
    %150 = vector.broadcast %cst_64 : f32 to vector<16x128xf32>
    %151 = arith.addf %149, %150 : vector<16x128xf32>
    %cst_65 = arith.constant 5.000000e-01 : f32
    %152 = vector.broadcast %cst_65 : f32 to vector<16x128xf32>
    %153 = arith.mulf %152, %151 : vector<16x128xf32>
    %154 = vector.extract_strided_slice %137 {offsets = [0, 256], sizes = [16, 128], strides = [1, 1]} : vector<16x512xf32> to vector<16x128xf32>
    %155 = math.tanh %154 : vector<16x128xf32>
    %156 = vector.extract_strided_slice %137 {offsets = [0, 384], sizes = [16, 128], strides = [1, 1]} : vector<16x512xf32> to vector<16x128xf32>
    %cst_66 = arith.constant 5.000000e-01 : f32
    %157 = vector.broadcast %cst_66 : f32 to vector<16x128xf32>
    %158 = arith.mulf %157, %156 : vector<16x128xf32>
    %159 = math.tanh %158 : vector<16x128xf32>
    %cst_67 = arith.constant 1.000000e+00 : f32
    %160 = vector.broadcast %cst_67 : f32 to vector<16x128xf32>
    %161 = arith.addf %159, %160 : vector<16x128xf32>
    %cst_68 = arith.constant 5.000000e-01 : f32
    %162 = vector.broadcast %cst_68 : f32 to vector<16x128xf32>
    %163 = arith.mulf %162, %161 : vector<16x128xf32>
    %164 = arith.mulf %153, %127 : vector<16x128xf32>
    %165 = arith.mulf %145, %155 : vector<16x128xf32>
    %166 = arith.addf %164, %165 : vector<16x128xf32>
    %167 = math.tanh %166 : vector<16x128xf32>
    %168 = arith.mulf %163, %167 : vector<16x128xf32>
    %c4_i32 = arith.constant 4 : i32
    %c0_69 = arith.constant 0 : index
    %c0_70 = arith.constant 0 : index
    %169 = vector.load %arg12[%c0_69, %c0_70] : memref<16x128xf32, #tpu.memory_space<vmem>>, vector<16x128xf32>
    tpu.vector_store %arg12[%c0_69, %c0_70], %168 {strides = array<i32>} : memref<16x128xf32, #tpu.memory_space<vmem>>, vector<16x128xf32>,
    %c0_71 = arith.constant 0 : index
    %c0_72 = arith.constant 0 : index
    %170 = vector.load %arg13[%c0_71, %c0_72] : memref<16x128xf32, #tpu.memory_space<vmem>>, vector<16x128xf32>
    tpu.vector_store %arg13[%c0_71, %c0_72], %166 {strides = array<i32>} : memref<16x128xf32, #tpu.memory_space<vmem>>, vector<16x128xf32>,
    %c1_i32_73 = arith.constant 1 : i32
    %171 = arith.cmpi eq, %arg1, %c1_i32_73 : i32
    %172 = arith.extui %171 : i1 to i32
    %c0_i32_74 = arith.constant 0 : i32
    %173 = arith.cmpi ne, %172, %c0_i32_74 : i32
    scf.if %173 {
      %174 = vector.extract_strided_slice %4 {offsets = [48, 0], sizes = [16, 128], strides = [1, 1]} : vector<64x128xbf16> to vector<16x128xbf16>
      %c0_75 = arith.constant 0 : index
      %c0_76 = arith.constant 0 : index
      %175 = vector.load %arg6[%c0_75, %c0_76] : memref<128x384xbf16, #tpu.memory_space<vmem>>, vector<128x384xbf16>
      %cst_77 = arith.constant dense<0.000000e+00> : vector<16x384xf32>
      %176 = tpu.matmul %174, %175, %cst_77 {dimension_numbers = #tpu.dot_dimension_numbers<[1], [0], [0], [1], [0, 0, 1, 1], [], []>} : vector<16x128xbf16>, vector<128x384xbf16>, vector<16x384xf32> -> vector<16x384xf32>
      %c0_78 = arith.constant 0 : index
      %c0_79 = arith.constant 0 : index
      %177 = vector.load %arg7[%c0_78, %c0_79] : memref<1x384xf32, #tpu.memory_space<vmem>>, vector<1x384xf32>
      %178 = vector.broadcast %177 : vector<1x384xf32> to vector<16x384xf32>
      %179 = arith.addf %176, %178 : vector<16x384xf32>
      %180 = vector.extract_strided_slice %179 {offsets = [0, 0], sizes = [16, 128], strides = [1, 1]} : vector<16x384xf32> to vector<16x128xf32>
      %cst_80 = arith.constant 5.000000e-01 : f32
      %181 = vector.broadcast %cst_80 : f32 to vector<16x128xf32>
      %182 = arith.mulf %181, %180 : vector<16x128xf32>
      %183 = math.tanh %182 : vector<16x128xf32>
      %cst_81 = arith.constant 1.000000e+00 : f32
      %184 = vector.broadcast %cst_81 : f32 to vector<16x128xf32>
      %185 = arith.addf %183, %184 : vector<16x128xf32>
      %cst_82 = arith.constant 5.000000e-01 : f32
      %186 = vector.broadcast %cst_82 : f32 to vector<16x128xf32>
      %187 = arith.mulf %186, %185 : vector<16x128xf32>
      %188 = vector.extract_strided_slice %179 {offsets = [0, 128], sizes = [16, 128], strides = [1, 1]} : vector<16x384xf32> to vector<16x128xf32>
      %189 = math.tanh %188 : vector<16x128xf32>
      %190 = vector.extract_strided_slice %179 {offsets = [0, 256], sizes = [16, 128], strides = [1, 1]} : vector<16x384xf32> to vector<16x128xf32>
      %cst_83 = arith.constant 5.000000e-01 : f32
      %191 = vector.broadcast %cst_83 : f32 to vector<16x128xf32>
      %192 = arith.mulf %191, %190 : vector<16x128xf32>
      %193 = math.tanh %192 : vector<16x128xf32>
      %cst_84 = arith.constant 1.000000e+00 : f32
      %194 = vector.broadcast %cst_84 : f32 to vector<16x128xf32>
      %195 = arith.addf %193, %194 : vector<16x128xf32>
      %cst_85 = arith.constant 5.000000e-01 : f32
      %196 = vector.broadcast %cst_85 : f32 to vector<16x128xf32>
      %197 = arith.mulf %196, %195 : vector<16x128xf32>
      %198 = arith.mulf %187, %189 : vector<16x128xf32>
      %199 = math.tanh %198 : vector<16x128xf32>
      %200 = arith.mulf %197, %199 : vector<16x128xf32>
      %201 = arith.truncf %168 : vector<16x128xf32> to vector<16x128xbf16>
      %c0_86 = arith.constant 0 : index
      %c0_87 = arith.constant 0 : index
      %202 = vector.load %arg8[%c0_86, %c0_87] : memref<128x128xbf16, #tpu.memory_space<vmem>>, vector<128x128xbf16>
      %cst_88 = arith.constant dense<0.000000e+00> : vector<16x128xf32>
      %203 = tpu.matmul %201, %202, %cst_88 {dimension_numbers = #tpu.dot_dimension_numbers<[1], [0], [0], [1], [0, 0, 1, 1], [], []>} : vector<16x128xbf16>, vector<128x128xbf16>, vector<16x128xf32> -> vector<16x128xf32>
      %204 = arith.truncf %200 : vector<16x128xf32> to vector<16x128xbf16>
      %c0_89 = arith.constant 0 : index
      %c0_90 = arith.constant 0 : index
      %205 = vector.load %arg9[%c0_89, %c0_90] : memref<128x128xbf16, #tpu.memory_space<vmem>>, vector<128x128xbf16>
      %cst_91 = arith.constant dense<0.000000e+00> : vector<16x128xf32>
      %206 = tpu.matmul %204, %205, %cst_91 {dimension_numbers = #tpu.dot_dimension_numbers<[1], [0], [0], [1], [0, 0, 1, 1], [], []>} : vector<16x128xbf16>, vector<128x128xbf16>, vector<16x128xf32> -> vector<16x128xf32>
      %207 = arith.addf %203, %206 : vector<16x128xf32>
      %c0_92 = arith.constant 0 : index
      %c0_93 = arith.constant 0 : index
      %208 = vector.load %arg10[%c0_92, %c0_93] : memref<1x128xf32, #tpu.memory_space<vmem>>, vector<1x128xf32>
      %209 = vector.broadcast %208 : vector<1x128xf32> to vector<16x128xf32>
      %210 = arith.addf %207, %209 : vector<16x128xf32>
      %c0_94 = arith.constant 0 : index
      %c0_95 = arith.constant 0 : index
      %211 = vector.load %arg11[%c0_94, %c0_95] : memref<16x128xf32, #tpu.memory_space<vmem>>, vector<16x128xf32>
      tpu.vector_store %arg11[%c0_94, %c0_95], %210 {strides = array<i32>} : memref<16x128xf32, #tpu.memory_space<vmem>>, vector<16x128xf32>,
    } else {
    }
    return
  }
  func.func @transform_0(%arg0: i32, %arg1: i32) -> (i32, i32, i32) {
    %c0_i32 = arith.constant 0 : i32
    %c0_i32_0 = arith.constant 0 : i32
    return %arg0, %arg1, %c0_i32 : i32, i32, i32
  }
  func.func @transform_1(%arg0: i32, %arg1: i32) -> (i32, i32) {
    %c0_i32 = arith.constant 0 : i32
    %c0_i32_0 = arith.constant 0 : i32
    %c0_i32_1 = arith.constant 0 : i32
    return %c0_i32, %c0_i32_0 : i32, i32
  }
  func.func @transform_2(%arg0: i32, %arg1: i32) -> (i32, i32) {
    %c0_i32 = arith.constant 0 : i32
    %c0_i32_0 = arith.constant 0 : i32
    %c0_i32_1 = arith.constant 0 : i32
    return %c0_i32, %c0_i32_0 : i32, i32
  }
  func.func @transform_3(%arg0: i32, %arg1: i32) -> (i32, i32) {
    %c0_i32 = arith.constant 0 : i32
    %c0_i32_0 = arith.constant 0 : i32
    %c0_i32_1 = arith.constant 0 : i32
    return %c0_i32, %c0_i32_0 : i32, i32
  }
  func.func @transform_4(%arg0: i32, %arg1: i32) -> (i32, i32) {
    %c0_i32 = arith.constant 0 : i32
    %c0_i32_0 = arith.constant 0 : i32
    %c0_i32_1 = arith.constant 0 : i32
    return %c0_i32, %c0_i32_0 : i32, i32
  }
  func.func @transform_5(%arg0: i32, %arg1: i32) -> (i32, i32) {
    %c0_i32 = arith.constant 0 : i32
    %c0_i32_0 = arith.constant 0 : i32
    %c0_i32_1 = arith.constant 0 : i32
    return %c0_i32, %c0_i32_0 : i32, i32
  }
  func.func @transform_6(%arg0: i32, %arg1: i32) -> (i32, i32) {
    %c0_i32 = arith.constant 0 : i32
    %c0_i32_0 = arith.constant 0 : i32
    %c0_i32_1 = arith.constant 0 : i32
    return %c0_i32, %c0_i32_0 : i32, i32
  }
  func.func @transform_7(%arg0: i32, %arg1: i32) -> (i32, i32) {
    %c0_i32 = arith.constant 0 : i32
    %c0_i32_0 = arith.constant 0 : i32
    %c0_i32_1 = arith.constant 0 : i32
    return %c0_i32, %c0_i32_0 : i32, i32
  }
  func.func @transform_8(%arg0: i32, %arg1: i32) -> (i32, i32) {
    %c0_i32 = arith.constant 0 : i32
    %c0_i32_0 = arith.constant 0 : i32
    %c0_i32_1 = arith.constant 0 : i32
    return %c0_i32, %c0_i32_0 : i32, i32
  }
  func.func @transform_9(%arg0: i32, %arg1: i32) -> (i32, i32) {
    %c0_i32 = arith.constant 0 : i32
    %c0_i32_0 = arith.constant 0 : i32
    return %arg0, %c0_i32 : i32, i32
  }
}

</mosaic_0001>

<bundles_post_ra>
// kernel: bilstm_classifier_forward.1
= control target key start
LH: loop header
LB: loop body
LE: loop exit
PB: predicated region body
PF: predicated region fallthrough
CT: control target
= control target key end

     0   :  { %s2624_s30 = smov 0   ;;  %s2626_s10 = smov 0   ;;  %s3611_s0 = inlined_call_operand.vmem [shape: bf16[1,128,128], index: 0, kind: input, shape index: {}]   ;;  %s3612_s1 = inlined_call_operand.vmem [shape: bf16[128,512], index: 1, kind: input, shape index: {}]   ;;  %s3613_s2 = inlined_call_operand.vmem [shape: bf16[128,512], index: 2, kind: input, shape index: {}]   ;;  %s3614_s3 = inlined_call_operand.vmem [shape: f32[1,512], index: 3, kind: input, shape index: {}]   ;;  %s3615_s4 = inlined_call_operand.vmem [shape: bf16[128,384], index: 4, kind: input, shape index: {}]   ;;  %s3616_s5 = inlined_call_operand.vmem [shape: f32[1,384], index: 5, kind: input, shape index: {}]   ;;  %s3617_s6 = inlined_call_operand.vmem [shape: bf16[128,128], index: 6, kind: input, shape index: {}]   ;;  %s3618_s7 = inlined_call_operand.vmem [shape: bf16[128,128], index: 7, kind: input, shape index: {}]   ;;  %s3619_s8 = inlined_call_operand.vmem [shape: f32[1,128], index: 8, kind: input, shape index: {}]   ;;  %s3620_s9 = inlined_call_operand.vmem [shape: f32[16,128], index: 9, kind: output, shape index: {}]  }
   0x1   :  { %s2628_s11 = smov 0  }
   0x2 LB: > { %s28_s12 = sadd.s32 1, %s2567_s10  ;;  %p1878_p0 = scmp.ge.s32.totalorder %s2571_s11, 1  ;;  %s2571_s11 = sphi %s2628_s11, %s19_s11   ;;  %s2567_s10 = sphi %s2626_s10, %s3660_s10   ;;  %s2563_s30 = sphi %s2624_s30, %s3659_s30  }
   0x3   : > { %p29_p1 = scmp.ge.s32.totalorder %s28_s12, 2  ;;  %p306_p2 = scmp.lt.s32.totalorder %s2571_s11, 3 }
   0x5   : > { %s3662_s12 = smov (%p29_p1, %s28_s12), 0  ;;  %p307_p3 = pnand %p1878_p0, %p306_p2 }
   0x7   : > { %310 = sbr.rel (%p307_p3) target bundleno = 1123 (0x463), region = 56 }
   0xc   : > { %s1879_s13 = sshll.u32 %s2563_s30, 3  ;;  %p1881_p5 = scmp.ne.s32.totalorder %s2563_s30, 0 }
   0xd   : > { %p349_p4 = scmp.lt.s32.totalorder %s1879_s13, 15 }
   0xe   : > { %365 = sbr.rel (%p1881_p5) target bundleno = 24 (0x18), region = 60 }
   0xf   : > { %s3664_s13 = smov (!%p349_p4, %s1879_s13), 15 }
  0x10   : > { %s1880_s14 = sshll.u32 %s3664_s13, 2 }
  0x11   : > { %s2648_s17 = scalar_lea.vmem %s3611_s0, %s1880_s14 }
  0x13   : > { %v2573_v0 = vmov 0.0  }
  0x14   : > { %366 = vst [vmem:[#allocation2] sm:$0xff] %v2573_v0 }
  0x15   : > { %367 = vst [vmem:[#allocation2 + $0x8] sm:$0xff] %v2573_v0 }
  0x16   : > { %368 = vst [vmem:[#allocation3 + $0x8] sm:$0xff] %v2573_v0 }
  0x17   : > { %369 = vst [vmem:[#allocation3] sm:$0xff] %v2573_v0 }
  0x18 PF: > { %v2012_v1 = vld [vmem:[%s3612_s1 + $0xe0] sm:$0xf]  ;;  %v2353_v2 = vld [vmem:[%s3612_s1 + $0xec] sm:$0xf0]  ;;  %v2351_v3 = vld [vmem:[%s3612_s1 + $0xe4] sm:$0xf] }
  0x19   : > { %v2013_v4 = vor.u32 %v2353_v2, %v2012_v1  ;;  %v2014_v5 = vld [vmem:[%s3612_s1 + $0xf0] sm:$0xf0]  ;;  %v2020_v6 = vld [vmem:[%s3612_s1 + $0xe8] sm:$0xf]  ;;  %v2354_v7 = vld [vmem:[%s3612_s1 + $0xf4] sm:$0xf0] }
  0x1a   : > { %v2017_v8 = vor.u32 %v2351_v3, %v2014_v5  ;;  %v2021_v9 = vor.u32 %v2354_v7, %v2020_v6  ;;  %v2352_v10 = vld [vmem:[%s3612_s1 + $0xec] sm:$0xf]  ;;  %v2022_v11 = vld [vmem:[%s3612_s1 + $0xf8] sm:$0xf0]  ;;  %v1996_v12 = vld [vmem:[%s3612_s1 + $0xc0] sm:$0xf] }
  0x1b   : > { %604 = vmatpush.bf16.msra.mxu0 %v2013_v4  ;;  %v2025_v13 = vor.u32 %v2352_v10, %v2022_v11  ;;  %v2349_v14 = vld [vmem:[%s3612_s1 + $0xcc] sm:$0xf0]  ;;  %v2347_v15 = vld [vmem:[%s3612_s1 + $0xc4] sm:$0xf]  ;;  %v1998_v16 = vld [vmem:[%s3612_s1 + $0xd0] sm:$0xf0] }
  0x1c   : > { %633 = vmatpush.bf16.msra.mxu1 %v2017_v8  ;;  %662 = vmatpush.bf16.msra.mxu2 %v2021_v9  ;;  %v1997_v17 = vor.u32 %v2349_v14, %v1996_v12  ;;  %v2001_v18 = vor.u32 %v2347_v15, %v1998_v16  ;;  %v2004_v19 = vld [vmem:[%s3612_s1 + $0xc8] sm:$0xf]  ;;  %v2350_v20 = vld [vmem:[%s3612_s1 + $0xd4] sm:$0xf0]  ;;  %v2348_v21 = vld [vmem:[%s3612_s1 + $0xcc] sm:$0xf] }
  0x1d   : > { %691 = vmatpush.bf16.msra.mxu3 %v2025_v13  ;;  %v2005_v22 = vor.u32 %v2350_v20, %v2004_v19  ;;  %v2006_v23 = vld [vmem:[%s3612_s1 + $0xd8] sm:$0xf0]  ;;  %v1980_v24 = vld [vmem:[%s3612_s1 + $0xa0] sm:$0xf]  ;;  %v2345_v25 = vld [vmem:[%s3612_s1 + $0xac] sm:$0xf0] }
  0x1e   : > { %v2009_v26 = vor.u32 %v2348_v21, %v2006_v23  ;;  %v2343_v27 = vld [vmem:[%s3612_s1 + $0xa4] sm:$0xf]  ;;  %v1982_v28 = vld [vmem:[%s3612_s1 + $0xb0] sm:$0xf0]  ;;  %v1988_v29 = vld [vmem:[%s3612_s1 + $0xa8] sm:$0xf]  ;;  %v1981_v30 = vor.u32 %v2345_v25, %v1980_v24 }
  0x1f   : > { %605 = vmatpush.bf16.msra.mxu0 %v1997_v17  ;;  %v2346_v31 = vld [vmem:[%s3612_s1 + $0xb4] sm:$0xf0]  ;;  %v2344_v32 = vld [vmem:[%s3612_s1 + $0xac] sm:$0xf]  ;;  %v1990_v33 = vld [vmem:[%s3612_s1 + $0xb8] sm:$0xf0]  ;;  %v1985_v34 = vor.u32 %v2343_v27, %v1982_v28 }
  0x20   : > { %634 = vmatpush.bf16.msra.mxu1 %v2001_v18  ;;  %663 = vmatpush.bf16.msra.mxu2 %v2005_v22  ;;  %v1989_v35 = vor.u32 %v2346_v31, %v1988_v29  ;;  %v1964_v36 = vld [vmem:[%s3612_s1 + $0x80] sm:$0xf]  ;;  %v2341_v37 = vld [vmem:[%s3612_s1 + $0x8c] sm:$0xf0]  ;;  %v2339_v38 = vld [vmem:[%s3612_s1 + $0x84] sm:$0xf]  ;;  %v1993_v39 = vor.u32 %v2344_v32, %v1990_v33 }
  0x21   : > { %692 = vmatpush.bf16.msra.mxu3 %v2009_v26  ;;  %v1966_v40 = vld [vmem:[%s3612_s1 + $0x90] sm:$0xf0]  ;;  %v1972_v41 = vld [vmem:[%s3612_s1 + $0x88] sm:$0xf]  ;;  %v2342_v42 = vld [vmem:[%s3612_s1 + $0x94] sm:$0xf0]  ;;  %v1965_v45 = vor.u32 %v2341_v37, %v1964_v36 }
  0x22   : > { %v2340_v43 = vld [vmem:[%s3612_s1 + $0x8c] sm:$0xf]  ;;  %v1974_v44 = vld [vmem:[%s3612_s1 + $0x98] sm:$0xf0]  ;;  %v1969_v46 = vor.u32 %v2339_v38, %v1966_v40  ;;  %v1973_v47 = vor.u32 %v2342_v42, %v1972_v41  ;;  %v1948_v48 = vld [vmem:[%s3612_s1 + $0x60] sm:$0xf] }
  0x23   : > { %606 = vmatpush.bf16.msra.mxu0 %v1981_v30  ;;  %v2337_v49 = vld [vmem:[%s3612_s1 + $0x6c] sm:$0xf0]  ;;  %v2335_v50 = vld [vmem:[%s3612_s1 + $0x64] sm:$0xf]  ;;  %v1977_v51 = vor.u32 %v2340_v43, %v1974_v44  ;;  %v1950_v52 = vld [vmem:[%s3612_s1 + $0x70] sm:$0xf0] }
  0x24   : > { %635 = vmatpush.bf16.msra.mxu1 %v1985_v34  ;;  %664 = vmatpush.bf16.msra.mxu2 %v1989_v35  ;;  %v1956_v53 = vld [vmem:[%s3612_s1 + $0x68] sm:$0xf]  ;;  %v2338_v54 = vld [vmem:[%s3612_s1 + $0x74] sm:$0xf0]  ;;  %v2336_v55 = vld [vmem:[%s3612_s1 + $0x6c] sm:$0xf]  ;;  %v1949_v57 = vor.u32 %v2337_v49, %v1948_v48  ;;  %v1953_v58 = vor.u32 %v2335_v50, %v1950_v52 }
  0x25   : > { %693 = vmatpush.bf16.msra.mxu3 %v1993_v39  ;;  %v1958_v56 = vld [vmem:[%s3612_s1 + $0x78] sm:$0xf0]  ;;  %v1957_v59 = vor.u32 %v2338_v54, %v1956_v53  ;;  %v1932_v60 = vld [vmem:[%s3612_s1 + $0x40] sm:$0xf]  ;;  %v2333_v61 = vld [vmem:[%s3612_s1 + $0x4c] sm:$0xf0] }
  0x26   : > { %v2331_v62 = vld [vmem:[%s3612_s1 + $0x44] sm:$0xf]  ;;  %v1961_v63 = vor.u32 %v2336_v55, %v1958_v56  ;;  %v1934_v0 = vld [vmem:[%s3612_s1 + $0x50] sm:$0xf0]  ;;  %v1940_v1 = vld [vmem:[%s3612_s1 + $0x48] sm:$0xf]  ;;  %v1933_v5 = vor.u32 %v2333_v61, %v1932_v60 }
  0x27   : > { %607 = vmatpush.bf16.msra.mxu0 %v1965_v45  ;;  %v2334_v2 = vld [vmem:[%s3612_s1 + $0x54] sm:$0xf0]  ;;  %v2332_v3 = vld [vmem:[%s3612_s1 + $0x4c] sm:$0xf]  ;;  %v1942_v4 = vld [vmem:[%s3612_s1 + $0x58] sm:$0xf0]  ;;  %v1937_v6 = vor.u32 %v2331_v62, %v1934_v0 }
  0x28   : > { %636 = vmatpush.bf16.msra.mxu1 %v1969_v46  ;;  %665 = vmatpush.bf16.msra.mxu2 %v1973_v47  ;;  %v1941_v7 = vor.u32 %v2334_v2, %v1940_v1  ;;  %v1916_v8 = vld [vmem:[%s3612_s1 + $0x20] sm:$0xf]  ;;  %v2329_v9 = vld [vmem:[%s3612_s1 + $0x2c] sm:$0xf0]  ;;  %v2327_v10 = vld [vmem:[%s3612_s1 + $0x24] sm:$0xf]  ;;  %v1945_v11 = vor.u32 %v2332_v3, %v1942_v4 }
  0x29   : > { %694 = vmatpush.bf16.msra.mxu3 %v1977_v51  ;;  %v1918_v12 = vld [vmem:[%s3612_s1 + $0x30] sm:$0xf0]  ;;  %v1924_v13 = vld [vmem:[%s3612_s1 + $0x28] sm:$0xf]  ;;  %v2330_v14 = vld [vmem:[%s3612_s1 + $0x34] sm:$0xf0]  ;;  %v1917_v17 = vor.u32 %v2329_v9, %v1916_v8 }
  0x2a   : > { %v2328_v15 = vld [vmem:[%s3612_s1 + $0x2c] sm:$0xf]  ;;  %v1926_v16 = vld [vmem:[%s3612_s1 + $0x38] sm:$0xf0]  ;;  %v1900_v18 = vld [vmem:[%s3612_s1] sm:$0xf]  ;;  %v1921_v19 = vor.u32 %v2327_v10, %v1918_v12  ;;  %v1925_v20 = vor.u32 %v2330_v14, %v1924_v13 }
  0x2b   : > { %608 = vmatpush.bf16.msra.mxu0 %v1949_v57  ;;  %v2325_v21 = vld [vmem:[%s3612_s1 + $0xc] sm:$0xf0]  ;;  %v2323_v22 = vld [vmem:[%s3612_s1 + $0x4] sm:$0xf]  ;;  %v1902_v23 = vld [vmem:[%s3612_s1 + $0x10] sm:$0xf0]  ;;  %v1929_v24 = vor.u32 %v2328_v15, %v1926_v16 }
  0x2c   : > { %637 = vmatpush.bf16.msra.mxu1 %v1953_v58  ;;  %666 = vmatpush.bf16.msra.mxu2 %v1957_v59  ;;  %v1908_v25 = vld [vmem:[%s3612_s1 + $0x8] sm:$0xf]  ;;  %v2326_v26 = vld [vmem:[%s3612_s1 + $0x14] sm:$0xf0]  ;;  %v2324_v27 = vld [vmem:[%s3612_s1 + $0xc] sm:$0xf]  ;;  %v1901_v31 = vor.u32 %v2325_v21, %v1900_v18  ;;  %v1905_v34 = vor.u32 %v2323_v22, %v1902_v23 }
  0x2d   : > { %695 = vmatpush.bf16.msra.mxu3 %v1961_v63  ;;  %v1910_v28 = vld [vmem:[%s3612_s1 + $0x18] sm:$0xf0]  ;;  %v2140_v29 = vld [vmem:[%s3613_s2 + $0xe0] sm:$0xf]  ;;  %v2385_v30 = vld [vmem:[%s3613_s2 + $0xec] sm:$0xf0]  ;;  %v1909_v35 = vor.u32 %v2326_v26, %v1908_v25 }
  0x2e   : > { %v2383_v32 = vld [vmem:[%s3613_s2 + $0xe4] sm:$0xf]  ;;  %v2142_v33 = vld [vmem:[%s3613_s2 + $0xf0] sm:$0xf0]  ;;  %v1913_v37 = vor.u32 %v2324_v27, %v1910_v28  ;;  %v2856_v38 = vor.u32 %v2385_v30, %v2140_v29  ;;  %v2148_v39 = vld [vmem:[%s3613_s2 + $0xe8] sm:$0xf] }
  0x2f   : > { %609 = vmatpush.bf16.msra.mxu0 %v1933_v5  ;;  %v2319_v36 = vld [vmem:[%s2648_s17] sm:$0xff]  ;;  %v2386_v40 = vld [vmem:[%s3613_s2 + $0xf4] sm:$0xf0]  ;;  %v2384_v41 = vld [vmem:[%s3613_s2 + $0xec] sm:$0xf]  ;;  %v2867_v42 = vor.u32 %v2383_v32, %v2142_v33  ;;  %p2154_p6 = scmp.ne.s32.totalorder %s2563_s30, 1 }
  0x30   : > { %638 = vmatpush.bf16.msra.mxu1 %v1937_v6  ;;  %667 = vmatpush.bf16.msra.mxu2 %v1941_v7  ;;  %v2150_v43 = vld [vmem:[%s3613_s2 + $0xf8] sm:$0xf0]  ;;  %v2124_v44 = vld [vmem:[%s3613_s2 + $0xc0] sm:$0xf]  ;;  %v2381_v45 = vld [vmem:[%s3613_s2 + $0xcc] sm:$0xf0]  ;;  %v2884_v48 = vor.u32 %v2386_v40, %v2148_v39 }
  0x31   : > { %696 = vmatpush.bf16.msra.mxu3 %v1945_v11  ;;  %v2379_v46 = vld [vmem:[%s3613_s2 + $0xc4] sm:$0xf]  ;;  %v2126_v47 = vld [vmem:[%s3613_s2 + $0xd0] sm:$0xf0]  ;;  %v2887_v49 = vor.u32 %v2384_v41, %v2150_v43  ;;  %v2889_v50 = vor.u32 %v2381_v45, %v2124_v44  ;;  %v2132_v51 = vld [vmem:[%s3613_s2 + $0xc8] sm:$0xf] }
  0x32   : > { %v2382_v52 = vld [vmem:[%s3613_s2 + $0xd4] sm:$0xf0]  ;;  %v2380_v53 = vld [vmem:[%s3613_s2 + $0xcc] sm:$0xf]  ;;  %v2901_v54 = vor.u32 %v2379_v46, %v2126_v47  ;;  %v2134_v55 = vld [vmem:[%s3613_s2 + $0xd8] sm:$0xf0] }
  0x33   : > { %610 = vmatpush.bf16.msra.mxu0 %v1917_v17  ;;  %v2108_v56 = vld [vmem:[%s3613_s2 + $0xa0] sm:$0xf]  ;;  %v2377_v57 = vld [vmem:[%s3613_s2 + $0xac] sm:$0xf0]  ;;  %v2375_v58 = vld [vmem:[%s3613_s2 + $0xa4] sm:$0xf]  ;;  %v2919_v60 = vor.u32 %v2382_v52, %v2132_v51  ;;  %v2923_v61 = vor.u32 %v2380_v53, %v2134_v55 }
  0x34   : > { %639 = vmatpush.bf16.msra.mxu1 %v1921_v19  ;;  %668 = vmatpush.bf16.msra.mxu2 %v1925_v20  ;;  %v2110_v59 = vld [vmem:[%s3613_s2 + $0xb0] sm:$0xf0]  ;;  %v2925_v62 = vor.u32 %v2377_v57, %v2108_v56  ;;  %v2116_v63 = vld [vmem:[%s3613_s2 + $0xa8] sm:$0xf]  ;;  %v2378_v0 = vld [vmem:[%s3613_s2 + $0xb4] sm:$0xf0] }
  0x35   : > { %697 = vmatpush.bf16.msra.mxu3 %v1929_v24  ;;  %v2376_v1 = vld [vmem:[%s3613_s2 + $0xac] sm:$0xf]  ;;  %v2937_v2 = vor.u32 %v2375_v58, %v2110_v59  ;;  %v2118_v3 = vld [vmem:[%s3613_s2 + $0xb8] sm:$0xf0]  ;;  %v2092_v4 = vld [vmem:[%s3613_s2 + $0x80] sm:$0xf]  ;;  %v2955_v8 = vor.u32 %v2378_v0, %v2116_v63 }
  0x36   : > { %v2373_v5 = vld [vmem:[%s3613_s2 + $0x8c] sm:$0xf0]  ;;  %v2371_v6 = vld [vmem:[%s3613_s2 + $0x84] sm:$0xf]  ;;  %v2094_v7 = vld [vmem:[%s3613_s2 + $0x90] sm:$0xf0]  ;;  %v2959_v9 = vor.u32 %v2376_v1, %v2118_v3 }
  0x37   : > { %611 = vmatpush.bf16.msra.mxu0 %v1901_v31  ;;  %v2961_v10 = vor.u32 %v2373_v5, %v2092_v4  ;;  %v2100_v11 = vld [vmem:[%s3613_s2 + $0x88] sm:$0xf]  ;;  %v2374_v12 = vld [vmem:[%s3613_s2 + $0x94] sm:$0xf0]  ;;  %v2372_v13 = vld [vmem:[%s3613_s2 + $0x8c] sm:$0xf]  ;;  %v2973_v14 = vor.u32 %v2371_v6, %v2094_v7 }
  0x38   : > { %640 = vmatpush.bf16.msra.mxu1 %v1905_v34  ;;  %669 = vmatpush.bf16.msra.mxu2 %v1909_v35  ;;  %v2102_v15 = vld [vmem:[%s3613_s2 + $0x98] sm:$0xf0]  ;;  %v2076_v16 = vld [vmem:[%s3613_s2 + $0x60] sm:$0xf]  ;;  %v2369_v17 = vld [vmem:[%s3613_s2 + $0x6c] sm:$0xf0]  ;;  %v2992_v21 = vor.u32 %v2374_v12, %v2100_v11 }
  0x39   : > { %698 = vmatpush.bf16.msra.mxu3 %v1913_v37  ;;  %v2367_v18 = vld [vmem:[%s3613_s2 + $0x64] sm:$0xf]  ;;  %v2078_v19 = vld [vmem:[%s3613_s2 + $0x70] sm:$0xf0]  ;;  %v2320_v20 = vld [vmem:[%s2648_s17 + $0x8] sm:$0xff]  ;;  %v2996_v22 = vor.u32 %v2372_v13, %v2102_v15  ;;  %v2998_v23 = vor.u32 %v2369_v17, %v2076_v16 }
  0x3a   : > { %612 = vmatmul.bf16.vlgmr.msra.gmra.mxu0 %v2319_v36  ;;  %v2084_v24 = vld [vmem:[%s3613_s2 + $0x68] sm:$0xf]  ;;  %v2370_v25 = vld [vmem:[%s3613_s2 + $0x74] sm:$0xf0]  ;;  %v2368_v26 = vld [vmem:[%s3613_s2 + $0x6c] sm:$0xf]  ;;  %v3010_v27 = vor.u32 %v2367_v18, %v2078_v19 }
  0x3b   : > { %960 = vmatpush.bf16.msrb.mxu0 %v2856_v38  ;;  %641 = vmatmul.bf16.vlgmr.msra.gmra.mxu1 %v2319_v36  ;;  %v2086_v28 = vld [vmem:[%s3613_s2 + $0x78] sm:$0xf0]  ;;  %v2060_v29 = vld [vmem:[%s3613_s2 + $0x40] sm:$0xf]  ;;  %v2365_v30 = vld [vmem:[%s3613_s2 + $0x4c] sm:$0xf0]  ;;  %v3028_v33 = vor.u32 %v2370_v25, %v2084_v24 }
  0x3c   : > { %974 = vmatpush.bf16.msrb.mxu1 %v2867_v42  ;;  %670 = vmatmul.bf16.vlgmr.msra.gmra.mxu2 %v2319_v36  ;;  %v2363_v31 = vld [vmem:[%s3613_s2 + $0x44] sm:$0xf]  ;;  %v2062_v32 = vld [vmem:[%s3613_s2 + $0x50] sm:$0xf0]  ;;  %v3032_v34 = vor.u32 %v2368_v26, %v2086_v28  ;;  %v3034_v35 = vor.u32 %v2365_v30, %v2060_v29  ;;  %v2366_v37 = vld [vmem:[%s3613_s2 + $0x54] sm:$0xf0] }
  0x3d   : > { %699 = vmatmul.bf16.vlgmr.msra.gmra.mxu3 %v2319_v36  ;;  %988 = vmatpush.bf16.msrb.mxu2 %v2884_v48  ;;  %v2068_v36 = vld [vmem:[%s3613_s2 + $0x48] sm:$0xf]  ;;  %v3043_v39 = vor.u32 %v2363_v31, %v2062_v32  ;;  %v2364_v40 = vld [vmem:[%s3613_s2 + $0x4c] sm:$0xf]  ;;  %v2070_v41 = vld [vmem:[%s3613_s2 + $0x58] sm:$0xf0] }
  0x3e   : > { %1002 = vmatpush.bf16.msrb.mxu3 %v2887_v49  ;;  %v3052_v43 = vor.u32 %v2366_v37, %v2068_v36  ;;  %v2044_v44 = vld [vmem:[%s3613_s2 + $0x20] sm:$0xf]  ;;  %v2361_v45 = vld [vmem:[%s3613_s2 + $0x2c] sm:$0xf0]  ;;  %v2359_v46 = vld [vmem:[%s3613_s2 + $0x24] sm:$0xf]  ;;  %v3065_v47 = vor.u32 %v2364_v40, %v2070_v41 }
  0x3f   : > { %961 = vmatpush.bf16.msrb.mxu0 %v2889_v50  ;;  %v3067_v51 = vor.u32 %v2361_v45, %v2044_v44  ;;  %v2046_v52 = vld [vmem:[%s3613_s2 + $0x30] sm:$0xf0]  ;;  %v2052_v53 = vld [vmem:[%s3613_s2 + $0x28] sm:$0xf]  ;;  %v2362_v55 = vld [vmem:[%s3613_s2 + $0x34] sm:$0xf0] }
  0x40   : > { %975 = vmatpush.bf16.msrb.mxu1 %v2901_v54  ;;  %v3079_v56 = vor.u32 %v2359_v46, %v2046_v52  ;;  %v2360_v57 = vld [vmem:[%s3613_s2 + $0x2c] sm:$0xf]  ;;  %v2054_v58 = vld [vmem:[%s3613_s2 + $0x38] sm:$0xf0]  ;;  %v2028_v59 = vld [vmem:[%s3613_s2] sm:$0xf]  ;;  %v3100_v3 = vor.u32 %v2362_v55, %v2052_v53 }
  0x41   : > { %989 = vmatpush.bf16.msrb.mxu2 %v2919_v60  ;;  %v2357_v63 = vld [vmem:[%s3613_s2 + $0xc] sm:$0xf0]  ;;  %v2355_v0 = vld [vmem:[%s3613_s2 + $0x4] sm:$0xf]  ;;  %v2030_v1 = vld [vmem:[%s3613_s2 + $0x10] sm:$0xf0]  ;;  %v3104_v4 = vor.u32 %v2360_v57, %v2054_v58 }
  0x42   : > { %1003 = vmatpush.bf16.msrb.mxu3 %v2923_v61  ;;  %v3106_v5 = vor.u32 %v2357_v63, %v2028_v59  ;;  %v2036_v6 = vld [vmem:[%s3613_s2 + $0x8] sm:$0xf]  ;;  %v2358_v7 = vld [vmem:[%s3613_s2 + $0x14] sm:$0xf0]  ;;  %v3115_v11 = vor.u32 %v2355_v0, %v2030_v1  ;;  %v2356_v12 = vld [vmem:[%s3613_s2 + $0xc] sm:$0xf] }
  0x43   : > { %962 = vmatpush.bf16.msrb.mxu0 %v2925_v62  ;;  %v2038_v13 = vld [vmem:[%s3613_s2 + $0x18] sm:$0xf0]  ;;  %v3124_v15 = vor.u32 %v2358_v7, %v2036_v6  ;;  %v2321_v17 = vld [vmem:[%s2648_s17 + $0x10] sm:$0xff]  ;;  %v752_v19 = vld [vmem:[#allocation2] sm:$0xff] }
  0x44   : > { %976 = vmatpush.bf16.msrb.mxu1 %v2937_v2  ;;  %v3128_v16 = vor.u32 %v2356_v12, %v2038_v13  ;;  %v3150_v18 = vld [vmem:[%s2648_s17 + $0x18] sm:$0xff]  ;;  %v410_v32 = vld [vmem:[%s3614_s3] sm:$0xf] }
  0x45   : > { %990 = vmatpush.bf16.msrb.mxu2 %v2955_v8  ;;  %3623 = vst [vmem:[#allocation5_spill] sm:$0xff] %v3150_v18  ;;  %v3216_v36 = vperm.slane %v410_v32, 0  ;;  %v3220_v40 = vperm.slane %v410_v32, 1  ;;  %v3230_v53 = vperm.slane %v410_v32, 2  ;;  %v3232_v55 = vperm.slane %v410_v32, 3 }
  0x46   : > { %1004 = vmatpush.bf16.msrb.mxu3 %v2959_v9 }
  0x47   : > { %963 = vmatpush.bf16.msrb.mxu0 %v2961_v10 }
  0x48   : > { %977 = vmatpush.bf16.msrb.mxu1 %v2973_v14 }
  0x49   : > { %991 = vmatpush.bf16.msrb.mxu2 %v2992_v21 }
  0x4a   : > { %1005 = vmatpush.bf16.msrb.mxu3 %v2996_v22  ;;  %617 = vmatmul.bf16.gmra.mxu0 %v2320_v20 }
  0x4b   : > { %964 = vmatpush.bf16.msrb.mxu0 %v2998_v23  ;;  %646 = vmatmul.bf16.gmra.mxu1 %v2320_v20 }
  0x4c   : > { %978 = vmatpush.bf16.msrb.mxu1 %v3010_v27  ;;  %675 = vmatmul.bf16.gmra.mxu2 %v2320_v20 }
  0x4d   : > { %704 = vmatmul.bf16.gmra.mxu3 %v2320_v20  ;;  %992 = vmatpush.bf16.msrb.mxu2 %v3028_v33  ;;  %v753_v20 = vld [vmem:[#allocation2 + $0x8] sm:$0xff] }
  0x4e   : > { %1006 = vmatpush.bf16.msrb.mxu3 %v3032_v34  ;;  %v767_v24 = vpack.c.bf16 %v753_v20, %v752_v19 }
  0x4f   : > { %965 = vmatpush.bf16.msrb.mxu0 %v3034_v35 }
  0x50   : > { %979 = vmatpush.bf16.msrb.mxu1 %v3043_v39 }
  0x51   : > { %993 = vmatpush.bf16.msrb.mxu2 %v3052_v43 }
  0x52   : > { %1007 = vmatpush.bf16.msrb.mxu3 %v3065_v47 }
  0x53   : > { %966 = vmatpush.bf16.msrb.mxu0 %v3067_v51 }
  0x54   : > { %980 = vmatpush.bf16.msrb.mxu1 %v3079_v56 }
  0x55   : > { %994 = vmatpush.bf16.msrb.mxu2 %v3100_v3 }
  0x56   : > { %1008 = vmatpush.bf16.msrb.mxu3 %v3104_v4 }
  0x57   : > { %967 = vmatpush.bf16.msrb.mxu0 %v3106_v5 }
  0x58   : > { %981 = vmatpush.bf16.msrb.mxu1 %v3115_v11 }
  0x59   : > { %995 = vmatpush.bf16.msrb.mxu2 %v3124_v15 }
  0x5a   : > { %1009 = vmatpush.bf16.msrb.mxu3 %v3128_v16  ;;  %622 = vmatmul.bf16.gmra.mxu0 %v2321_v17 }
  0x5b   : > { %1072 = vmatpush.bf16.msra.mxu0 %v2856_v38  ;;  %651 = vmatmul.bf16.gmra.mxu1 %v2321_v17 }
  0x5c   : > { %1086 = vmatpush.bf16.msra.mxu1 %v2867_v42  ;;  %680 = vmatmul.bf16.gmra.mxu2 %v2321_v17 }
  0x5d   : > { %1100 = vmatpush.bf16.msra.mxu2 %v2884_v48  ;;  %709 = vmatmul.bf16.gmra.mxu3 %v2321_v17 }
  0x5e   : > { %1114 = vmatpush.bf16.msra.mxu3 %v2887_v49 }
  0x5f   : > { %1073 = vmatpush.bf16.msra.mxu0 %v2889_v50 }
  0x60   : > { %1087 = vmatpush.bf16.msra.mxu1 %v2901_v54 }
  0x61   : > { %1101 = vmatpush.bf16.msra.mxu2 %v2919_v60 }
  0x62   : > { %1115 = vmatpush.bf16.msra.mxu3 %v2923_v61 }
  0x63   : > { %1074 = vmatpush.bf16.msra.mxu0 %v2925_v62 }
  0x64   : > { %1088 = vmatpush.bf16.msra.mxu1 %v2937_v2 }
  0x65   : > { %1102 = vmatpush.bf16.msra.mxu2 %v2955_v8 }
  0x66   : > { %1116 = vmatpush.bf16.msra.mxu3 %v2959_v9 }
  0x67   : > { %1075 = vmatpush.bf16.msra.mxu0 %v2961_v10 }
  0x68   : > { %1089 = vmatpush.bf16.msra.mxu1 %v2973_v14 }
  0x69   : > { %1103 = vmatpush.bf16.msra.mxu2 %v2992_v21 }
  0x6a   : > { %1117 = vmatpush.bf16.msra.mxu3 %v2996_v22  ;;  %627 = vmatmul.bf16.gmra.mxu0 %v3150_v18 }
  0x6b   : > { %1076 = vmatpush.bf16.msra.mxu0 %v2998_v23  ;;  %656 = vmatmul.bf16.gmra.mxu1 %v3150_v18 }
  0x6c   : > { %1090 = vmatpush.bf16.msra.mxu1 %v3010_v27  ;;  %685 = vmatmul.bf16.gmra.mxu2 %v3150_v18 }
  0x6d   : > { %1104 = vmatpush.bf16.msra.mxu2 %v3028_v33  ;;  %714 = vmatmul.bf16.gmra.mxu3 %v3150_v18 }
  0x6e   : > { %1118 = vmatpush.bf16.msra.mxu3 %v3032_v34 }
  0x6f   : > { %1077 = vmatpush.bf16.msra.mxu0 %v3034_v35 }
  0x70   : > { %1091 = vmatpush.bf16.msra.mxu1 %v3043_v39 }
  0x71   : > { %1105 = vmatpush.bf16.msra.mxu2 %v3052_v43 }
  0x72   : > { %1119 = vmatpush.bf16.msra.mxu3 %v3065_v47 }
  0x73   : > { %1078 = vmatpush.bf16.msra.mxu0 %v3067_v51 }
  0x74   : > { %1092 = vmatpush.bf16.msra.mxu1 %v3079_v56 }
  0x75   : > { %1106 = vmatpush.bf16.msra.mxu2 %v3100_v3 }
  0x76   : > { %1120 = vmatpush.bf16.msra.mxu3 %v3104_v4 }
  0x77   : > { %1079 = vmatpush.bf16.msra.mxu0 %v3106_v5 }
  0x78   : > { %1093 = vmatpush.bf16.msra.mxu1 %v3115_v11 }
  0x79   : > { %1107 = vmatpush.bf16.msra.mxu2 %v3124_v15 }
  0x7a   : > { %1121 = vmatpush.bf16.msra.mxu3 %v3128_v16  ;;  %968 = vmatmul.bf16.vlgmr.msrb.gmra.mxu0 %v767_v24 }
  0x7b   : > { %982 = vmatmul.bf16.vlgmr.msrb.gmra.mxu1 %v767_v24  ;;  %1184 = vmatpush.bf16.msrb.mxu0 %v2856_v38 }
  0x7c   : > { %996 = vmatmul.bf16.vlgmr.msrb.gmra.mxu2 %v767_v24  ;;  %1198 = vmatpush.bf16.msrb.mxu1 %v2867_v42 }
  0x7d   : > { %1010 = vmatmul.bf16.vlgmr.msrb.gmra.mxu3 %v767_v24  ;;  %1212 = vmatpush.bf16.msrb.mxu2 %v2884_v48 }
  0x7e   : > { %1226 = vmatpush.bf16.msrb.mxu3 %v2887_v49 }
  0x7f   : > { %1185 = vmatpush.bf16.msrb.mxu0 %v2889_v50 }
  0x80   : > { %1199 = vmatpush.bf16.msrb.mxu1 %v2901_v54 }
  0x81   : > { %1213 = vmatpush.bf16.msrb.mxu2 %v2919_v60 }
  0x82   : > { %1227 = vmatpush.bf16.msrb.mxu3 %v2923_v61 }
  0x83   : > { %1186 = vmatpush.bf16.msrb.mxu0 %v2925_v62 }
  0x84   : > { %1200 = vmatpush.bf16.msrb.mxu1 %v2937_v2 }
  0x85   : > { %1214 = vmatpush.bf16.msrb.mxu2 %v2955_v8 }
  0x86   : > { %1228 = vmatpush.bf16.msrb.mxu3 %v2959_v9 }
  0x87   : > { %1187 = vmatpush.bf16.msrb.mxu0 %v2961_v10 }
  0x88   : > { %1201 = vmatpush.bf16.msrb.mxu1 %v2973_v14 }
  0x89   : > { %1215 = vmatpush.bf16.msrb.mxu2 %v2992_v21 }
  0x8a   : > { %1229 = vmatpush.bf16.msrb.mxu3 %v2996_v22 }
  0x8b   : > { %1188 = vmatpush.bf16.msrb.mxu0 %v2998_v23 }
  0x8c   : > { %1202 = vmatpush.bf16.msrb.mxu1 %v3010_v27 }
  0x8d   : > { %1216 = vmatpush.bf16.msrb.mxu2 %v3028_v33 }
  0x8e   : > { %1230 = vmatpush.bf16.msrb.mxu3 %v3032_v34 }
  0x8f   : > { %1189 = vmatpush.bf16.msrb.mxu0 %v3034_v35 }
  0x90   : > { %1203 = vmatpush.bf16.msrb.mxu1 %v3043_v39 }
  0x91   : > { %1217 = vmatpush.bf16.msrb.mxu2 %v3052_v43 }
  0x92   : > { %1231 = vmatpush.bf16.msrb.mxu3 %v3065_v47 }
  0x93   : > { %1190 = vmatpush.bf16.msrb.mxu0 %v3067_v51 }
  0x94   : > { %1204 = vmatpush.bf16.msrb.mxu1 %v3079_v56 }
  0x95   : > { %1218 = vmatpush.bf16.msrb.mxu2 %v3100_v3 }
  0x96   : > { %1232 = vmatpush.bf16.msrb.mxu3 %v3104_v4 }
  0x97   : > { %1191 = vmatpush.bf16.msrb.mxu0 %v3106_v5 }
  0x98   : > { %1205 = vmatpush.bf16.msrb.mxu1 %v3115_v11 }
  0x99   : > { %1219 = vmatpush.bf16.msrb.mxu2 %v3124_v15 }
  0x9a   : > { %1233 = vmatpush.bf16.msrb.mxu3 %v3128_v16 }
  0xb7   : > { %v613_v25 = vpop.f32.mrf.mxu0 }
  0xb8   : > { %v642_v26 = vpop.f32.mrf.mxu1 }
  0xbf   : > { %v3205_v28 = vpop.f32.mrf.mxu2  ;;  %v3209_v30 = vpop.f32.mrf.mxu0 }
  0xc0   : > { %v3207_v29 = vpop.f32.mrf.mxu3  ;;  %v3211_v31 = vpop.f32.mrf.mxu1 }
  0xc7   : > { %v3218_v37 = vpop.f32.mrf.mxu2  ;;  %v618_v44 = vpop.f32.mrf.mxu0 }
  0xc8   : > { %v3222_v41 = vpop.f32.mrf.mxu3  ;;  %v3225_v45 = vadd.f32 %v618_v44, %v3216_v36  ;;  %v647_v46 = vpop.f32.mrf.mxu1 }
  0xc9   : > { %v3228_v52 = vadd.f32 %v647_v46, %v3220_v40 }
  0xcf   : > { %v676_v57 = vpop.f32.mrf.mxu2  ;;  %v620_v63 = vpop.f32.mrf.mxu0 }
  0xd0   : > { %v3235_v58 = vadd.f32 %v676_v57, %v3230_v53  ;;  %v705_v59 = vpop.f32.mrf.mxu3  ;;  %v3241_v1 = vadd.f32 %v620_v63, %v3216_v36  ;;  %v649_v6 = vpop.f32.mrf.mxu1 }
  0xd1   : > { %v3238_v0 = vadd.f32 %v705_v59, %v3232_v55  ;;  %v3244_v7 = vadd.f32 %v649_v6, %v3220_v40 }
  0xd7   : > { %v678_v12 = vpop.f32.mrf.mxu2  ;;  %v623_v19 = vpop.f32.mrf.mxu0 }
  0xd8   : > { %v3247_v13 = vadd.f32 %v678_v12, %v3230_v53  ;;  %v707_v17 = vpop.f32.mrf.mxu3  ;;  %v3253_v24 = vadd.f32 %v623_v19, %v3216_v36  ;;  %v652_v32 = vpop.f32.mrf.mxu1 }
  0xd9   : > { %v3250_v20 = vadd.f32 %v707_v17, %v3232_v55  ;;  %v3256_v44 = vadd.f32 %v652_v32, %v3220_v40 }
  0xda   : > { %3624 = vst [vmem:[#allocation6_spill] sm:$0xff] %v3247_v13 }
  0xdb   : > { %3625 = vst [vmem:[#allocation7_spill] sm:$0xff] %v3250_v20 }
  0xdc   : > { %3626 = vst [vmem:[#allocation8_spill] sm:$0xff] %v3253_v24 }
  0xdd   : > { %3627 = vst [vmem:[#allocation9_spill] sm:$0xff] %v3256_v44 }
  0xdf   : > { %v681_v46 = vpop.f32.mrf.mxu2  ;;  %v625_v63 = vpop.f32.mrf.mxu0 }
  0xe0   : > { %v3259_v57 = vadd.f32 %v681_v46, %v3230_v53  ;;  %v710_v59 = vpop.f32.mrf.mxu3  ;;  %v3265_v12 = vadd.f32 %v625_v63, %v3216_v36  ;;  %v654_v17 = vpop.f32.mrf.mxu1 }
  0xe1   : > { %v3262_v6 = vadd.f32 %v710_v59, %v3232_v55  ;;  %v3268_v19 = vadd.f32 %v654_v17, %v3220_v40 }
  0xe2   : > { %3628 = vst [vmem:[#allocation10_spill] sm:$0xff] %v3259_v57 }
  0xe3   : > { %3629 = vst [vmem:[#allocation11_spill] sm:$0xff] %v3262_v6 }
  0xe4   : > { %3630 = vst [vmem:[#allocation12_spill] sm:$0xff] %v3265_v12 }
  0xe5   : > { %3631 = vst [vmem:[#allocation13_spill] sm:$0xff] %v3268_v19 }
  0xe7   : > { %v683_v18 = vpop.f32.mrf.mxu2  ;;  %v628_v24 = vpop.f32.mrf.mxu0 }
  0xe8   : > { %v3271_v32 = vadd.f32 %v683_v18, %v3230_v53  ;;  %v712_v44 = vpop.f32.mrf.mxu3  ;;  %v3277_v57 = vadd.f32 %v628_v24, %v3216_v36  ;;  %v657_v59 = vpop.f32.mrf.mxu1 }
  0xe9   : > { %v3274_v46 = vadd.f32 %v712_v44, %v3232_v55  ;;  %v3280_v63 = vadd.f32 %v657_v59, %v3220_v40 }
  0xea   : > { %3632 = vst [vmem:[#allocation14_spill] sm:$0xff] %v3271_v32 }
  0xeb   : > { %3633 = vst [vmem:[#allocation15_spill] sm:$0xff] %v3274_v46 }
  0xec   : > { %3634 = vst [vmem:[#allocation16_spill] sm:$0xff] %v3277_v57  ;;  %v614_v57 = vadd.f32 %v613_v25, %v3216_v36  ;;  %v672_v25 = vadd.f32 %v3205_v28, %v3230_v53 }
  0xed   : > { %3635 = vst [vmem:[#allocation17_spill] sm:$0xff] %v3280_v63  ;;  %v643_v63 = vadd.f32 %v642_v26, %v3220_v40  ;;  %v616_v26 = vadd.f32 %v3209_v30, %v3216_v36 }
  0xef   : > { %v686_v6 = vpop.f32.mrf.mxu2  ;;  %v630_v12 = vpop.f32.mrf.mxu0 }
  0xf0   : > { %v3283_v17 = vadd.f32 %v686_v6, %v3230_v53  ;;  %v715_v19 = vpop.f32.mrf.mxu3  ;;  %v3289_v32 = vadd.f32 %v630_v12, %v3216_v36  ;;  %v659_v44 = vpop.f32.mrf.mxu1 }
  0xf1   : > { %v3286_v18 = vadd.f32 %v715_v19, %v3232_v55  ;;  %v3292_v24 = vadd.f32 %v659_v44, %v3220_v40 }
  0xf2   : > { %3636 = vst [vmem:[#allocation18_spill] sm:$0xff] %v3283_v17 }
  0xf3   : > { %3637 = vst [vmem:[#allocation19_spill] sm:$0xff] %v3286_v18 }
  0xf4   : > { %3638 = vst [vmem:[#allocation20_spill] sm:$0xff] %v3289_v32 }
  0xf7   : > { %v688_v59 = vpop.f32.mrf.mxu2  ;;  %v969_v46 = vpop.f32.mrf.mxu0 }
  0xf8   : > { %v3297_v6 = vadd.f32 %v688_v59, %v3230_v53  ;;  %v717_v17 = vpop.f32.mrf.mxu3  ;;  %v1016_v18 = vadd.f32 %v969_v46, %v614_v57  ;;  %v983_v12 = vpop.f32.mrf.mxu1  ;;  %v645_v59 = vadd.f32 %v3211_v31, %v3220_v40  ;;  %v674_v31 = vadd.f32 %v3218_v37, %v3230_v53 }
  0xf9   : > { %v3300_v19 = vadd.f32 %v717_v17, %v3232_v55  ;;  %v1017_v32 = vadd.f32 %v983_v12, %v643_v63 }
  0xfa   : > { %3639 = vst [vmem:[#allocation21_spill] sm:$0xff] %v3297_v6  ;;  %v1024_v20 = vmul.f32 0.5, %v1016_v18 }
  0xfb   : > { %3640 = vst [vmem:[#allocation22_spill] sm:$0xff] %v3300_v19  ;;  %v1032_v13 = vmul.f32 0.5, %v1017_v32 }
  0xfc   : > { %2452 = vtanh.f32 %v1024_v20  ;;  %v701_v20 = vadd.f32 %v3207_v29, %v3232_v55 }
  0xfd   : > { %2454 = vtanh.f32 %v1032_v13 }
  0xff   : > { %v997_v44 = vpop.f32.mrf.mxu2  ;;  %v971_v19 = vpop.f32.mrf.mxu0 }
 0x100   : > { %v1018_v6 = vadd.f32 %v997_v44, %v672_v25  ;;  %v1011_v17 = vpop.f32.mrf.mxu3  ;;  %v1020_v57 = vadd.f32 %v971_v19, %v616_v26  ;;  %v985_v46 = vpop.f32.mrf.mxu1  ;;  %v754_v25 = vld [vmem:[#allocation3 + $0x8] sm:$0xff] }
 0x101   : > { %v1021_v63 = vadd.f32 %v985_v46, %v645_v59  ;;  %v1019_v36 = vadd.f32 %v1011_v17, %v701_v20 }
 0x102   : > { %2456 = vtanh.f32 %v1018_v6  ;;  %v2453_v32 = vpop.eup %2452  ;;  %v1025_v28 = vmul.f32 0.5, %v1020_v57  ;;  %v703_v6 = vadd.f32 %v3222_v41, %v3232_v55  ;;  %v755_v55 = vld [vmem:[#allocation3] sm:$0xff] }
 0x103   : > { %v2455_v13 = vpop.eup %2454  ;;  %v1028_v18 = vadd.f32 1.0, %v2453_v32  ;;  %v1033_v12 = vmul.f32 0.5, %v1021_v63  ;;  %v1042_v63 = vmul.f32 0.5, %v1019_v36 }
 0x104   : > { %v1036_v30 = vadd.f32 1.0, %v2455_v13  ;;  %2458 = vtanh.f32 %v1025_v28 }
 0x105   : > { %v1030_v40 = vmul.f32 0.5, %v1028_v18  ;;  %2460 = vtanh.f32 %v1033_v12 }
 0x106   : > { %v1038_v19 = vmul.f32 0.5, %v1036_v30 }
 0x107   : > { %v999_v26 = vpop.f32.mrf.mxu2 }
 0x108   : > { %v2457_v44 = vpop.eup %2456  ;;  %v1022_v29 = vadd.f32 %v999_v26, %v674_v31  ;;  %v1013_v59 = vpop.f32.mrf.mxu3  ;;  %v1050_v57 = vmul.f32 %v1038_v19, %v754_v25 }
 0x109   : > { %v1052_v46 = vmul.f32 %v2457_v44, %v1030_v40  ;;  %v1023_v32 = vadd.f32 %v1013_v59, %v703_v6 }
 0x10a   : > { %2462 = vtanh.f32 %v1022_v29  ;;  %v2459_v53 = vpop.eup %2458 }
 0x10b   : > { %v3314_v17 = vadd.f32 %v1052_v46, %v1050_v57  ;;  %v1043_v37 = vmul.f32 0.5, %v1023_v32  ;;  %v2461_v20 = vpop.eup %2460  ;;  %2464 = vtanh.f32 %v1042_v63  ;;  %v1029_v28 = vadd.f32 1.0, %v2459_v53 }
 0x10c   : > { %v1037_v13 = vadd.f32 1.0, %v2461_v20 }
 0x10d   : > { %2466 = vtanh.f32 %v1043_v37  ;;  %v1031_v41 = vmul.f32 0.5, %v1029_v28 }
 0x10e   : > { %v1039_v12 = vmul.f32 0.5, %v1037_v13  ;;  %2468 = vtanh.f32 %v3314_v17 }
 0x110   : > { %v2463_v18 = vpop.eup %2462  ;;  %v1051_v31 = vmul.f32 %v1039_v12, %v755_v55 }
 0x111   : > { %v1053_v30 = vmul.f32 %v2463_v18, %v1031_v41  ;;  %v2465_v25 = vpop.eup %2464 }
 0x112   : > { %v1046_v6 = vadd.f32 1.0, %v2465_v25 }
 0x113   : > { %v2467_v40 = vpop.eup %2466  ;;  %v3317_v36 = vadd.f32 %v1053_v30, %v1051_v31 }
 0x114   : > { %v1047_v19 = vadd.f32 1.0, %v2467_v40  ;;  %v2469_v26 = vpop.eup %2468  ;;  %v1048_v44 = vmul.f32 0.5, %v1046_v6 }
 0x115   : > { %2470 = vtanh.f32 %v3317_v36 }
 0x116   : > { %v1049_v29 = vmul.f32 0.5, %v1047_v19  ;;  %v1058_v57 = vmul.f32 %v2469_v26, %v1048_v44  ;;  %v3643_v44 = vld [vmem:[#allocation8_spill] sm:$0xff] }
 0x11b   : > { %v2471_v59 = vpop.eup %2470 }
 0x11c   : > { %v1059_v46 = vmul.f32 %v2471_v59, %v1049_v29  ;;  %v3644_v59 = vld [vmem:[#allocation9_spill] sm:$0xff] }
 0x11e   : > { %v1071_v63 = vpack.c.bf16 %v1059_v46, %v1058_v57 }
 0x120   : > { %1080 = vmatmul.bf16.vlgmr.msra.gmra.mxu0 %v1071_v63  ;;  %1094 = vmatmul.bf16.vlgmr.msra.gmra.mxu1 %v1071_v63 }
 0x121   : > { %1108 = vmatmul.bf16.vlgmr.msra.gmra.mxu2 %v1071_v63  ;;  %1122 = vmatmul.bf16.vlgmr.msra.gmra.mxu3 %v1071_v63 }
 0x122   : > { %1296 = vmatpush.bf16.msra.mxu0 %v2856_v38  ;;  %1310 = vmatpush.bf16.msra.mxu1 %v2867_v42 }
 0x123   : > { %1324 = vmatpush.bf16.msra.mxu2 %v2884_v48  ;;  %1338 = vmatpush.bf16.msra.mxu3 %v2887_v49 }
 0x126   : > { %1297 = vmatpush.bf16.msra.mxu0 %v2889_v50  ;;  %1311 = vmatpush.bf16.msra.mxu1 %v2901_v54 }
 0x127   : > { %1325 = vmatpush.bf16.msra.mxu2 %v2919_v60  ;;  %1339 = vmatpush.bf16.msra.mxu3 %v2923_v61 }
 0x12a   : > { %1298 = vmatpush.bf16.msra.mxu0 %v2925_v62  ;;  %1312 = vmatpush.bf16.msra.mxu1 %v2937_v2 }
 0x12b   : > { %1326 = vmatpush.bf16.msra.mxu2 %v2955_v8  ;;  %1340 = vmatpush.bf16.msra.mxu3 %v2959_v9 }
 0x12e   : > { %1299 = vmatpush.bf16.msra.mxu0 %v2961_v10  ;;  %1313 = vmatpush.bf16.msra.mxu1 %v2973_v14 }
 0x12f   : > { %1327 = vmatpush.bf16.msra.mxu2 %v2992_v21  ;;  %1341 = vmatpush.bf16.msra.mxu3 %v2996_v22 }
 0x132   : > { %1300 = vmatpush.bf16.msra.mxu0 %v2998_v23  ;;  %1314 = vmatpush.bf16.msra.mxu1 %v3010_v27 }
 0x133   : > { %1328 = vmatpush.bf16.msra.mxu2 %v3028_v33  ;;  %1342 = vmatpush.bf16.msra.mxu3 %v3032_v34 }
 0x136   : > { %1301 = vmatpush.bf16.msra.mxu0 %v3034_v35  ;;  %1315 = vmatpush.bf16.msra.mxu1 %v3043_v39 }
 0x137   : > { %1329 = vmatpush.bf16.msra.mxu2 %v3052_v43  ;;  %1343 = vmatpush.bf16.msra.mxu3 %v3065_v47 }
 0x13a   : > { %1302 = vmatpush.bf16.msra.mxu0 %v3067_v51  ;;  %1316 = vmatpush.bf16.msra.mxu1 %v3079_v56 }
 0x13b   : > { %1330 = vmatpush.bf16.msra.mxu2 %v3100_v3  ;;  %1344 = vmatpush.bf16.msra.mxu3 %v3104_v4  ;;  %v3641_v3 = vld [vmem:[#allocation6_spill] sm:$0xff] }
 0x13e   : > { %1303 = vmatpush.bf16.msra.mxu0 %v3106_v5  ;;  %1317 = vmatpush.bf16.msra.mxu1 %v3115_v11  ;;  %v3642_v5 = vld [vmem:[#allocation7_spill] sm:$0xff] }
 0x13f   : > { %1331 = vmatpush.bf16.msra.mxu2 %v3124_v15  ;;  %1345 = vmatpush.bf16.msra.mxu3 %v3128_v16 }
 0x19d   : > { %v1081_v38 = vpop.f32.mrf.mxu0  ;;  %v1095_v42 = vpop.f32.mrf.mxu1 }
 0x19e   : > { %v1128_v48 = vadd.f32 %v1081_v38, %v3225_v45  ;;  %v1129_v49 = vadd.f32 %v1095_v42, %v3228_v52 }
 0x1a0   : > { %v1136_v50 = vmul.f32 0.5, %v1128_v48  ;;  %v1144_v54 = vmul.f32 0.5, %v1129_v49  ;;  %v3645_v48 = vld [vmem:[#allocation10_spill] sm:$0xff] }
 0x1a2   : > { %2472 = vtanh.f32 %v1136_v50 }
 0x1a3   : > { %2474 = vtanh.f32 %v1144_v54 }
 0x1a4   : > { %v1109_v60 = vpop.f32.mrf.mxu2  ;;  %v1123_v61 = vpop.f32.mrf.mxu3 }
 0x1a5   : > { %v1130_v62 = vadd.f32 %v1109_v60, %v3235_v58  ;;  %v1083_v2 = vpop.f32.mrf.mxu0  ;;  %v1097_v8 = vpop.f32.mrf.mxu1  ;;  %v1131_v33 = vadd.f32 %v1123_v61, %v3238_v0  ;;  %v3646_v60 = vld [vmem:[#allocation12_spill] sm:$0xff] }
 0x1a6   : > { %v1132_v9 = vadd.f32 %v1083_v2, %v3241_v1  ;;  %v1133_v10 = vadd.f32 %v1097_v8, %v3244_v7 }
 0x1a7   : > { %2476 = vtanh.f32 %v1130_v62  ;;  %v1154_v56 = vmul.f32 0.5, %v1131_v33  ;;  %v3647_v62 = vld [vmem:[#allocation13_spill] sm:$0xff] }
 0x1a8   : > { %v2473_v14 = vpop.eup %2472  ;;  %v1137_v21 = vmul.f32 0.5, %v1132_v9  ;;  %v1145_v22 = vmul.f32 0.5, %v1133_v10 }
 0x1a9   : > { %v2475_v23 = vpop.eup %2474  ;;  %v1140_v27 = vadd.f32 1.0, %v2473_v14 }
 0x1aa   : > { %v1148_v34 = vadd.f32 1.0, %v2475_v23  ;;  %2478 = vtanh.f32 %v1137_v21 }
 0x1ab   : > { %v1142_v35 = vmul.f32 0.5, %v1140_v27  ;;  %2480 = vtanh.f32 %v1145_v22  ;;  %v3648_v22 = vld [vmem:[#allocation11_spill] sm:$0xff] }
 0x1ac   : > { %v1150_v39 = vmul.f32 0.5, %v1148_v34  ;;  %v1111_v43 = vpop.f32.mrf.mxu2  ;;  %v1125_v47 = vpop.f32.mrf.mxu3 }
 0x1ad   : > { %v2477_v51 = vpop.eup %2476  ;;  %v1134_v4 = vadd.f32 %v1111_v43, %v3641_v3  ;;  %v1135_v11 = vadd.f32 %v1125_v47, %v3642_v5  ;;  %v3650_v3 = vld [vmem:[#allocation15_spill] sm:$0xff] }
 0x1ae   : > { %v1162_v15 = vmul.f32 %v1150_v39, %v3314_v17  ;;  %v1164_v16 = vmul.f32 %v2477_v51, %v1142_v35  ;;  %v3649_v51 = vld [vmem:[#allocation14_spill] sm:$0xff] }
 0x1af   : > { %2482 = vtanh.f32 %v1134_v4  ;;  %v1155_v45 = vmul.f32 0.5, %v1135_v11 }
 0x1b0   : > { %v2479_v52 = vpop.eup %2478  ;;  %v1166_v58 = vadd.f32 %v1164_v16, %v1162_v15  ;;  %2484 = vtanh.f32 %v1154_v56 }
 0x1b1   : > { %v2481_v0 = vpop.eup %2480  ;;  %v1141_v1 = vadd.f32 1.0, %v2479_v52  ;;  %2486 = vtanh.f32 %v1155_v45 }
 0x1b2   : > { %v1149_v7 = vadd.f32 1.0, %v2481_v0  ;;  %2488 = vtanh.f32 %v1166_v58 }
 0x1b3   : > { %v1143_v32 = vmul.f32 0.5, %v1141_v1 }
 0x1b4   : > { %v1151_v37 = vmul.f32 0.5, %v1149_v7 }
 0x1b5   : > { %v2483_v53 = vpop.eup %2482 }
 0x1b6   : > { %v1163_v20 = vmul.f32 %v1151_v37, %v3317_v36  ;;  %v1165_v28 = vmul.f32 %v2483_v53, %v1143_v32  ;;  %v2485_v13 = vpop.eup %2484 }
 0x1b7   : > { %v2487_v41 = vpop.eup %2486  ;;  %v1158_v55 = vadd.f32 1.0, %v2485_v13 }
 0x1b8   : > { %v1167_v17 = vadd.f32 %v1165_v28, %v1163_v20  ;;  %v1159_v18 = vadd.f32 1.0, %v2487_v41  ;;  %v2489_v12 = vpop.eup %2488 }
 0x1b9   : > { %v1160_v30 = vmul.f32 0.5, %v1158_v55 }
 0x1ba   : > { %2490 = vtanh.f32 %v1167_v17  ;;  %v1161_v31 = vmul.f32 0.5, %v1159_v18 }
 0x1bb   : > { %v1170_v40 = vmul.f32 %v2489_v12, %v1160_v30 }
 0x1c0   : > { %v2491_v25 = vpop.eup %2490 }
 0x1c1   : > { %v1171_v6 = vmul.f32 %v2491_v25, %v1161_v31 }
 0x1c3   : > { %v1183_v19 = vpack.c.bf16 %v1171_v6, %v1170_v40 }
 0x1c5   : > { %1192 = vmatmul.bf16.vlgmr.msrb.gmra.mxu0 %v1183_v19  ;;  %1206 = vmatmul.bf16.vlgmr.msrb.gmra.mxu1 %v1183_v19 }
 0x1c6   : > { %1220 = vmatmul.bf16.vlgmr.msrb.gmra.mxu2 %v1183_v19  ;;  %1234 = vmatmul.bf16.vlgmr.msrb.gmra.mxu3 %v1183_v19 }
 0x242   : > { %v1193_v36 = vpop.f32.mrf.mxu0  ;;  %v1207_v26 = vpop.f32.mrf.mxu1 }
 0x243   : > { %v1240_v29 = vadd.f32 %v1193_v36, %v3643_v44  ;;  %v1241_v57 = vadd.f32 %v1207_v26, %v3644_v59  ;;  %v3651_v36 = vld [vmem:[#allocation16_spill] sm:$0xff]  ;;  %v3652_v44 = vld [vmem:[#allocation17_spill] sm:$0xff] }
 0x245   : > { %v1248_v46 = vmul.f32 0.5, %v1240_v29  ;;  %v1256_v63 = vmul.f32 0.5, %v1241_v57 }
 0x247   : > { %2492 = vtanh.f32 %v1248_v46 }
 0x248   : > { %2494 = vtanh.f32 %v1256_v63 }
 0x249   : > { %v1221_v38 = vpop.f32.mrf.mxu2  ;;  %v1235_v42 = vpop.f32.mrf.mxu3 }
 0x24a   : > { %v1242_v49 = vadd.f32 %v1221_v38, %v3645_v48  ;;  %v1195_v50 = vpop.f32.mrf.mxu0  ;;  %v1209_v54 = vpop.f32.mrf.mxu1  ;;  %v1243_v23 = vadd.f32 %v1235_v42, %v3648_v22  ;;  %v3653_v38 = vld [vmem:[#allocation18_spill] sm:$0xff]  ;;  %v3654_v48 = vld [vmem:[#allocation19_spill] sm:$0xff] }
 0x24b   : > { %v1244_v61 = vadd.f32 %v1195_v50, %v3646_v60  ;;  %v1245_v2 = vadd.f32 %v1209_v54, %v3647_v62  ;;  %v3655_v60 = vld [vmem:[#allocation20_spill] sm:$0xff] }
 0x24c   : > { %2496 = vtanh.f32 %v1242_v49  ;;  %v1266_v47 = vmul.f32 0.5, %v1243_v23 }
 0x24d   : > { %v2493_v8 = vpop.eup %2492  ;;  %v1249_v9 = vmul.f32 0.5, %v1244_v61  ;;  %v1257_v10 = vmul.f32 0.5, %v1245_v2 }
 0x24e   : > { %v2495_v14 = vpop.eup %2494  ;;  %v1252_v21 = vadd.f32 1.0, %v2493_v8 }
 0x24f   : > { %v1260_v27 = vadd.f32 1.0, %v2495_v14  ;;  %2498 = vtanh.f32 %v1249_v9 }
 0x250   : > { %v1254_v33 = vmul.f32 0.5, %v1252_v21  ;;  %2500 = vtanh.f32 %v1257_v10 }
 0x251   : > { %v1262_v34 = vmul.f32 0.5, %v1260_v27  ;;  %v1223_v35 = vpop.f32.mrf.mxu2  ;;  %v1237_v39 = vpop.f32.mrf.mxu3 }
 0x252   : > { %v2497_v43 = vpop.eup %2496  ;;  %v1246_v56 = vadd.f32 %v1223_v35, %v3649_v51  ;;  %v1247_v4 = vadd.f32 %v1237_v39, %v3650_v3  ;;  %v3656_v39 = vld [vmem:[#allocation21_spill] sm:$0xff] }
 0x253   : > { %v1274_v5 = vmul.f32 %v1262_v34, %v1166_v58  ;;  %v1276_v11 = vmul.f32 %v2497_v43, %v1254_v33 }
 0x254   : > { %2502 = vtanh.f32 %v1246_v56  ;;  %v1267_v15 = vmul.f32 0.5, %v1247_v4 }
 0x255   : > { %v2499_v16 = vpop.eup %2498  ;;  %v3370_v45 = vadd.f32 %v1276_v11, %v1274_v5  ;;  %2504 = vtanh.f32 %v1266_v47  ;;  %v3657_v47 = vld [vmem:[#allocation22_spill] sm:$0xff] }
 0x256   : > { %v2501_v52 = vpop.eup %2500  ;;  %v1253_v0 = vadd.f32 1.0, %v2499_v16  ;;  %2506 = vtanh.f32 %v1267_v15 }
 0x257   : > { %v1261_v1 = vadd.f32 1.0, %v2501_v52  ;;  %2508 = vtanh.f32 %v3370_v45 }
 0x258   : > { %v1255_v7 = vmul.f32 0.5, %v1253_v0 }
 0x259   : > { %v1263_v32 = vmul.f32 0.5, %v1261_v1 }
 0x25a   : > { %v2503_v37 = vpop.eup %2502 }
 0x25b   : > { %v1275_v53 = vmul.f32 %v1263_v32, %v1167_v17  ;;  %v1277_v20 = vmul.f32 %v2503_v37, %v1255_v7  ;;  %v2505_v28 = vpop.eup %2504 }
 0x25c   : > { %v2507_v13 = vpop.eup %2506  ;;  %v1270_v41 = vadd.f32 1.0, %v2505_v28 }
 0x25d   : > { %v3373_v58 = vadd.f32 %v1277_v20, %v1275_v53  ;;  %v1271_v55 = vadd.f32 1.0, %v2507_v13  ;;  %v2509_v18 = vpop.eup %2508 }
 0x25e   : > { %v1272_v12 = vmul.f32 0.5, %v1270_v41 }
 0x25f   : > { %2510 = vtanh.f32 %v3373_v58  ;;  %v1273_v30 = vmul.f32 0.5, %v1271_v55 }
 0x260   : > { %v1282_v25 = vmul.f32 %v2509_v18, %v1272_v12 }
 0x265   : > { %v2511_v31 = vpop.eup %2510 }
 0x266   : > { %v1283_v40 = vmul.f32 %v2511_v31, %v1273_v30 }
 0x268   : > { %v1295_v6 = vpack.c.bf16 %v1283_v40, %v1282_v25 }
 0x26a   : > { %1304 = vmatmul.bf16.vlgmr.msra.gmra.mxu0 %v1295_v6  ;;  %1318 = vmatmul.bf16.vlgmr.msra.gmra.mxu1 %v1295_v6 }
 0x26b   : > { %1332 = vmatmul.bf16.vlgmr.msra.gmra.mxu2 %v1295_v6  ;;  %1346 = vmatmul.bf16.vlgmr.msra.gmra.mxu3 %v1295_v6 }
 0x2e7   : > { %v1305_v17 = vpop.f32.mrf.mxu0  ;;  %v1319_v19 = vpop.f32.mrf.mxu1 }
 0x2e8   : > { %v1352_v26 = vadd.f32 %v1305_v17, %v3651_v36  ;;  %v1353_v29 = vadd.f32 %v1319_v19, %v3652_v44 }
 0x2ea   : > { %v1360_v59 = vmul.f32 0.5, %v1352_v26  ;;  %v1368_v57 = vmul.f32 0.5, %v1353_v29 }
 0x2ec   : > { %2512 = vtanh.f32 %v1360_v59 }
 0x2ed   : > { %2514 = vtanh.f32 %v1368_v57 }
 0x2ee   : > { %v1333_v46 = vpop.f32.mrf.mxu2  ;;  %v1347_v63 = vpop.f32.mrf.mxu3 }
 0x2ef   : > { %v1354_v42 = vadd.f32 %v1333_v46, %v3653_v38  ;;  %v1355_v49 = vadd.f32 %v1347_v63, %v3654_v48  ;;  %v1307_v50 = vpop.f32.mrf.mxu0  ;;  %v1321_v54 = vpop.f32.mrf.mxu1 }
 0x2f0   : > { %v1356_v61 = vadd.f32 %v1307_v50, %v3655_v60  ;;  %v1357_v62 = vadd.f32 %v1321_v54, %v3292_v24 }
 0x2f1   : > { %2516 = vtanh.f32 %v1354_v42  ;;  %v1378_v2 = vmul.f32 0.5, %v1355_v49 }
 0x2f2   : > { %v2513_v8 = vpop.eup %2512  ;;  %v1361_v9 = vmul.f32 0.5, %v1356_v61  ;;  %v1369_v10 = vmul.f32 0.5, %v1357_v62 }
 0x2f3   : > { %v2515_v14 = vpop.eup %2514  ;;  %v1364_v21 = vadd.f32 1.0, %v2513_v8  ;;  %2518 = vtanh.f32 %v1378_v2 }
 0x2f4   : > { %v1372_v22 = vadd.f32 1.0, %v2515_v14  ;;  %2520 = vtanh.f32 %v1361_v9 }
 0x2f5   : > { %v1366_v23 = vmul.f32 0.5, %v1364_v21  ;;  %2522 = vtanh.f32 %v1369_v10 }
 0x2f6   : > { %v1374_v27 = vmul.f32 0.5, %v1372_v22  ;;  %v1335_v33 = vpop.f32.mrf.mxu2  ;;  %v1349_v34 = vpop.f32.mrf.mxu3 }
 0x2f7   : > { %v2517_v35 = vpop.eup %2516  ;;  %v1358_v43 = vadd.f32 %v1335_v33, %v3656_v39  ;;  %v1359_v24 = vadd.f32 %v1349_v34, %v3657_v47 }
 0x2f8   : > { %v1386_v51 = vmul.f32 %v1374_v27, %v3370_v45  ;;  %v1388_v56 = vmul.f32 %v2517_v35, %v1366_v23 }
 0x2f9   : > { %v2519_v3 = vpop.eup %2518  ;;  %2524 = vtanh.f32 %v1358_v43  ;;  %v1379_v4 = vmul.f32 0.5, %v1359_v24 }
 0x2fa   : > { %v2521_v5 = vpop.eup %2520  ;;  %v1390_v11 = vadd.f32 %v1388_v56, %v1386_v51  ;;  %v1382_v0 = vadd.f32 1.0, %v2519_v3 }
 0x2fb   : > { %v2523_v15 = vpop.eup %2522  ;;  %v1365_v16 = vadd.f32 1.0, %v2521_v5  ;;  %2526 = vtanh.f32 %v1379_v4 }
 0x2fc   : > { %2528 = vtanh.f32 %v1390_v11  ;;  %1398 = vst [vmem:[#allocation3 + $0x8] sm:$0xff] %v1390_v11  ;;  %v1373_v52 = vadd.f32 1.0, %v2523_v15  ;;  %v1384_v20 = vmul.f32 0.5, %v1382_v0 }
 0x2fd   : > { %v1367_v1 = vmul.f32 0.5, %v1365_v16 }
 0x2fe   : > { %v1375_v7 = vmul.f32 0.5, %v1373_v52 }
 0x2ff   : > { %v2525_v32 = vpop.eup %2524 }
 0x300   : > { %v1387_v37 = vmul.f32 %v1375_v7, %v3373_v58  ;;  %v1389_v53 = vmul.f32 %v2525_v32, %v1367_v1 }
 0x301   : > { %v2527_v45 = vpop.eup %2526 }
 0x302   : > { %v2529_v28 = vpop.eup %2528  ;;  %v1391_v13 = vadd.f32 %v1389_v53, %v1387_v37  ;;  %v1383_v55 = vadd.f32 1.0, %v2527_v45 }
 0x303   : > { %v3386_v41 = vmul.f32 %v2529_v28, %v1384_v20 }
 0x304   : > { %2530 = vtanh.f32 %v1391_v13  ;;  %1399 = vst [vmem:[#allocation3] sm:$0xff] %v1391_v13  ;;  %v1385_v18 = vmul.f32 0.5, %v1383_v55 }
 0x305   : > { %1396 = vst [vmem:[#allocation2] sm:$0xff] %v3386_v41 }
 0x309   : > { %1403 = sbr.rel (%p2154_p6) target bundleno = 1123 (0x463), region = 64 }
 0x30a   : > { %v2531_v12 = vpop.eup %2530 }
 0x30b   : > { %v3389_v30 = vmul.f32 %v2531_v12, %v1385_v18 }
 0x30d   : > { %1397 = vst [vmem:[#allocation2 + $0x8] sm:$0xff] %v3389_v30 }
 0x30e   : > { %v2241_v58 = vld [vmem:[%s3615_s4 + $0xa8] sm:$0xf]  ;;  %v2409_v31 = vld [vmem:[%s3615_s4 + $0xb0] sm:$0xf0]  ;;  %v2408_v25 = vld [vmem:[%s3615_s4 + $0xac] sm:$0xf] }
 0x30f   : > { %v2242_v40 = vor.u32 %v2409_v31, %v2241_v58  ;;  %v2243_v6 = vld [vmem:[%s3615_s4 + $0xb4] sm:$0xf0]  ;;  %v2249_v17 = vld [vmem:[%s3615_s4 + $0xb0] sm:$0xf]  ;;  %v2410_v19 = vld [vmem:[%s3615_s4 + $0xb8] sm:$0xf0] }
 0x310   : > { %v2246_v36 = vor.u32 %v2408_v25, %v2243_v6  ;;  %v2250_v26 = vor.u32 %v2410_v19, %v2249_v17  ;;  %v2229_v44 = vld [vmem:[%s3615_s4 + $0x90] sm:$0xf]  ;;  %v2406_v29 = vld [vmem:[%s3615_s4 + $0x98] sm:$0xf0]  ;;  %v2405_v59 = vld [vmem:[%s3615_s4 + $0x94] sm:$0xf] }
 0x311   : > { %1572 = vmatpush.bf16.msra.mxu0 %v2242_v40  ;;  %v2230_v57 = vor.u32 %v2406_v29, %v2229_v44  ;;  %v2231_v46 = vld [vmem:[%s3615_s4 + $0x9c] sm:$0xf0]  ;;  %v2237_v63 = vld [vmem:[%s3615_s4 + $0x98] sm:$0xf]  ;;  %v2407_v38 = vld [vmem:[%s3615_s4 + $0xa0] sm:$0xf0] }
 0x312   : > { %1586 = vmatpush.bf16.msra.mxu1 %v2246_v36  ;;  %1600 = vmatpush.bf16.msra.mxu2 %v2250_v26  ;;  %v2234_v42 = vor.u32 %v2405_v59, %v2231_v46  ;;  %v2238_v48 = vor.u32 %v2407_v38, %v2237_v63  ;;  %v2217_v49 = vld [vmem:[%s3615_s4 + $0x78] sm:$0xf]  ;;  %v2403_v50 = vld [vmem:[%s3615_s4 + $0x80] sm:$0xf0]  ;;  %v2402_v54 = vld [vmem:[%s3615_s4 + $0x7c] sm:$0xf] }
 0x313   : > { %v2219_v60 = vld [vmem:[%s3615_s4 + $0x84] sm:$0xf0]  ;;  %v2225_v61 = vld [vmem:[%s3615_s4 + $0x80] sm:$0xf]  ;;  %v2404_v62 = vld [vmem:[%s3615_s4 + $0x88] sm:$0xf0]  ;;  %v2218_v2 = vor.u32 %v2403_v50, %v2217_v49 }
 0x314   : > { %v2222_v8 = vor.u32 %v2402_v54, %v2219_v60  ;;  %v2226_v9 = vor.u32 %v2404_v62, %v2225_v61  ;;  %v2205_v10 = vld [vmem:[%s3615_s4 + $0x60] sm:$0xf]  ;;  %v2400_v14 = vld [vmem:[%s3615_s4 + $0x68] sm:$0xf0]  ;;  %v2399_v21 = vld [vmem:[%s3615_s4 + $0x64] sm:$0xf] }
 0x315   : > { %1573 = vmatpush.bf16.msra.mxu0 %v2230_v57  ;;  %v2207_v22 = vld [vmem:[%s3615_s4 + $0x6c] sm:$0xf0]  ;;  %v2213_v23 = vld [vmem:[%s3615_s4 + $0x68] sm:$0xf]  ;;  %v2401_v27 = vld [vmem:[%s3615_s4 + $0x70] sm:$0xf0]  ;;  %v2206_v33 = vor.u32 %v2400_v14, %v2205_v10 }
 0x316   : > { %1587 = vmatpush.bf16.msra.mxu1 %v2234_v42  ;;  %1601 = vmatpush.bf16.msra.mxu2 %v2238_v48  ;;  %v2210_v34 = vor.u32 %v2399_v21, %v2207_v22  ;;  %v2214_v35 = vor.u32 %v2401_v27, %v2213_v23  ;;  %v2193_v39 = vld [vmem:[%s3615_s4 + $0x48] sm:$0xf]  ;;  %v2397_v43 = vld [vmem:[%s3615_s4 + $0x50] sm:$0xf0]  ;;  %v2396_v47 = vld [vmem:[%s3615_s4 + $0x4c] sm:$0xf]  ;;  %v1638_v27 = vpack.c.bf16 %v3389_v30, %v3386_v41 }
 0x317   : > { %v2195_v24 = vld [vmem:[%s3615_s4 + $0x54] sm:$0xf0]  ;;  %v2201_v51 = vld [vmem:[%s3615_s4 + $0x50] sm:$0xf]  ;;  %v2398_v56 = vld [vmem:[%s3615_s4 + $0x58] sm:$0xf0]  ;;  %v2194_v3 = vor.u32 %v2397_v43, %v2193_v39 }
 0x318   : > { %v2181_v4 = vld [vmem:[%s3615_s4 + $0x30] sm:$0xf]  ;;  %v2198_v5 = vor.u32 %v2396_v47, %v2195_v24  ;;  %v2202_v11 = vor.u32 %v2398_v56, %v2201_v51  ;;  %v2394_v15 = vld [vmem:[%s3615_s4 + $0x38] sm:$0xf0]  ;;  %v2393_v16 = vld [vmem:[%s3615_s4 + $0x34] sm:$0xf] }
 0x319   : > { %1574 = vmatpush.bf16.msra.mxu0 %v2218_v2  ;;  %v2183_v52 = vld [vmem:[%s3615_s4 + $0x3c] sm:$0xf0]  ;;  %v2189_v0 = vld [vmem:[%s3615_s4 + $0x38] sm:$0xf]  ;;  %v2395_v1 = vld [vmem:[%s3615_s4 + $0x40] sm:$0xf0]  ;;  %v2182_v7 = vor.u32 %v2394_v15, %v2181_v4 }
 0x31a   : > { %1588 = vmatpush.bf16.msra.mxu1 %v2222_v8  ;;  %1602 = vmatpush.bf16.msra.mxu2 %v2226_v9  ;;  %v2186_v32 = vor.u32 %v2393_v16, %v2183_v52  ;;  %v2190_v37 = vor.u32 %v2395_v1, %v2189_v0  ;;  %v2169_v53 = vld [vmem:[%s3615_s4 + $0x18] sm:$0xf]  ;;  %v2391_v45 = vld [vmem:[%s3615_s4 + $0x20] sm:$0xf0]  ;;  %v2390_v20 = vld [vmem:[%s3615_s4 + $0x1c] sm:$0xf] }
 0x31b   : > { %v2171_v28 = vld [vmem:[%s3615_s4 + $0x24] sm:$0xf0]  ;;  %v2177_v13 = vld [vmem:[%s3615_s4 + $0x20] sm:$0xf]  ;;  %v2392_v55 = vld [vmem:[%s3615_s4 + $0x28] sm:$0xf0]  ;;  %v2170_v18 = vor.u32 %v2391_v45, %v2169_v53 }
 0x31c   : > { %v2174_v12 = vor.u32 %v2390_v20, %v2171_v28  ;;  %v2178_v58 = vor.u32 %v2392_v55, %v2177_v13  ;;  %v2157_v31 = vld [vmem:[%s3615_s4] sm:$0xf]  ;;  %v2388_v25 = vld [vmem:[%s3615_s4 + $0x8] sm:$0xf0]  ;;  %v2387_v40 = vld [vmem:[%s3615_s4 + $0x4] sm:$0xf] }
 0x31d   : > { %1575 = vmatpush.bf16.msra.mxu0 %v2206_v33  ;;  %v2159_v6 = vld [vmem:[%s3615_s4 + $0xc] sm:$0xf0]  ;;  %v2165_v17 = vld [vmem:[%s3615_s4 + $0x8] sm:$0xf]  ;;  %v2389_v19 = vld [vmem:[%s3615_s4 + $0x10] sm:$0xf0]  ;;  %v2158_v36 = vor.u32 %v2388_v25, %v2157_v31 }
 0x31e   : > { %1589 = vmatpush.bf16.msra.mxu1 %v2210_v34  ;;  %1603 = vmatpush.bf16.msra.mxu2 %v2214_v35  ;;  %v2162_v26 = vor.u32 %v2387_v40, %v2159_v6  ;;  %v2166_v44 = vor.u32 %v2389_v19, %v2165_v17  ;;  %v3658_v29 = vld [vmem:[#allocation5_spill] sm:$0xff]  ;;  %v2418_v59 = vld [vmem:[%s3617_s6 + $0x38] sm:$0xff]  ;;  %v2417_v46 = vld [vmem:[%s3617_s6 + $0x30] sm:$0xff] }
 0x31f   : > { %v2426_v57 = vld [vmem:[%s3618_s7 + $0x38] sm:$0xff]  ;;  %v2425_v63 = vld [vmem:[%s3618_s7 + $0x30] sm:$0xff]  ;;  %v2416_v38 = vld [vmem:[%s3617_s6 + $0x28] sm:$0xff] }
 0x320   : > { %1720 = vmatpush.bf16.msra.mxu3 %v2426_v57  ;;  %v2424_v42 = vld [vmem:[%s3618_s7 + $0x28] sm:$0xff]  ;;  %v2415_v48 = vld [vmem:[%s3617_s6 + $0x20] sm:$0xff]  ;;  %v2414_v50 = vld [vmem:[%s3617_s6 + $0x18] sm:$0xff] }
 0x321   : > { %1576 = vmatpush.bf16.msra.mxu0 %v2194_v3  ;;  %v2423_v49 = vld [vmem:[%s3618_s7 + $0x20] sm:$0xff]  ;;  %v2422_v54 = vld [vmem:[%s3618_s7 + $0x18] sm:$0xff]  ;;  %v2413_v60 = vld [vmem:[%s3617_s6 + $0x10] sm:$0xff] }
 0x322   : > { %1590 = vmatpush.bf16.msra.mxu1 %v2198_v5  ;;  %1604 = vmatpush.bf16.msra.mxu2 %v2202_v11  ;;  %v1436_v61 = vld [vmem:[%s3616_s5] sm:$0x7]  ;;  %v2421_v62 = vld [vmem:[%s3618_s7 + $0x10] sm:$0xff]  ;;  %v2412_v8 = vld [vmem:[%s3617_s6 + $0x8] sm:$0xff] }
 0x323   : > { %v1438_v2 = vperm.slane %v1436_v61, 0  ;;  %v2420_v9 = vld [vmem:[%s3618_s7 + $0x8] sm:$0xff]  ;;  %v2411_v10 = vld [vmem:[%s3617_s6] sm:$0xff]  ;;  %v1439_v34 = vperm.slane %v1436_v61, 1  ;;  %v1440_v35 = vperm.slane %v1436_v61, 2 }
 0x324   : > { %1721 = vmatpush.bf16.msra.mxu3 %v2425_v63  ;;  %v2419_v23 = vld [vmem:[%s3618_s7] sm:$0xff] }
 0x325   : > { %1577 = vmatpush.bf16.msra.mxu0 %v2182_v7  ;;  %v2532_v19 = vld [vmem:[%s3619_s8] ss:$0 sm:$0xff] }
 0x326   : > { %1591 = vmatpush.bf16.msra.mxu1 %v2186_v32  ;;  %1605 = vmatpush.bf16.msra.mxu2 %v2190_v37 }
 0x328   : > { %1722 = vmatpush.bf16.msra.mxu3 %v2424_v42 }
 0x329   : > { %1578 = vmatpush.bf16.msra.mxu0 %v2170_v18 }
 0x32a   : > { %1592 = vmatpush.bf16.msra.mxu1 %v2174_v12  ;;  %1606 = vmatpush.bf16.msra.mxu2 %v2178_v58 }
 0x32c   : > { %1723 = vmatpush.bf16.msra.mxu3 %v2423_v49 }
 0x32d   : > { %1579 = vmatpush.bf16.msra.mxu0 %v2158_v36 }
 0x32e   : > { %1593 = vmatpush.bf16.msra.mxu1 %v2162_v26  ;;  %1607 = vmatpush.bf16.msra.mxu2 %v2166_v44 }
 0x330   : > { %1580 = vmatmul.bf16.vlgmr.msra.gmra.mxu0 %v3658_v29  ;;  %1724 = vmatpush.bf16.msra.mxu3 %v2422_v54 }
 0x331   : > { %1594 = vmatmul.bf16.vlgmr.msra.gmra.mxu1 %v3658_v29  ;;  %1608 = vmatmul.bf16.vlgmr.msra.gmra.mxu2 %v3658_v29 }
 0x332   : > { %1782 = vmatpush.bf16.msrb.mxu0 %v2418_v59 }
 0x334   : > { %1725 = vmatpush.bf16.msra.mxu3 %v2421_v62 }
 0x336   : > { %1783 = vmatpush.bf16.msrb.mxu0 %v2417_v46 }
 0x338   : > { %1726 = vmatpush.bf16.msra.mxu3 %v2420_v9 }
 0x33a   : > { %1784 = vmatpush.bf16.msrb.mxu0 %v2416_v38 }
 0x33c   : > { %1727 = vmatpush.bf16.msra.mxu3 %v2419_v23 }
 0x33e   : > { %1785 = vmatpush.bf16.msrb.mxu0 %v2415_v48 }
 0x342   : > { %1786 = vmatpush.bf16.msrb.mxu0 %v2414_v50 }
 0x346   : > { %1787 = vmatpush.bf16.msrb.mxu0 %v2413_v60 }
 0x34a   : > { %1788 = vmatpush.bf16.msrb.mxu0 %v2412_v8 }
 0x34e   : > { %1789 = vmatpush.bf16.msrb.mxu0 %v2411_v10 }
 0x351   : > { %1790 = vmatmul.bf16.vlgmr.msrb.gmra.mxu0 %v1638_v27 }
 0x3ad   : > { %v1581_v14 = vpop.f32.mrf.mxu0 }
 0x3ae   : > { %v1582_v21 = vadd.f32 %v1581_v14, %v1438_v2  ;;  %v1595_v22 = vpop.f32.mrf.mxu1 }
 0x3af   : > { %v1596_v39 = vadd.f32 %v1595_v22, %v1439_v34 }
 0x3b0   : > { %v1614_v33 = vmul.f32 0.5, %v1582_v21 }
 0x3b2   : > { %2533 = vtanh.f32 %v1614_v33 }
 0x3b3   : > { %2535 = vtanh.f32 %v1596_v39 }
 0x3b4   : > { %v1609_v43 = vpop.f32.mrf.mxu2 }
 0x3b5   : > { %v1610_v47 = vadd.f32 %v1609_v43, %v1440_v35  ;;  %v1583_v24 = vpop.f32.mrf.mxu0 }
 0x3b6   : > { %v1584_v51 = vadd.f32 %v1583_v24, %v1438_v2  ;;  %v1597_v56 = vpop.f32.mrf.mxu1 }
 0x3b7   : > { %v1624_v11 = vmul.f32 0.5, %v1610_v47  ;;  %v1598_v41 = vadd.f32 %v1597_v56, %v1439_v34 }
 0x3b8   : > { %v2534_v3 = vpop.eup %2533  ;;  %v1615_v4 = vmul.f32 0.5, %v1584_v51 }
 0x3b9   : > { %v1618_v5 = vadd.f32 1.0, %v2534_v3  ;;  %v2536_v52 = vpop.eup %2535 }
 0x3ba   : > { %2537 = vtanh.f32 %v1615_v4 }
 0x3bb   : > { %v1620_v15 = vmul.f32 0.5, %v1618_v5  ;;  %2539 = vtanh.f32 %v1624_v11 }
 0x3bc   : > { %v1611_v30 = vpop.f32.mrf.mxu2  ;;  %2541 = vtanh.f32 %v1598_v41 }
 0x3bd   : > { %v1612_v16 = vadd.f32 %v1611_v30, %v1440_v35  ;;  %v1632_v7 = vmul.f32 %v2536_v52, %v1620_v15 }
 0x3bf   : > { %v1625_v0 = vmul.f32 0.5, %v1612_v16 }
 0x3c0   : > { %v2538_v1 = vpop.eup %2537 }
 0x3c1   : > { %v1619_v32 = vadd.f32 1.0, %v2538_v1  ;;  %2543 = vtanh.f32 %v1625_v0  ;;  %v2540_v37 = vpop.eup %2539 }
 0x3c2   : > { %v2542_v45 = vpop.eup %2541  ;;  %2545 = vtanh.f32 %v1632_v7  ;;  %v1628_v28 = vadd.f32 1.0, %v2540_v37 }
 0x3c3   : > { %v1621_v53 = vmul.f32 0.5, %v1619_v32 }
 0x3c4   : > { %v1630_v18 = vmul.f32 0.5, %v1628_v28 }
 0x3c5   : > { %v1633_v20 = vmul.f32 %v2542_v45, %v1621_v53 }
 0x3c7   : > { %v2544_v13 = vpop.eup %2543  ;;  %2547 = vtanh.f32 %v1633_v20 }
 0x3c8   : > { %v1629_v55 = vadd.f32 1.0, %v2544_v13  ;;  %v2546_v12 = vpop.eup %2545 }
 0x3c9   : > { %v1636_v25 = vmul.f32 %v2546_v12, %v1630_v18 }
 0x3ca   : > { %v1631_v58 = vmul.f32 0.5, %v1629_v55 }
 0x3cd   : > { %v2548_v31 = vpop.eup %2547 }
 0x3ce   : > { %v1637_v40 = vmul.f32 %v2548_v31, %v1631_v58  ;;  %v1791_v17 = vpop.f32.mrf.mxu0 }
 0x3d0   : > { %v1655_v6 = vpack.c.bf16 %v1637_v40, %v1636_v25 }
 0x3d2   : > { %1728 = vmatmul.bf16.vlgmr.msra.gmra.mxu3 %v1655_v6 }
 0x3d6   : > { %v1793_v29 = vpop.f32.mrf.mxu0 }
 0x455   : > { %v1729_v36 = vpop.f32.mrf.mxu3 }
 0x456   : > { %v1792_v26 = vadd.f32 %v1791_v17, %v1729_v36 }
 0x458   : > { %v1800_v44 = vadd.f32 %v2532_v19, %v1792_v26 }
 0x45a   : > { %1802 = vst [vmem:[%s3620_s9] sm:$0xff] %v1800_v44 }
 0x45d   : > { %v1731_v59 = vpop.f32.mrf.mxu3 }
 0x45e   : > { %v1794_v57 = vadd.f32 %v1793_v29, %v1731_v59 }
 0x460   : > { %v1801_v46 = vadd.f32 %v2532_v19, %v1794_v57 }
 0x462   : > { %1803 = vst [vmem:[%s3620_s9 + $0x8] sm:$0xff] %v1801_v46 }
 0x463 PF: > { %s19_s11 = sadd.s32 1, %s2571_s11   ;;  %s3659_s30 = smov %s2567_s10 }
 0x464   : > { %p16_p7 = scmp.ge.s32.totalorder %s19_s11, 4   ;;  %s3660_s10 = smov %s3662_s12 }
 0x466   :  { %18 = sbr.rel (!%p16_p7) target bundleno = 2 (0x2), region = 98 }

// kernel: bilstm_classifier_forward.1
= control target key start
LH: loop header
LB: loop body
LE: loop exit
PB: predicated region body
PF: predicated region fallthrough
CT: control target
= control target key end

     0   :  { %s2624_s30 = smov 0   ;;  %s2626_s10 = smov 0   ;;  %s3611_s0 = inlined_call_operand.vmem [shape: bf16[1,128,128], index: 0, kind: input, shape index: {}]   ;;  %s3612_s1 = inlined_call_operand.vmem [shape: bf16[128,512], index: 1, kind: input, shape index: {}]   ;;  %s3613_s2 = inlined_call_operand.vmem [shape: bf16[128,512], index: 2, kind: input, shape index: {}]   ;;  %s3614_s3 = inlined_call_operand.vmem [shape: f32[1,512], index: 3, kind: input, shape index: {}]   ;;  %s3615_s4 = inlined_call_operand.vmem [shape: bf16[128,384], index: 4, kind: input, shape index: {}]   ;;  %s3616_s5 = inlined_call_operand.vmem [shape: f32[1,384], index: 5, kind: input, shape index: {}]   ;;  %s3617_s6 = inlined_call_operand.vmem [shape: bf16[128,128], index: 6, kind: input, shape index: {}]   ;;  %s3618_s7 = inlined_call_operand.vmem [shape: bf16[128,128], index: 7, kind: input, shape index: {}]   ;;  %s3619_s8 = inlined_call_operand.vmem [shape: f32[1,128], index: 8, kind: input, shape index: {}]   ;;  %s3620_s9 = inlined_call_operand.vmem [shape: f32[16,128], index: 9, kind: output, shape index: {}]  }
   0x1   :  { %s2628_s11 = smov 0  }
   0x2 LB: > { %s28_s12 = sadd.s32 1, %s2567_s10  ;;  %p1878_p0 = scmp.ge.s32.totalorder %s2571_s11, 1  ;;  %s2571_s11 = sphi %s2628_s11, %s19_s11   ;;  %s2567_s10 = sphi %s2626_s10, %s3660_s10   ;;  %s2563_s30 = sphi %s2624_s30, %s3659_s30  }
   0x3   : > { %p29_p1 = scmp.ge.s32.totalorder %s28_s12, 2  ;;  %p306_p2 = scmp.lt.s32.totalorder %s2571_s11, 3 }
   0x5   : > { %s3662_s12 = smov (%p29_p1, %s28_s12), 0  ;;  %p307_p3 = pnand %p1878_p0, %p306_p2 }
   0x7   : > { %310 = sbr.rel (%p307_p3) target bundleno = 1123 (0x463), region = 56 }
   0xc   : > { %s1879_s13 = sshll.u32 %s2563_s30, 3  ;;  %p1881_p5 = scmp.ne.s32.totalorder %s2563_s30, 0 }
   0xd   : > { %p349_p4 = scmp.lt.s32.totalorder %s1879_s13, 15 }
   0xe   : > { %365 = sbr.rel (%p1881_p5) target bundleno = 24 (0x18), region = 60 }
   0xf   : > { %s3664_s13 = smov (!%p349_p4, %s1879_s13), 15 }
  0x10   : > { %s1880_s14 = sshll.u32 %s3664_s13, 2 }
  0x11   : > { %s2648_s17 = scalar_lea.vmem %s3611_s0, %s1880_s14 }
  0x13   : > { %v2573_v0 = vmov 0.0  }
  0x14   : > { %366 = vst [vmem:[#allocation2] sm:$0xff] %v2573_v0 }
  0x15   : > { %367 = vst [vmem:[#allocation2 + $0x8] sm:$0xff] %v2573_v0 }
  0x16   : > { %368 = vst [vmem:[#allocation3 + $0x8] sm:$0xff] %v2573_v0 }
  0x17   : > { %369 = vst [vmem:[#allocation3] sm:$0xff] %v2573_v0 }
  0x18 PF: > { %v2012_v1 = vld [vmem:[%s3612_s1 + $0xe0] sm:$0xf]  ;;  %v2353_v2 = vld [vmem:[%s3612_s1 + $0xec] sm:$0xf0]  ;;  %v2351_v3 = vld [vmem:[%s3612_s1 + $0xe4] sm:$0xf] }
  0x19   : > { %v2013_v4 = vor.u32 %v2353_v2, %v2012_v1  ;;  %v2014_v5 = vld [vmem:[%s3612_s1 + $0xf0] sm:$0xf0]  ;;  %v2020_v6 = vld [vmem:[%s3612_s1 + $0xe8] sm:$0xf]  ;;  %v2354_v7 = vld [vmem:[%s3612_s1 + $0xf4] sm:$0xf0] }
  0x1a   : > { %v2017_v8 = vor.u32 %v2351_v3, %v2014_v5  ;;  %v2021_v9 = vor.u32 %v2354_v7, %v2020_v6  ;;  %v2352_v10 = vld [vmem:[%s3612_s1 + $0xec] sm:$0xf]  ;;  %v2022_v11 = vld [vmem:[%s3612_s1 + $0xf8] sm:$0xf0]  ;;  %v1996_v12 = vld [vmem:[%s3612_s1 + $0xc0] sm:$0xf] }
  0x1b   : > { %604 = vmatpush.bf16.msra.mxu0 %v2013_v4  ;;  %v2025_v13 = vor.u32 %v2352_v10, %v2022_v11  ;;  %v2349_v14 = vld [vmem:[%s3612_s1 + $0xcc] sm:$0xf0]  ;;  %v2347_v15 = vld [vmem:[%s3612_s1 + $0xc4] sm:$0xf]  ;;  %v1998_v16 = vld [vmem:[%s3612_s1 + $0xd0] sm:$0xf0] }
  0x1c   : > { %633 = vmatpush.bf16.msra.mxu1 %v2017_v8  ;;  %662 = vmatpush.bf16.msra.mxu2 %v2021_v9  ;;  %v1997_v17 = vor.u32 %v2349_v14, %v1996_v12  ;;  %v2001_v18 = vor.u32 %v2347_v15, %v1998_v16  ;;  %v2004_v19 = vld [vmem:[%s3612_s1 + $0xc8] sm:$0xf]  ;;  %v2350_v20 = vld [vmem:[%s3612_s1 + $0xd4] sm:$0xf0]  ;;  %v2348_v21 = vld [vmem:[%s3612_s1 + $0xcc] sm:$0xf] }
  0x1d   : > { %691 = vmatpush.bf16.msra.mxu3 %v2025_v13  ;;  %v2005_v22 = vor.u32 %v2350_v20, %v2004_v19  ;;  %v2006_v23 = vld [vmem:[%s3612_s1 + $0xd8] sm:$0xf0]  ;;  %v1980_v24 = vld [vmem:[%s3612_s1 + $0xa0] sm:$0xf]  ;;  %v2345_v25 = vld [vmem:[%s3612_s1 + $0xac] sm:$0xf0] }
  0x1e   : > { %v2009_v26 = vor.u32 %v2348_v21, %v2006_v23  ;;  %v2343_v27 = vld [vmem:[%s3612_s1 + $0xa4] sm:$0xf]  ;;  %v1982_v28 = vld [vmem:[%s3612_s1 + $0xb0] sm:$0xf0]  ;;  %v1988_v29 = vld [vmem:[%s3612_s1 + $0xa8] sm:$0xf]  ;;  %v1981_v30 = vor.u32 %v2345_v25, %v1980_v24 }
  0x1f   : > { %605 = vmatpush.bf16.msra.mxu0 %v1997_v17  ;;  %v2346_v31 = vld [vmem:[%s3612_s1 + $0xb4] sm:$0xf0]  ;;  %v2344_v32 = vld [vmem:[%s3612_s1 + $0xac] sm:$0xf]  ;;  %v1990_v33 = vld [vmem:[%s3612_s1 + $0xb8] sm:$0xf0]  ;;  %v1985_v34 = vor.u32 %v2343_v27, %v1982_v28 }
  0x20   : > { %634 = vmatpush.bf16.msra.mxu1 %v2001_v18  ;;  %663 = vmatpush.bf16.msra.mxu2 %v2005_v22  ;;  %v1989_v35 = vor.u32 %v2346_v31, %v1988_v29  ;;  %v1964_v36 = vld [vmem:[%s3612_s1 + $0x80] sm:$0xf]  ;;  %v2341_v37 = vld [vmem:[%s3612_s1 + $0x8c] sm:$0xf0]  ;;  %v2339_v38 = vld [vmem:[%s3612_s1 + $0x84] sm:$0xf]  ;;  %v1993_v39 = vor.u32 %v2344_v32, %v1990_v33 }
  0x21   : > { %692 = vmatpush.bf16.msra.mxu3 %v2009_v26  ;;  %v1966_v40 = vld [vmem:[%s3612_s1 + $0x90] sm:$0xf0]  ;;  %v1972_v41 = vld [vmem:[%s3612_s1 + $0x88] sm:$0xf]  ;;  %v2342_v42 = vld [vmem:[%s3612_s1 + $0x94] sm:$0xf0]  ;;  %v1965_v45 = vor.u32 %v2341_v37, %v1964_v36 }
  0x22   : > { %v2340_v43 = vld [vmem:[%s3612_s1 + $0x8c] sm:$0xf]  ;;  %v1974_v44 = vld [vmem:[%s3612_s1 + $0x98] sm:$0xf0]  ;;  %v1969_v46 = vor.u32 %v2339_v38, %v1966_v40  ;;  %v1973_v47 = vor.u32 %v2342_v42, %v1972_v41  ;;  %v1948_v48 = vld [vmem:[%s3612_s1 + $0x60] sm:$0xf] }
  0x23   : > { %606 = vmatpush.bf16.msra.mxu0 %v1981_v30  ;;  %v2337_v49 = vld [vmem:[%s3612_s1 + $0x6c] sm:$0xf0]  ;;  %v2335_v50 = vld [vmem:[%s3612_s1 + $0x64] sm:$0xf]  ;;  %v1977_v51 = vor.u32 %v2340_v43, %v1974_v44  ;;  %v1950_v52 = vld [vmem:[%s3612_s1 + $0x70] sm:$0xf0] }
  0x24   : > { %635 = vmatpush.bf16.msra.mxu1 %v1985_v34  ;;  %664 = vmatpush.bf16.msra.mxu2 %v1989_v35  ;;  %v1956_v53 = vld [vmem:[%s3612_s1 + $0x68] sm:$0xf]  ;;  %v2338_v54 = vld [vmem:[%s3612_s1 + $0x74] sm:$0xf0]  ;;  %v2336_v55 = vld [vmem:[%s3612_s1 + $0x6c] sm:$0xf]  ;;  %v1949_v57 = vor.u32 %v2337_v49, %v1948_v48  ;;  %v1953_v58 = vor.u32 %v2335_v50, %v1950_v52 }
  0x25   : > { %693 = vmatpush.bf16.msra.mxu3 %v1993_v39  ;;  %v1958_v56 = vld [vmem:[%s3612_s1 + $0x78] sm:$0xf0]  ;;  %v1957_v59 = vor.u32 %v2338_v54, %v1956_v53  ;;  %v1932_v60 = vld [vmem:[%s3612_s1 + $0x40] sm:$0xf]  ;;  %v2333_v61 = vld [vmem:[%s3612_s1 + $0x4c] sm:$0xf0] }
  0x26   : > { %v2331_v62 = vld [vmem:[%s3612_s1 + $0x44] sm:$0xf]  ;;  %v1961_v63 = vor.u32 %v2336_v55, %v1958_v56  ;;  %v1934_v0 = vld [vmem:[%s3612_s1 + $0x50] sm:$0xf0]  ;;  %v1940_v1 = vld [vmem:[%s3612_s1 + $0x48] sm:$0xf]  ;;  %v1933_v5 = vor.u32 %v2333_v61, %v1932_v60 }
  0x27   : > { %607 = vmatpush.bf16.msra.mxu0 %v1965_v45  ;;  %v2334_v2 = vld [vmem:[%s3612_s1 + $0x54] sm:$0xf0]  ;;  %v2332_v3 = vld [vmem:[%s3612_s1 + $0x4c] sm:$0xf]  ;;  %v1942_v4 = vld [vmem:[%s3612_s1 + $0x58] sm:$0xf0]  ;;  %v1937_v6 = vor.u32 %v2331_v62, %v1934_v0 }
  0x28   : > { %636 = vmatpush.bf16.msra.mxu1 %v1969_v46  ;;  %665 = vmatpush.bf16.msra.mxu2 %v1973_v47  ;;  %v1941_v7 = vor.u32 %v2334_v2, %v1940_v1  ;;  %v1916_v8 = vld [vmem:[%s3612_s1 + $0x20] sm:$0xf]  ;;  %v2329_v9 = vld [vmem:[%s3612_s1 + $0x2c] sm:$0xf0]  ;;  %v2327_v10 = vld [vmem:[%s3612_s1 + $0x24] sm:$0xf]  ;;  %v1945_v11 = vor.u32 %v2332_v3, %v1942_v4 }
  0x29   : > { %694 = vmatpush.bf16.msra.mxu3 %v1977_v51  ;;  %v1918_v12 = vld [vmem:[%s3612_s1 + $0x30] sm:$0xf0]  ;;  %v1924_v13 = vld [vmem:[%s3612_s1 + $0x28] sm:$0xf]  ;;  %v2330_v14 = vld [vmem:[%s3612_s1 + $0x34] sm:$0xf0]  ;;  %v1917_v17 = vor.u32 %v2329_v9, %v1916_v8 }
  0x2a   : > { %v2328_v15 = vld [vmem:[%s3612_s1 + $0x2c] sm:$0xf]  ;;  %v1926_v16 = vld [vmem:[%s3612_s1 + $0x38] sm:$0xf0]  ;;  %v1900_v18 = vld [vmem:[%s3612_s1] sm:$0xf]  ;;  %v1921_v19 = vor.u32 %v2327_v10, %v1918_v12  ;;  %v1925_v20 = vor.u32 %v2330_v14, %v1924_v13 }
  0x2b   : > { %608 = vmatpush.bf16.msra.mxu0 %v1949_v57  ;;  %v2325_v21 = vld [vmem:[%s3612_s1 + $0xc] sm:$0xf0]  ;;  %v2323_v22 = vld [vmem:[%s3612_s1 + $0x4] sm:$0xf]  ;;  %v1902_v23 = vld [vmem:[%s3612_s1 + $0x10] sm:$0xf0]  ;;  %v1929_v24 = vor.u32 %v2328_v15, %v1926_v16 }
  0x2c   : > { %637 = vmatpush.bf16.msra.mxu1 %v1953_v58  ;;  %666 = vmatpush.bf16.msra.mxu2 %v1957_v59  ;;  %v1908_v25 = vld [vmem:[%s3612_s1 + $0x8] sm:$0xf]  ;;  %v2326_v26 = vld [vmem:[%s3612_s1 + $0x14] sm:$0xf0]  ;;  %v2324_v27 = vld [vmem:[%s3612_s1 + $0xc] sm:$0xf]  ;;  %v1901_v31 = vor.u32 %v2325_v21, %v1900_v18  ;;  %v1905_v34 = vor.u32 %v2323_v22, %v1902_v23 }
  0x2d   : > { %695 = vmatpush.bf16.msra.mxu3 %v1961_v63  ;;  %v1910_v28 = vld [vmem:[%s3612_s1 + $0x18] sm:$0xf0]  ;;  %v2140_v29 = vld [vmem:[%s3613_s2 + $0xe0] sm:$0xf]  ;;  %v2385_v30 = vld [vmem:[%s3613_s2 + $0xec] sm:$0xf0]  ;;  %v1909_v35 = vor.u32 %v2326_v26, %v1908_v25 }
  0x2e   : > { %v2383_v32 = vld [vmem:[%s3613_s2 + $0xe4] sm:$0xf]  ;;  %v2142_v33 = vld [vmem:[%s3613_s2 + $0xf0] sm:$0xf0]  ;;  %v1913_v37 = vor.u32 %v2324_v27, %v1910_v28  ;;  %v2856_v38 = vor.u32 %v2385_v30, %v2140_v29  ;;  %v2148_v39 = vld [vmem:[%s3613_s2 + $0xe8] sm:$0xf] }
  0x2f   : > { %609 = vmatpush.bf16.msra.mxu0 %v1933_v5  ;;  %v2319_v36 = vld [vmem:[%s2648_s17] sm:$0xff]  ;;  %v2386_v40 = vld [vmem:[%s3613_s2 + $0xf4] sm:$0xf0]  ;;  %v2384_v41 = vld [vmem:[%s3613_s2 + $0xec] sm:$0xf]  ;;  %v2867_v42 = vor.u32 %v2383_v32, %v2142_v33  ;;  %p2154_p6 = scmp.ne.s32.totalorder %s2563_s30, 1 }
  0x30   : > { %638 = vmatpush.bf16.msra.mxu1 %v1937_v6  ;;  %667 = vmatpush.bf16.msra.mxu2 %v1941_v7  ;;  %v2150_v43 = vld [vmem:[%s3613_s2 + $0xf8] sm:$0xf0]  ;;  %v2124_v44 = vld [vmem:[%s3613_s2 + $0xc0] sm:$0xf]  ;;  %v2381_v45 = vld [vmem:[%s3613_s2 + $0xcc] sm:$0xf0]  ;;  %v2884_v48 = vor.u32 %v2386_v40, %v2148_v39 }
  0x31   : > { %696 = vmatpush.bf16.msra.mxu3 %v1945_v11  ;;  %v2379_v46 = vld [vmem:[%s3613_s2 + $0xc4] sm:$0xf]  ;;  %v2126_v47 = vld [vmem:[%s3613_s2 + $0xd0] sm:$0xf0]  ;;  %v2887_v49 = vor.u32 %v2384_v41, %v2150_v43  ;;  %v2889_v50 = vor.u32 %v2381_v45, %v2124_v44  ;;  %v2132_v51 = vld [vmem:[%s3613_s2 + $0xc8] sm:$0xf] }
  0x32   : > { %v2382_v52 = vld [vmem:[%s3613_s2 + $0xd4] sm:$0xf0]  ;;  %v2380_v53 = vld [vmem:[%s3613_s2 + $0xcc] sm:$0xf]  ;;  %v2901_v54 = vor.u32 %v2379_v46, %v2126_v47  ;;  %v2134_v55 = vld [vmem:[%s3613_s2 + $0xd8] sm:$0xf0] }
  0x33   : > { %610 = vmatpush.bf16.msra.mxu0 %v1917_v17  ;;  %v2108_v56 = vld [vmem:[%s3613_s2 + $0xa0] sm:$0xf]  ;;  %v2377_v57 = vld [vmem:[%s3613_s2 + $0xac] sm:$0xf0]  ;;  %v2375_v58 = vld [vmem:[%s3613_s2 + $0xa4] sm:$0xf]  ;;  %v2919_v60 = vor.u32 %v2382_v52, %v2132_v51  ;;  %v2923_v61 = vor.u32 %v2380_v53, %v2134_v55 }
  0x34   : > { %639 = vmatpush.bf16.msra.mxu1 %v1921_v19  ;;  %668 = vmatpush.bf16.msra.mxu2 %v1925_v20  ;;  %v2110_v59 = vld [vmem:[%s3613_s2 + $0xb0] sm:$0xf0]  ;;  %v2925_v62 = vor.u32 %v2377_v57, %v2108_v56  ;;  %v2116_v63 = vld [vmem:[%s3613_s2 + $0xa8] sm:$0xf]  ;;  %v2378_v0 = vld [vmem:[%s3613_s2 + $0xb4] sm:$0xf0] }
  0x35   : > { %697 = vmatpush.bf16.msra.mxu3 %v1929_v24  ;;  %v2376_v1 = vld [vmem:[%s3613_s2 + $0xac] sm:$0xf]  ;;  %v2937_v2 = vor.u32 %v2375_v58, %v2110_v59  ;;  %v2118_v3 = vld [vmem:[%s3613_s2 + $0xb8] sm:$0xf0]  ;;  %v2092_v4 = vld [vmem:[%s3613_s2 + $0x80] sm:$0xf]  ;;  %v2955_v8 = vor.u32 %v2378_v0, %v2116_v63 }
  0x36   : > { %v2373_v5 = vld [vmem:[%s3613_s2 + $0x8c] sm:$0xf0]  ;;  %v2371_v6 = vld [vmem:[%s3613_s2 + $0x84] sm:$0xf]  ;;  %v2094_v7 = vld [vmem:[%s3613_s2 + $0x90] sm:$0xf0]  ;;  %v2959_v9 = vor.u32 %v2376_v1, %v2118_v3 }
  0x37   : > { %611 = vmatpush.bf16.msra.mxu0 %v1901_v31  ;;  %v2961_v10 = vor.u32 %v2373_v5, %v2092_v4  ;;  %v2100_v11 = vld [vmem:[%s3613_s2 + $0x88] sm:$0xf]  ;;  %v2374_v12 = vld [vmem:[%s3613_s2 + $0x94] sm:$0xf0]  ;;  %v2372_v13 = vld [vmem:[%s3613_s2 + $0x8c] sm:$0xf]  ;;  %v2973_v14 = vor.u32 %v2371_v6, %v2094_v7 }
  0x38   : > { %640 = vmatpush.bf16.msra.mxu1 %v1905_v34  ;;  %669 = vmatpush.bf16.msra.mxu2 %v1909_v35  ;;  %v2102_v15 = vld [vmem:[%s3613_s2 + $0x98] sm:$0xf0]  ;;  %v2076_v16 = vld [vmem:[%s3613_s2 + $0x60] sm:$0xf]  ;;  %v2369_v17 = vld [vmem:[%s3613_s2 + $0x6c] sm:$0xf0]  ;;  %v2992_v21 = vor.u32 %v2374_v12, %v2100_v11 }
  0x39   : > { %698 = vmatpush.bf16.msra.mxu3 %v1913_v37  ;;  %v2367_v18 = vld [vmem:[%s3613_s2 + $0x64] sm:$0xf]  ;;  %v2078_v19 = vld [vmem:[%s3613_s2 + $0x70] sm:$0xf0]  ;;  %v2320_v20 = vld [vmem:[%s2648_s17 + $0x8] sm:$0xff]  ;;  %v2996_v22 = vor.u32 %v2372_v13, %v2102_v15  ;;  %v2998_v23 = vor.u32 %v2369_v17, %v2076_v16 }
  0x3a   : > { %612 = vmatmul.bf16.vlgmr.msra.gmra.mxu0 %v2319_v36  ;;  %v2084_v24 = vld [vmem:[%s3613_s2 + $0x68] sm:$0xf]  ;;  %v2370_v25 = vld [vmem:[%s3613_s2 + $0x74] sm:$0xf0]  ;;  %v2368_v26 = vld [vmem:[%s3613_s2 + $0x6c] sm:$0xf]  ;;  %v3010_v27 = vor.u32 %v2367_v18, %v2078_v19 }
  0x3b   : > { %960 = vmatpush.bf16.msrb.mxu0 %v2856_v38  ;;  %641 = vmatmul.bf16.vlgmr.msra.gmra.mxu1 %v2319_v36  ;;  %v2086_v28 = vld [vmem:[%s3613_s2 + $0x78] sm:$0xf0]  ;;  %v2060_v29 = vld [vmem:[%s3613_s2 + $0x40] sm:$0xf]  ;;  %v2365_v30 = vld [vmem:[%s3613_s2 + $0x4c] sm:$0xf0]  ;;  %v3028_v33 = vor.u32 %v2370_v25, %v2084_v24 }
  0x3c   : > { %974 = vmatpush.bf16.msrb.mxu1 %v2867_v42  ;;  %670 = vmatmul.bf16.vlgmr.msra.gmra.mxu2 %v2319_v36  ;;  %v2363_v31 = vld [vmem:[%s3613_s2 + $0x44] sm:$0xf]  ;;  %v2062_v32 = vld [vmem:[%s3613_s2 + $0x50] sm:$0xf0]  ;;  %v3032_v34 = vor.u32 %v2368_v26, %v2086_v28  ;;  %v3034_v35 = vor.u32 %v2365_v30, %v2060_v29  ;;  %v2366_v37 = vld [vmem:[%s3613_s2 + $0x54] sm:$0xf0] }
  0x3d   : > { %699 = vmatmul.bf16.vlgmr.msra.gmra.mxu3 %v2319_v36  ;;  %988 = vmatpush.bf16.msrb.mxu2 %v2884_v48  ;;  %v2068_v36 = vld [vmem:[%s3613_s2 + $0x48] sm:$0xf]  ;;  %v3043_v39 = vor.u32 %v2363_v31, %v2062_v32  ;;  %v2364_v40 = vld [vmem:[%s3613_s2 + $0x4c] sm:$0xf]  ;;  %v2070_v41 = vld [vmem:[%s3613_s2 + $0x58] sm:$0xf0] }
  0x3e   : > { %1002 = vmatpush.bf16.msrb.mxu3 %v2887_v49  ;;  %v3052_v43 = vor.u32 %v2366_v37, %v2068_v36  ;;  %v2044_v44 = vld [vmem:[%s3613_s2 + $0x20] sm:$0xf]  ;;  %v2361_v45 = vld [vmem:[%s3613_s2 + $0x2c] sm:$0xf0]  ;;  %v2359_v46 = vld [vmem:[%s3613_s2 + $0x24] sm:$0xf]  ;;  %v3065_v47 = vor.u32 %v2364_v40, %v2070_v41 }
  0x3f   : > { %961 = vmatpush.bf16.msrb.mxu0 %v2889_v50  ;;  %v3067_v51 = vor.u32 %v2361_v45, %v2044_v44  ;;  %v2046_v52 = vld [vmem:[%s3613_s2 + $0x30] sm:$0xf0]  ;;  %v2052_v53 = vld [vmem:[%s3613_s2 + $0x28] sm:$0xf]  ;;  %v2362_v55 = vld [vmem:[%s3613_s2 + $0x34] sm:$0xf0] }
  0x40   : > { %975 = vmatpush.bf16.msrb.mxu1 %v2901_v54  ;;  %v3079_v56 = vor.u32 %v2359_v46, %v2046_v52  ;;  %v2360_v57 = vld [vmem:[%s3613_s2 + $0x2c] sm:$0xf]  ;;  %v2054_v58 = vld [vmem:[%s3613_s2 + $0x38] sm:$0xf0]  ;;  %v2028_v59 = vld [vmem:[%s3613_s2] sm:$0xf]  ;;  %v3100_v3 = vor.u32 %v2362_v55, %v2052_v53 }
  0x41   : > { %989 = vmatpush.bf16.msrb.mxu2 %v2919_v60  ;;  %v2357_v63 = vld [vmem:[%s3613_s2 + $0xc] sm:$0xf0]  ;;  %v2355_v0 = vld [vmem:[%s3613_s2 + $0x4] sm:$0xf]  ;;  %v2030_v1 = vld [vmem:[%s3613_s2 + $0x10] sm:$0xf0]  ;;  %v3104_v4 = vor.u32 %v2360_v57, %v2054_v58 }
  0x42   : > { %1003 = vmatpush.bf16.msrb.mxu3 %v2923_v61  ;;  %v3106_v5 = vor.u32 %v2357_v63, %v2028_v59  ;;  %v2036_v6 = vld [vmem:[%s3613_s2 + $0x8] sm:$0xf]  ;;  %v2358_v7 = vld [vmem:[%s3613_s2 + $0x14] sm:$0xf0]  ;;  %v3115_v11 = vor.u32 %v2355_v0, %v2030_v1  ;;  %v2356_v12 = vld [vmem:[%s3613_s2 + $0xc] sm:$0xf] }
  0x43   : > { %962 = vmatpush.bf16.msrb.mxu0 %v2925_v62  ;;  %v2038_v13 = vld [vmem:[%s3613_s2 + $0x18] sm:$0xf0]  ;;  %v3124_v15 = vor.u32 %v2358_v7, %v2036_v6  ;;  %v2321_v17 = vld [vmem:[%s2648_s17 + $0x10] sm:$0xff]  ;;  %v752_v19 = vld [vmem:[#allocation2] sm:$0xff] }
  0x44   : > { %976 = vmatpush.bf16.msrb.mxu1 %v2937_v2  ;;  %v3128_v16 = vor.u32 %v2356_v12, %v2038_v13  ;;  %v3150_v18 = vld [vmem:[%s2648_s17 + $0x18] sm:$0xff]  ;;  %v410_v32 = vld [vmem:[%s3614_s3] sm:$0xf] }
  0x45   : > { %990 = vmatpush.bf16.msrb.mxu2 %v2955_v8  ;;  %3623 = vst [vmem:[#allocation5_spill] sm:$0xff] %v3150_v18  ;;  %v3216_v36 = vperm.slane %v410_v32, 0  ;;  %v3220_v40 = vperm.slane %v410_v32, 1  ;;  %v3230_v53 = vperm.slane %v410_v32, 2  ;;  %v3232_v55 = vperm.slane %v410_v32, 3 }
  0x46   : > { %1004 = vmatpush.bf16.msrb.mxu3 %v2959_v9 }
  0x47   : > { %963 = vmatpush.bf16.msrb.mxu0 %v2961_v10 }
  0x48   : > { %977 = vmatpush.bf16.msrb.mxu1 %v2973_v14 }
  0x49   : > { %991 = vmatpush.bf16.msrb.mxu2 %v2992_v21 }
  0x4a   : > { %1005 = vmatpush.bf16.msrb.mxu3 %v2996_v22  ;;  %617 = vmatmul.bf16.gmra.mxu0 %v2320_v20 }
  0x4b   : > { %964 = vmatpush.bf16.msrb.mxu0 %v2998_v23  ;;  %646 = vmatmul.bf16.gmra.mxu1 %v2320_v20 }
  0x4c   : > { %978 = vmatpush.bf16.msrb.mxu1 %v3010_v27  ;;  %675 = vmatmul.bf16.gmra.mxu2 %v2320_v20 }
  0x4d   : > { %704 = vmatmul.bf16.gmra.mxu3 %v2320_v20  ;;  %992 = vmatpush.bf16.msrb.mxu2 %v3028_v33  ;;  %v753_v20 = vld [vmem:[#allocation2 + $0x8] sm:$0xff] }
  0x4e   : > { %1006 = vmatpush.bf16.msrb.mxu3 %v3032_v34  ;;  %v767_v24 = vpack.c.bf16 %v753_v20, %v752_v19 }
  0x4f   : > { %965 = vmatpush.bf16.msrb.mxu0 %v3034_v35 }
  0x50   : > { %979 = vmatpush.bf16.msrb.mxu1 %v3043_v39 }
  0x51   : > { %993 = vmatpush.bf16.msrb.mxu2 %v3052_v43 }
  0x52   : > { %1007 = vmatpush.bf16.msrb.mxu3 %v3065_v47 }
  0x53   : > { %966 = vmatpush.bf16.msrb.mxu0 %v3067_v51 }
  0x54   : > { %980 = vmatpush.bf16.msrb.mxu1 %v3079_v56 }
  0x55   : > { %994 = vmatpush.bf16.msrb.mxu2 %v3100_v3 }
  0x56   : > { %1008 = vmatpush.bf16.msrb.mxu3 %v3104_v4 }
  0x57   : > { %967 = vmatpush.bf16.msrb.mxu0 %v3106_v5 }
  0x58   : > { %981 = vmatpush.bf16.msrb.mxu1 %v3115_v11 }
  0x59   : > { %995 = vmatpush.bf16.msrb.mxu2 %v3124_v15 }
  0x5a   : > { %1009 = vmatpush.bf16.msrb.mxu3 %v3128_v16  ;;  %622 = vmatmul.bf16.gmra.mxu0 %v2321_v17 }
  0x5b   : > { %1072 = vmatpush.bf16.msra.mxu0 %v2856_v38  ;;  %651 = vmatmul.bf16.gmra.mxu1 %v2321_v17 }
  0x5c   : > { %1086 = vmatpush.bf16.msra.mxu1 %v2867_v42  ;;  %680 = vmatmul.bf16.gmra.mxu2 %v2321_v17 }
  0x5d   : > { %1100 = vmatpush.bf16.msra.mxu2 %v2884_v48  ;;  %709 = vmatmul.bf16.gmra.mxu3 %v2321_v17 }
  0x5e   : > { %1114 = vmatpush.bf16.msra.mxu3 %v2887_v49 }
  0x5f   : > { %1073 = vmatpush.bf16.msra.mxu0 %v2889_v50 }
  0x60   : > { %1087 = vmatpush.bf16.msra.mxu1 %v2901_v54 }
  0x61   : > { %1101 = vmatpush.bf16.msra.mxu2 %v2919_v60 }
  0x62   : > { %1115 = vmatpush.bf16.msra.mxu3 %v2923_v61 }
  0x63   : > { %1074 = vmatpush.bf16.msra.mxu0 %v2925_v62 }
  0x64   : > { %1088 = vmatpush.bf16.msra.mxu1 %v2937_v2 }
  0x65   : > { %1102 = vmatpush.bf16.msra.mxu2 %v2955_v8 }
  0x66   : > { %1116 = vmatpush.bf16.msra.mxu3 %v2959_v9 }
  0x67   : > { %1075 = vmatpush.bf16.msra.mxu0 %v2961_v10 }
  0x68   : > { %1089 = vmatpush.bf16.msra.mxu1 %v2973_v14 }
  0x69   : > { %1103 = vmatpush.bf16.msra.mxu2 %v2992_v21 }
  0x6a   : > { %1117 = vmatpush.bf16.msra.mxu3 %v2996_v22  ;;  %627 = vmatmul.bf16.gmra.mxu0 %v3150_v18 }
  0x6b   : > { %1076 = vmatpush.bf16.msra.mxu0 %v2998_v23  ;;  %656 = vmatmul.bf16.gmra.mxu1 %v3150_v18 }
  0x6c   : > { %1090 = vmatpush.bf16.msra.mxu1 %v3010_v27  ;;  %685 = vmatmul.bf16.gmra.mxu2 %v3150_v18 }
  0x6d   : > { %1104 = vmatpush.bf16.msra.mxu2 %v3028_v33  ;;  %714 = vmatmul.bf16.gmra.mxu3 %v3150_v18 }
  0x6e   : > { %1118 = vmatpush.bf16.msra.mxu3 %v3032_v34 }
  0x6f   : > { %1077 = vmatpush.bf16.msra.mxu0 %v3034_v35 }
  0x70   : > { %1091 = vmatpush.bf16.msra.mxu1 %v3043_v39 }
  0x71   : > { %1105 = vmatpush.bf16.msra.mxu2 %v3052_v43 }
  0x72   : > { %1119 = vmatpush.bf16.msra.mxu3 %v3065_v47 }
  0x73   : > { %1078 = vmatpush.bf16.msra.mxu0 %v3067_v51 }
  0x74   : > { %1092 = vmatpush.bf16.msra.mxu1 %v3079_v56 }
  0x75   : > { %1106 = vmatpush.bf16.msra.mxu2 %v3100_v3 }
  0x76   : > { %1120 = vmatpush.bf16.msra.mxu3 %v3104_v4 }
  0x77   : > { %1079 = vmatpush.bf16.msra.mxu0 %v3106_v5 }
  0x78   : > { %1093 = vmatpush.bf16.msra.mxu1 %v3115_v11 }
  0x79   : > { %1107 = vmatpush.bf16.msra.mxu2 %v3124_v15 }
  0x7a   : > { %1121 = vmatpush.bf16.msra.mxu3 %v3128_v16  ;;  %968 = vmatmul.bf16.vlgmr.msrb.gmra.mxu0 %v767_v24 }
  0x7b   : > { %982 = vmatmul.bf16.vlgmr.msrb.gmra.mxu1 %v767_v24  ;;  %1184 = vmatpush.bf16.msrb.mxu0 %v2856_v38 }
  0x7c   : > { %996 = vmatmul.bf16.vlgmr.msrb.gmra.mxu2 %v767_v24  ;;  %1198 = vmatpush.bf16.msrb.mxu1 %v2867_v42 }
  0x7d   : > { %1010 = vmatmul.bf16.vlgmr.msrb.gmra.mxu3 %v767_v24  ;;  %1212 = vmatpush.bf16.msrb.mxu2 %v2884_v48 }
  0x7e   : > { %1226 = vmatpush.bf16.msrb.mxu3 %v2887_v49 }
  0x7f   : > { %1185 = vmatpush.bf16.msrb.mxu0 %v2889_v50 }
  0x80   : > { %1199 = vmatpush.bf16.msrb.mxu1 %v2901_v54 }
  0x81   : > { %1213 = vmatpush.bf16.msrb.mxu2 %v2919_v60 }
  0x82   : > { %1227 = vmatpush.bf16.msrb.mxu3 %v2923_v61 }
  0x83   : > { %1186 = vmatpush.bf16.msrb.mxu0 %v2925_v62 }
  0x84   : > { %1200 = vmatpush.bf16.msrb.mxu1 %v2937_v2 }
  0x85   : > { %1214 = vmatpush.bf16.msrb.mxu2 %v2955_v8 }
  0x86   : > { %1228 = vmatpush.bf16.msrb.mxu3 %v2959_v9 }
  0x87   : > { %1187 = vmatpush.bf16.msrb.mxu0 %v2961_v10 }
  0x88   : > { %1201 = vmatpush.bf16.msrb.mxu1 %v2973_v14 }
  0x89   : > { %1215 = vmatpush.bf16.msrb.mxu2 %v2992_v21 }
  0x8a   : > { %1229 = vmatpush.bf16.msrb.mxu3 %v2996_v22 }
  0x8b   : > { %1188 = vmatpush.bf16.msrb.mxu0 %v2998_v23 }
  0x8c   : > { %1202 = vmatpush.bf16.msrb.mxu1 %v3010_v27 }
  0x8d   : > { %1216 = vmatpush.bf16.msrb.mxu2 %v3028_v33 }
  0x8e   : > { %1230 = vmatpush.bf16.msrb.mxu3 %v3032_v34 }
  0x8f   : > { %1189 = vmatpush.bf16.msrb.mxu0 %v3034_v35 }
  0x90   : > { %1203 = vmatpush.bf16.msrb.mxu1 %v3043_v39 }
  0x91   : > { %1217 = vmatpush.bf16.msrb.mxu2 %v3052_v43 }
  0x92   : > { %1231 = vmatpush.bf16.msrb.mxu3 %v3065_v47 }
  0x93   : > { %1190 = vmatpush.bf16.msrb.mxu0 %v3067_v51 }
  0x94   : > { %1204 = vmatpush.bf16.msrb.mxu1 %v3079_v56 }
  0x95   : > { %1218 = vmatpush.bf16.msrb.mxu2 %v3100_v3 }
  0x96   : > { %1232 = vmatpush.bf16.msrb.mxu3 %v3104_v4 }
  0x97   : > { %1191 = vmatpush.bf16.msrb.mxu0 %v3106_v5 }
  0x98   : > { %1205 = vmatpush.bf16.msrb.mxu1 %v3115_v11 }
  0x99   : > { %1219 = vmatpush.bf16.msrb.mxu2 %v3124_v15 }
  0x9a   : > { %1233 = vmatpush.bf16.msrb.mxu3 %v3128_v16 }
  0xb7   : > { %v613_v25 = vpop.f32.mrf.mxu0 }
  0xb8   : > { %v642_v26 = vpop.f32.mrf.mxu1 }
  0xbf   : > { %v3205_v28 = vpop.f32.mrf.mxu2  ;;  %v3209_v30 = vpop.f32.mrf.mxu0 }
  0xc0   : > { %v3207_v29 = vpop.f32.mrf.mxu3  ;;  %v3211_v31 = vpop.f32.mrf.mxu1 }
  0xc7   : > { %v3218_v37 = vpop.f32.mrf.mxu2  ;;  %v618_v44 = vpop.f32.mrf.mxu0 }
  0xc8   : > { %v3222_v41 = vpop.f32.mrf.mxu3  ;;  %v3225_v45 = vadd.f32 %v618_v44, %v3216_v36  ;;  %v647_v46 = vpop.f32.mrf.mxu1 }
  0xc9   : > { %v3228_v52 = vadd.f32 %v647_v46, %v3220_v40 }
  0xcf   : > { %v676_v57 = vpop.f32.mrf.mxu2  ;;  %v620_v63 = vpop.f32.mrf.mxu0 }
  0xd0   : > { %v3235_v58 = vadd.f32 %v676_v57, %v3230_v53  ;;  %v705_v59 = vpop.f32.mrf.mxu3  ;;  %v3241_v1 = vadd.f32 %v620_v63, %v3216_v36  ;;  %v649_v6 = vpop.f32.mrf.mxu1 }
  0xd1   : > { %v3238_v0 = vadd.f32 %v705_v59, %v3232_v55  ;;  %v3244_v7 = vadd.f32 %v649_v6, %v3220_v40 }
  0xd7   : > { %v678_v12 = vpop.f32.mrf.mxu2  ;;  %v623_v19 = vpop.f32.mrf.mxu0 }
  0xd8   : > { %v3247_v13 = vadd.f32 %v678_v12, %v3230_v53  ;;  %v707_v17 = vpop.f32.mrf.mxu3  ;;  %v3253_v24 = vadd.f32 %v623_v19, %v3216_v36  ;;  %v652_v32 = vpop.f32.mrf.mxu1 }
  0xd9   : > { %v3250_v20 = vadd.f32 %v707_v17, %v3232_v55  ;;  %v3256_v44 = vadd.f32 %v652_v32, %v3220_v40 }
  0xda   : > { %3624 = vst [vmem:[#allocation6_spill] sm:$0xff] %v3247_v13 }
  0xdb   : > { %3625 = vst [vmem:[#allocation7_spill] sm:$0xff] %v3250_v20 }
  0xdc   : > { %3626 = vst [vmem:[#allocation8_spill] sm:$0xff] %v3253_v24 }
  0xdd   : > { %3627 = vst [vmem:[#allocation9_spill] sm:$0xff] %v3256_v44 }
  0xdf   : > { %v681_v46 = vpop.f32.mrf.mxu2  ;;  %v625_v63 = vpop.f32.mrf.mxu0 }
  0xe0   : > { %v3259_v57 = vadd.f32 %v681_v46, %v3230_v53  ;;  %v710_v59 = vpop.f32.mrf.mxu3  ;;  %v3265_v12 = vadd.f32 %v625_v63, %v3216_v36  ;;  %v654_v17 = vpop.f32.mrf.mxu1 }
  0xe1   : > { %v3262_v6 = vadd.f32 %v710_v59, %v3232_v55  ;;  %v3268_v19 = vadd.f32 %v654_v17, %v3220_v40 }
  0xe2   : > { %3628 = vst [vmem:[#allocation10_spill] sm:$0xff] %v3259_v57 }
  0xe3   : > { %3629 = vst [vmem:[#allocation11_spill] sm:$0xff] %v3262_v6 }
  0xe4   : > { %3630 = vst [vmem:[#allocation12_spill] sm:$0xff] %v3265_v12 }
  0xe5   : > { %3631 = vst [vmem:[#allocation13_spill] sm:$0xff] %v3268_v19 }
  0xe7   : > { %v683_v18 = vpop.f32.mrf.mxu2  ;;  %v628_v24 = vpop.f32.mrf.mxu0 }
  0xe8   : > { %v3271_v32 = vadd.f32 %v683_v18, %v3230_v53  ;;  %v712_v44 = vpop.f32.mrf.mxu3  ;;  %v3277_v57 = vadd.f32 %v628_v24, %v3216_v36  ;;  %v657_v59 = vpop.f32.mrf.mxu1 }
  0xe9   : > { %v3274_v46 = vadd.f32 %v712_v44, %v3232_v55  ;;  %v3280_v63 = vadd.f32 %v657_v59, %v3220_v40 }
  0xea   : > { %3632 = vst [vmem:[#allocation14_spill] sm:$0xff] %v3271_v32 }
  0xeb   : > { %3633 = vst [vmem:[#allocation15_spill] sm:$0xff] %v3274_v46 }
  0xec   : > { %3634 = vst [vmem:[#allocation16_spill] sm:$0xff] %v3277_v57  ;;  %v614_v57 = vadd.f32 %v613_v25, %v3216_v36  ;;  %v672_v25 = vadd.f32 %v3205_v28, %v3230_v53 }
  0xed   : > { %3635 = vst [vmem:[#allocation17_spill] sm:$0xff] %v3280_v63  ;;  %v643_v63 = vadd.f32 %v642_v26, %v3220_v40  ;;  %v616_v26 = vadd.f32 %v3209_v30, %v3216_v36 }
  0xef   : > { %v686_v6 = vpop.f32.mrf.mxu2  ;;  %v630_v12 = vpop.f32.mrf.mxu0 }
  0xf0   : > { %v3283_v17 = vadd.f32 %v686_v6, %v3230_v53  ;;  %v715_v19 = vpop.f32.mrf.mxu3  ;;  %v3289_v32 = vadd.f32 %v630_v12, %v3216_v36  ;;  %v659_v44 = vpop.f32.mrf.mxu1 }
  0xf1   : > { %v3286_v18 = vadd.f32 %v715_v19, %v3232_v55  ;;  %v3292_v24 = vadd.f32 %v659_v44, %v3220_v40 }
  0xf2   : > { %3636 = vst [vmem:[#allocation18_spill] sm:$0xff] %v3283_v17 }
  0xf3   : > { %3637 = vst [vmem:[#allocation19_spill] sm:$0xff] %v3286_v18 }
  0xf4   : > { %3638 = vst [vmem:[#allocation20_spill] sm:$0xff] %v3289_v32 }
  0xf7   : > { %v688_v59 = vpop.f32.mrf.mxu2  ;;  %v969_v46 = vpop.f32.mrf.mxu0 }
  0xf8   : > { %v3297_v6 = vadd.f32 %v688_v59, %v3230_v53  ;;  %v717_v17 = vpop.f32.mrf.mxu3  ;;  %v1016_v18 = vadd.f32 %v969_v46, %v614_v57  ;;  %v983_v12 = vpop.f32.mrf.mxu1  ;;  %v645_v59 = vadd.f32 %v3211_v31, %v3220_v40  ;;  %v674_v31 = vadd.f32 %v3218_v37, %v3230_v53 }
  0xf9   : > { %v3300_v19 = vadd.f32 %v717_v17, %v3232_v55  ;;  %v1017_v32 = vadd.f32 %v983_v12, %v643_v63 }
  0xfa   : > { %3639 = vst [vmem:[#allocation21_spill] sm:$0xff] %v3297_v6  ;;  %v1024_v20 = vmul.f32 0.5, %v1016_v18 }
  0xfb   : > { %3640 = vst [vmem:[#allocation22_spill] sm:$0xff] %v3300_v19  ;;  %v1032_v13 = vmul.f32 0.5, %v1017_v32 }
  0xfc   : > { %2452 = vtanh.f32 %v1024_v20  ;;  %v701_v20 = vadd.f32 %v3207_v29, %v3232_v55 }
  0xfd   : > { %2454 = vtanh.f32 %v1032_v13 }
  0xff   : > { %v997_v44 = vpop.f32.mrf.mxu2  ;;  %v971_v19 = vpop.f32.mrf.mxu0 }
 0x100   : > { %v1018_v6 = vadd.f32 %v997_v44, %v672_v25  ;;  %v1011_v17 = vpop.f32.mrf.mxu3  ;;  %v1020_v57 = vadd.f32 %v971_v19, %v616_v26  ;;  %v985_v46 = vpop.f32.mrf.mxu1  ;;  %v754_v25 = vld [vmem:[#allocation3 + $0x8] sm:$0xff] }
 0x101   : > { %v1021_v63 = vadd.f32 %v985_v46, %v645_v59  ;;  %v1019_v36 = vadd.f32 %v1011_v17, %v701_v20 }
 0x102   : > { %2456 = vtanh.f32 %v1018_v6  ;;  %v2453_v32 = vpop.eup %2452  ;;  %v1025_v28 = vmul.f32 0.5, %v1020_v57  ;;  %v703_v6 = vadd.f32 %v3222_v41, %v3232_v55  ;;  %v755_v55 = vld [vmem:[#allocation3] sm:$0xff] }
 0x103   : > { %v2455_v13 = vpop.eup %2454  ;;  %v1028_v18 = vadd.f32 1.0, %v2453_v32  ;;  %v1033_v12 = vmul.f32 0.5, %v1021_v63  ;;  %v1042_v63 = vmul.f32 0.5, %v1019_v36 }
 0x104   : > { %v1036_v30 = vadd.f32 1.0, %v2455_v13  ;;  %2458 = vtanh.f32 %v1025_v28 }
 0x105   : > { %v1030_v40 = vmul.f32 0.5, %v1028_v18  ;;  %2460 = vtanh.f32 %v1033_v12 }
 0x106   : > { %v1038_v19 = vmul.f32 0.5, %v1036_v30 }
 0x107   : > { %v999_v26 = vpop.f32.mrf.mxu2 }
 0x108   : > { %v2457_v44 = vpop.eup %2456  ;;  %v1022_v29 = vadd.f32 %v999_v26, %v674_v31  ;;  %v1013_v59 = vpop.f32.mrf.mxu3  ;;  %v1050_v57 = vmul.f32 %v1038_v19, %v754_v25 }
 0x109   : > { %v1052_v46 = vmul.f32 %v2457_v44, %v1030_v40  ;;  %v1023_v32 = vadd.f32 %v1013_v59, %v703_v6 }
 0x10a   : > { %2462 = vtanh.f32 %v1022_v29  ;;  %v2459_v53 = vpop.eup %2458 }
 0x10b   : > { %v3314_v17 = vadd.f32 %v1052_v46, %v1050_v57  ;;  %v1043_v37 = vmul.f32 0.5, %v1023_v32  ;;  %v2461_v20 = vpop.eup %2460  ;;  %2464 = vtanh.f32 %v1042_v63  ;;  %v1029_v28 = vadd.f32 1.0, %v2459_v53 }
 0x10c   : > { %v1037_v13 = vadd.f32 1.0, %v2461_v20 }
 0x10d   : > { %2466 = vtanh.f32 %v1043_v37  ;;  %v1031_v41 = vmul.f32 0.5, %v1029_v28 }
 0x10e   : > { %v1039_v12 = vmul.f32 0.5, %v1037_v13  ;;  %2468 = vtanh.f32 %v3314_v17 }
 0x110   : > { %v2463_v18 = vpop.eup %2462  ;;  %v1051_v31 = vmul.f32 %v1039_v12, %v755_v55 }
 0x111   : > { %v1053_v30 = vmul.f32 %v2463_v18, %v1031_v41  ;;  %v2465_v25 = vpop.eup %2464 }
 0x112   : > { %v1046_v6 = vadd.f32 1.0, %v2465_v25 }
 0x113   : > { %v2467_v40 = vpop.eup %2466  ;;  %v3317_v36 = vadd.f32 %v1053_v30, %v1051_v31 }
 0x114   : > { %v1047_v19 = vadd.f32 1.0, %v2467_v40  ;;  %v2469_v26 = vpop.eup %2468  ;;  %v1048_v44 = vmul.f32 0.5, %v1046_v6 }
 0x115   : > { %2470 = vtanh.f32 %v3317_v36 }
 0x116   : > { %v1049_v29 = vmul.f32 0.5, %v1047_v19  ;;  %v1058_v57 = vmul.f32 %v2469_v26, %v1048_v44  ;;  %v3643_v44 = vld [vmem:[#allocation8_spill] sm:$0xff] }
 0x11b   : > { %v2471_v59 = vpop.eup %2470 }
 0x11c   : > { %v1059_v46 = vmul.f32 %v2471_v59, %v1049_v29  ;;  %v3644_v59 = vld [vmem:[#allocation9_spill] sm:$0xff] }
 0x11e   : > { %v1071_v63 = vpack.c.bf16 %v1059_v46, %v1058_v57 }
 0x120   : > { %1080 = vmatmul.bf16.vlgmr.msra.gmra.mxu0 %v1071_v63  ;;  %1094 = vmatmul.bf16.vlgmr.msra.gmra.mxu1 %v1071_v63 }
 0x121   : > { %1108 = vmatmul.bf16.vlgmr.msra.gmra.mxu2 %v1071_v63  ;;  %1122 = vmatmul.bf16.vlgmr.msra.gmra.mxu3 %v1071_v63 }
 0x122   : > { %1296 = vmatpush.bf16.msra.mxu0 %v2856_v38  ;;  %1310 = vmatpush.bf16.msra.mxu1 %v2867_v42 }
 0x123   : > { %1324 = vmatpush.bf16.msra.mxu2 %v2884_v48  ;;  %1338 = vmatpush.bf16.msra.mxu3 %v2887_v49 }
 0x126   : > { %1297 = vmatpush.bf16.msra.mxu0 %v2889_v50  ;;  %1311 = vmatpush.bf16.msra.mxu1 %v2901_v54 }
 0x127   : > { %1325 = vmatpush.bf16.msra.mxu2 %v2919_v60  ;;  %1339 = vmatpush.bf16.msra.mxu3 %v2923_v61 }
 0x12a   : > { %1298 = vmatpush.bf16.msra.mxu0 %v2925_v62  ;;  %1312 = vmatpush.bf16.msra.mxu1 %v2937_v2 }
 0x12b   : > { %1326 = vmatpush.bf16.msra.mxu2 %v2955_v8  ;;  %1340 = vmatpush.bf16.msra.mxu3 %v2959_v9 }
 0x12e   : > { %1299 = vmatpush.bf16.msra.mxu0 %v2961_v10  ;;  %1313 = vmatpush.bf16.msra.mxu1 %v2973_v14 }
 0x12f   : > { %1327 = vmatpush.bf16.msra.mxu2 %v2992_v21  ;;  %1341 = vmatpush.bf16.msra.mxu3 %v2996_v22 }
 0x132   : > { %1300 = vmatpush.bf16.msra.mxu0 %v2998_v23  ;;  %1314 = vmatpush.bf16.msra.mxu1 %v3010_v27 }
 0x133   : > { %1328 = vmatpush.bf16.msra.mxu2 %v3028_v33  ;;  %1342 = vmatpush.bf16.msra.mxu3 %v3032_v34 }
 0x136   : > { %1301 = vmatpush.bf16.msra.mxu0 %v3034_v35  ;;  %1315 = vmatpush.bf16.msra.mxu1 %v3043_v39 }
 0x137   : > { %1329 = vmatpush.bf16.msra.mxu2 %v3052_v43  ;;  %1343 = vmatpush.bf16.msra.mxu3 %v3065_v47 }
 0x13a   : > { %1302 = vmatpush.bf16.msra.mxu0 %v3067_v51  ;;  %1316 = vmatpush.bf16.msra.mxu1 %v3079_v56 }
 0x13b   : > { %1330 = vmatpush.bf16.msra.mxu2 %v3100_v3  ;;  %1344 = vmatpush.bf16.msra.mxu3 %v3104_v4  ;;  %v3641_v3 = vld [vmem:[#allocation6_spill] sm:$0xff] }
 0x13e   : > { %1303 = vmatpush.bf16.msra.mxu0 %v3106_v5  ;;  %1317 = vmatpush.bf16.msra.mxu1 %v3115_v11  ;;  %v3642_v5 = vld [vmem:[#allocation7_spill] sm:$0xff] }
 0x13f   : > { %1331 = vmatpush.bf16.msra.mxu2 %v3124_v15  ;;  %1345 = vmatpush.bf16.msra.mxu3 %v3128_v16 }
 0x19d   : > { %v1081_v38 = vpop.f32.mrf.mxu0  ;;  %v1095_v42 = vpop.f32.mrf.mxu1 }
 0x19e   : > { %v1128_v48 = vadd.f32 %v1081_v38, %v3225_v45  ;;  %v1129_v49 = vadd.f32 %v1095_v42, %v3228_v52 }
 0x1a0   : > { %v1136_v50 = vmul.f32 0.5, %v1128_v48  ;;  %v1144_v54 = vmul.f32 0.5, %v1129_v49  ;;  %v3645_v48 = vld [vmem:[#allocation10_spill] sm:$0xff] }
 0x1a2   : > { %2472 = vtanh.f32 %v1136_v50 }
 0x1a3   : > { %2474 = vtanh.f32 %v1144_v54 }
 0x1a4   : > { %v1109_v60 = vpop.f32.mrf.mxu2  ;;  %v1123_v61 = vpop.f32.mrf.mxu3 }
 0x1a5   : > { %v1130_v62 = vadd.f32 %v1109_v60, %v3235_v58  ;;  %v1083_v2 = vpop.f32.mrf.mxu0  ;;  %v1097_v8 = vpop.f32.mrf.mxu1  ;;  %v1131_v33 = vadd.f32 %v1123_v61, %v3238_v0  ;;  %v3646_v60 = vld [vmem:[#allocation12_spill] sm:$0xff] }
 0x1a6   : > { %v1132_v9 = vadd.f32 %v1083_v2, %v3241_v1  ;;  %v1133_v10 = vadd.f32 %v1097_v8, %v3244_v7 }
 0x1a7   : > { %2476 = vtanh.f32 %v1130_v62  ;;  %v1154_v56 = vmul.f32 0.5, %v1131_v33  ;;  %v3647_v62 = vld [vmem:[#allocation13_spill] sm:$0xff] }
 0x1a8   : > { %v2473_v14 = vpop.eup %2472  ;;  %v1137_v21 = vmul.f32 0.5, %v1132_v9  ;;  %v1145_v22 = vmul.f32 0.5, %v1133_v10 }
 0x1a9   : > { %v2475_v23 = vpop.eup %2474  ;;  %v1140_v27 = vadd.f32 1.0, %v2473_v14 }
 0x1aa   : > { %v1148_v34 = vadd.f32 1.0, %v2475_v23  ;;  %2478 = vtanh.f32 %v1137_v21 }
 0x1ab   : > { %v1142_v35 = vmul.f32 0.5, %v1140_v27  ;;  %2480 = vtanh.f32 %v1145_v22  ;;  %v3648_v22 = vld [vmem:[#allocation11_spill] sm:$0xff] }
 0x1ac   : > { %v1150_v39 = vmul.f32 0.5, %v1148_v34  ;;  %v1111_v43 = vpop.f32.mrf.mxu2  ;;  %v1125_v47 = vpop.f32.mrf.mxu3 }
 0x1ad   : > { %v2477_v51 = vpop.eup %2476  ;;  %v1134_v4 = vadd.f32 %v1111_v43, %v3641_v3  ;;  %v1135_v11 = vadd.f32 %v1125_v47, %v3642_v5  ;;  %v3650_v3 = vld [vmem:[#allocation15_spill] sm:$0xff] }
 0x1ae   : > { %v1162_v15 = vmul.f32 %v1150_v39, %v3314_v17  ;;  %v1164_v16 = vmul.f32 %v2477_v51, %v1142_v35  ;;  %v3649_v51 = vld [vmem:[#allocation14_spill] sm:$0xff] }
 0x1af   : > { %2482 = vtanh.f32 %v1134_v4  ;;  %v1155_v45 = vmul.f32 0.5, %v1135_v11 }
 0x1b0   : > { %v2479_v52 = vpop.eup %2478  ;;  %v1166_v58 = vadd.f32 %v1164_v16, %v1162_v15  ;;  %2484 = vtanh.f32 %v1154_v56 }
 0x1b1   : > { %v2481_v0 = vpop.eup %2480  ;;  %v1141_v1 = vadd.f32 1.0, %v2479_v52  ;;  %2486 = vtanh.f32 %v1155_v45 }
 0x1b2   : > { %v1149_v7 = vadd.f32 1.0, %v2481_v0  ;;  %2488 = vtanh.f32 %v1166_v58 }
 0x1b3   : > { %v1143_v32 = vmul.f32 0.5, %v1141_v1 }
 0x1b4   : > { %v1151_v37 = vmul.f32 0.5, %v1149_v7 }
 0x1b5   : > { %v2483_v53 = vpop.eup %2482 }
 0x1b6   : > { %v1163_v20 = vmul.f32 %v1151_v37, %v3317_v36  ;;  %v1165_v28 = vmul.f32 %v2483_v53, %v1143_v32  ;;  %v2485_v13 = vpop.eup %2484 }
 0x1b7   : > { %v2487_v41 = vpop.eup %2486  ;;  %v1158_v55 = vadd.f32 1.0, %v2485_v13 }
 0x1b8   : > { %v1167_v17 = vadd.f32 %v1165_v28, %v1163_v20  ;;  %v1159_v18 = vadd.f32 1.0, %v2487_v41  ;;  %v2489_v12 = vpop.eup %2488 }
 0x1b9   : > { %v1160_v30 = vmul.f32 0.5, %v1158_v55 }
 0x1ba   : > { %2490 = vtanh.f32 %v1167_v17  ;;  %v1161_v31 = vmul.f32 0.5, %v1159_v18 }
 0x1bb   : > { %v1170_v40 = vmul.f32 %v2489_v12, %v1160_v30 }
 0x1c0   : > { %v2491_v25 = vpop.eup %2490 }
 0x1c1   : > { %v1171_v6 = vmul.f32 %v2491_v25, %v1161_v31 }
 0x1c3   : > { %v1183_v19 = vpack.c.bf16 %v1171_v6, %v1170_v40 }
 0x1c5   : > { %1192 = vmatmul.bf16.vlgmr.msrb.gmra.mxu0 %v1183_v19  ;;  %1206 = vmatmul.bf16.vlgmr.msrb.gmra.mxu1 %v1183_v19 }
 0x1c6   : > { %1220 = vmatmul.bf16.vlgmr.msrb.gmra.mxu2 %v1183_v19  ;;  %1234 = vmatmul.bf16.vlgmr.msrb.gmra.mxu3 %v1183_v19 }
 0x242   : > { %v1193_v36 = vpop.f32.mrf.mxu0  ;;  %v1207_v26 = vpop.f32.mrf.mxu1 }
 0x243   : > { %v1240_v29 = vadd.f32 %v1193_v36, %v3643_v44  ;;  %v1241_v57 = vadd.f32 %v1207_v26, %v3644_v59  ;;  %v3651_v36 = vld [vmem:[#allocation16_spill] sm:$0xff]  ;;  %v3652_v44 = vld [vmem:[#allocation17_spill] sm:$0xff] }
 0x245   : > { %v1248_v46 = vmul.f32 0.5, %v1240_v29  ;;  %v1256_v63 = vmul.f32 0.5, %v1241_v57 }
 0x247   : > { %2492 = vtanh.f32 %v1248_v46 }
 0x248   : > { %2494 = vtanh.f32 %v1256_v63 }
 0x249   : > { %v1221_v38 = vpop.f32.mrf.mxu2  ;;  %v1235_v42 = vpop.f32.mrf.mxu3 }
 0x24a   : > { %v1242_v49 = vadd.f32 %v1221_v38, %v3645_v48  ;;  %v1195_v50 = vpop.f32.mrf.mxu0  ;;  %v1209_v54 = vpop.f32.mrf.mxu1  ;;  %v1243_v23 = vadd.f32 %v1235_v42, %v3648_v22  ;;  %v3653_v38 = vld [vmem:[#allocation18_spill] sm:$0xff]  ;;  %v3654_v48 = vld [vmem:[#allocation19_spill] sm:$0xff] }
 0x24b   : > { %v1244_v61 = vadd.f32 %v1195_v50, %v3646_v60  ;;  %v1245_v2 = vadd.f32 %v1209_v54, %v3647_v62  ;;  %v3655_v60 = vld [vmem:[#allocation20_spill] sm:$0xff] }
 0x24c   : > { %2496 = vtanh.f32 %v1242_v49  ;;  %v1266_v47 = vmul.f32 0.5, %v1243_v23 }
 0x24d   : > { %v2493_v8 = vpop.eup %2492  ;;  %v1249_v9 = vmul.f32 0.5, %v1244_v61  ;;  %v1257_v10 = vmul.f32 0.5, %v1245_v2 }
 0x24e   : > { %v2495_v14 = vpop.eup %2494  ;;  %v1252_v21 = vadd.f32 1.0, %v2493_v8 }
 0x24f   : > { %v1260_v27 = vadd.f32 1.0, %v2495_v14  ;;  %2498 = vtanh.f32 %v1249_v9 }
 0x250   : > { %v1254_v33 = vmul.f32 0.5, %v1252_v21  ;;  %2500 = vtanh.f32 %v1257_v10 }
 0x251   : > { %v1262_v34 = vmul.f32 0.5, %v1260_v27  ;;  %v1223_v35 = vpop.f32.mrf.mxu2  ;;  %v1237_v39 = vpop.f32.mrf.mxu3 }
 0x252   : > { %v2497_v43 = vpop.eup %2496  ;;  %v1246_v56 = vadd.f32 %v1223_v35, %v3649_v51  ;;  %v1247_v4 = vadd.f32 %v1237_v39, %v3650_v3  ;;  %v3656_v39 = vld [vmem:[#allocation21_spill] sm:$0xff] }
 0x253   : > { %v1274_v5 = vmul.f32 %v1262_v34, %v1166_v58  ;;  %v1276_v11 = vmul.f32 %v2497_v43, %v1254_v33 }
 0x254   : > { %2502 = vtanh.f32 %v1246_v56  ;;  %v1267_v15 = vmul.f32 0.5, %v1247_v4 }
 0x255   : > { %v2499_v16 = vpop.eup %2498  ;;  %v3370_v45 = vadd.f32 %v1276_v11, %v1274_v5  ;;  %2504 = vtanh.f32 %v1266_v47  ;;  %v3657_v47 = vld [vmem:[#allocation22_spill] sm:$0xff] }
 0x256   : > { %v2501_v52 = vpop.eup %2500  ;;  %v1253_v0 = vadd.f32 1.0, %v2499_v16  ;;  %2506 = vtanh.f32 %v1267_v15 }
 0x257   : > { %v1261_v1 = vadd.f32 1.0, %v2501_v52  ;;  %2508 = vtanh.f32 %v3370_v45 }
 0x258   : > { %v1255_v7 = vmul.f32 0.5, %v1253_v0 }
 0x259   : > { %v1263_v32 = vmul.f32 0.5, %v1261_v1 }
 0x25a   : > { %v2503_v37 = vpop.eup %2502 }
 0x25b   : > { %v1275_v53 = vmul.f32 %v1263_v32, %v1167_v17  ;;  %v1277_v20 = vmul.f32 %v2503_v37, %v1255_v7  ;;  %v2505_v28 = vpop.eup %2504 }
 0x25c   : > { %v2507_v13 = vpop.eup %2506  ;;  %v1270_v41 = vadd.f32 1.0, %v2505_v28 }
 0x25d   : > { %v3373_v58 = vadd.f32 %v1277_v20, %v1275_v53  ;;  %v1271_v55 = vadd.f32 1.0, %v2507_v13  ;;  %v2509_v18 = vpop.eup %2508 }
 0x25e   : > { %v1272_v12 = vmul.f32 0.5, %v1270_v41 }
 0x25f   : > { %2510 = vtanh.f32 %v3373_v58  ;;  %v1273_v30 = vmul.f32 0.5, %v1271_v55 }
 0x260   : > { %v1282_v25 = vmul.f32 %v2509_v18, %v1272_v12 }
 0x265   : > { %v2511_v31 = vpop.eup %2510 }
 0x266   : > { %v1283_v40 = vmul.f32 %v2511_v31, %v1273_v30 }
 0x268   : > { %v1295_v6 = vpack.c.bf16 %v1283_v40, %v1282_v25 }
 0x26a   : > { %1304 = vmatmul.bf16.vlgmr.msra.gmra.mxu0 %v1295_v6  ;;  %1318 = vmatmul.bf16.vlgmr.msra.gmra.mxu1 %v1295_v6 }
 0x26b   : > { %1332 = vmatmul.bf16.vlgmr.msra.gmra.mxu2 %v1295_v6  ;;  %1346 = vmatmul.bf16.vlgmr.msra.gmra.mxu3 %v1295_v6 }
 0x2e7   : > { %v1305_v17 = vpop.f32.mrf.mxu0  ;;  %v1319_v19 = vpop.f32.mrf.mxu1 }
 0x2e8   : > { %v1352_v26 = vadd.f32 %v1305_v17, %v3651_v36  ;;  %v1353_v29 = vadd.f32 %v1319_v19, %v3652_v44 }
 0x2ea   : > { %v1360_v59 = vmul.f32 0.5, %v1352_v26  ;;  %v1368_v57 = vmul.f32 0.5, %v1353_v29 }
 0x2ec   : > { %2512 = vtanh.f32 %v1360_v59 }
 0x2ed   : > { %2514 = vtanh.f32 %v1368_v57 }
 0x2ee   : > { %v1333_v46 = vpop.f32.mrf.mxu2  ;;  %v1347_v63 = vpop.f32.mrf.mxu3 }
 0x2ef   : > { %v1354_v42 = vadd.f32 %v1333_v46, %v3653_v38  ;;  %v1355_v49 = vadd.f32 %v1347_v63, %v3654_v48  ;;  %v1307_v50 = vpop.f32.mrf.mxu0  ;;  %v1321_v54 = vpop.f32.mrf.mxu1 }
 0x2f0   : > { %v1356_v61 = vadd.f32 %v1307_v50, %v3655_v60  ;;  %v1357_v62 = vadd.f32 %v1321_v54, %v3292_v24 }
 0x2f1   : > { %2516 = vtanh.f32 %v1354_v42  ;;  %v1378_v2 = vmul.f32 0.5, %v1355_v49 }
 0x2f2   : > { %v2513_v8 = vpop.eup %2512  ;;  %v1361_v9 = vmul.f32 0.5, %v1356_v61  ;;  %v1369_v10 = vmul.f32 0.5, %v1357_v62 }
 0x2f3   : > { %v2515_v14 = vpop.eup %2514  ;;  %v1364_v21 = vadd.f32 1.0, %v2513_v8  ;;  %2518 = vtanh.f32 %v1378_v2 }
 0x2f4   : > { %v1372_v22 = vadd.f32 1.0, %v2515_v14  ;;  %2520 = vtanh.f32 %v1361_v9 }
 0x2f5   : > { %v1366_v23 = vmul.f32 0.5, %v1364_v21  ;;  %2522 = vtanh.f32 %v1369_v10 }
 0x2f6   : > { %v1374_v27 = vmul.f32 0.5, %v1372_v22  ;;  %v1335_v33 = vpop.f32.mrf.mxu2  ;;  %v1349_v34 = vpop.f32.mrf.mxu3 }
 0x2f7   : > { %v2517_v35 = vpop.eup %2516  ;;  %v1358_v43 = vadd.f32 %v1335_v33, %v3656_v39  ;;  %v1359_v24 = vadd.f32 %v1349_v34, %v3657_v47 }
 0x2f8   : > { %v1386_v51 = vmul.f32 %v1374_v27, %v3370_v45  ;;  %v1388_v56 = vmul.f32 %v2517_v35, %v1366_v23 }
 0x2f9   : > { %v2519_v3 = vpop.eup %2518  ;;  %2524 = vtanh.f32 %v1358_v43  ;;  %v1379_v4 = vmul.f32 0.5, %v1359_v24 }
 0x2fa   : > { %v2521_v5 = vpop.eup %2520  ;;  %v1390_v11 = vadd.f32 %v1388_v56, %v1386_v51  ;;  %v1382_v0 = vadd.f32 1.0, %v2519_v3 }
 0x2fb   : > { %v2523_v15 = vpop.eup %2522  ;;  %v1365_v16 = vadd.f32 1.0, %v2521_v5  ;;  %2526 = vtanh.f32 %v1379_v4 }
 0x2fc   : > { %2528 = vtanh.f32 %v1390_v11  ;;  %1398 = vst [vmem:[#allocation3 + $0x8] sm:$0xff] %v1390_v11  ;;  %v1373_v52 = vadd.f32 1.0, %v2523_v15  ;;  %v1384_v20 = vmul.f32 0.5, %v1382_v0 }
 0x2fd   : > { %v1367_v1 = vmul.f32 0.5, %v1365_v16 }
 0x2fe   : > { %v1375_v7 = vmul.f32 0.5, %v1373_v52 }
 0x2ff   : > { %v2525_v32 = vpop.eup %2524 }
 0x300   : > { %v1387_v37 = vmul.f32 %v1375_v7, %v3373_v58  ;;  %v1389_v53 = vmul.f32 %v2525_v32, %v1367_v1 }
 0x301   : > { %v2527_v45 = vpop.eup %2526 }
 0x302   : > { %v2529_v28 = vpop.eup %2528  ;;  %v1391_v13 = vadd.f32 %v1389_v53, %v1387_v37  ;;  %v1383_v55 = vadd.f32 1.0, %v2527_v45 }
 0x303   : > { %v3386_v41 = vmul.f32 %v2529_v28, %v1384_v20 }
 0x304   : > { %2530 = vtanh.f32 %v1391_v13  ;;  %1399 = vst [vmem:[#allocation3] sm:$0xff] %v1391_v13  ;;  %v1385_v18 = vmul.f32 0.5, %v1383_v55 }
 0x305   : > { %1396 = vst [vmem:[#allocation2] sm:$0xff] %v3386_v41 }
 0x309   : > { %1403 = sbr.rel (%p2154_p6) target bundleno = 1123 (0x463), region = 64 }
 0x30a   : > { %v2531_v12 = vpop.eup %2530 }
 0x30b   : > { %v3389_v30 = vmul.f32 %v2531_v12, %v1385_v18 }
 0x30d   : > { %1397 = vst [vmem:[#allocation2 + $0x8] sm:$0xff] %v3389_v30 }
 0x30e   : > { %v2241_v58 = vld [vmem:[%s3615_s4 + $0xa8] sm:$0xf]  ;;  %v2409_v31 = vld [vmem:[%s3615_s4 + $0xb0] sm:$0xf0]  ;;  %v2408_v25 = vld [vmem:[%s3615_s4 + $0xac] sm:$0xf] }
 0x30f   : > { %v2242_v40 = vor.u32 %v2409_v31, %v2241_v58  ;;  %v2243_v6 = vld [vmem:[%s3615_s4 + $0xb4] sm:$0xf0]  ;;  %v2249_v17 = vld [vmem:[%s3615_s4 + $0xb0] sm:$0xf]  ;;  %v2410_v19 = vld [vmem:[%s3615_s4 + $0xb8] sm:$0xf0] }
 0x310   : > { %v2246_v36 = vor.u32 %v2408_v25, %v2243_v6  ;;  %v2250_v26 = vor.u32 %v2410_v19, %v2249_v17  ;;  %v2229_v44 = vld [vmem:[%s3615_s4 + $0x90] sm:$0xf]  ;;  %v2406_v29 = vld [vmem:[%s3615_s4 + $0x98] sm:$0xf0]  ;;  %v2405_v59 = vld [vmem:[%s3615_s4 + $0x94] sm:$0xf] }
 0x311   : > { %1572 = vmatpush.bf16.msra.mxu0 %v2242_v40  ;;  %v2230_v57 = vor.u32 %v2406_v29, %v2229_v44  ;;  %v2231_v46 = vld [vmem:[%s3615_s4 + $0x9c] sm:$0xf0]  ;;  %v2237_v63 = vld [vmem:[%s3615_s4 + $0x98] sm:$0xf]  ;;  %v2407_v38 = vld [vmem:[%s3615_s4 + $0xa0] sm:$0xf0] }
 0x312   : > { %1586 = vmatpush.bf16.msra.mxu1 %v2246_v36  ;;  %1600 = vmatpush.bf16.msra.mxu2 %v2250_v26  ;;  %v2234_v42 = vor.u32 %v2405_v59, %v2231_v46  ;;  %v2238_v48 = vor.u32 %v2407_v38, %v2237_v63  ;;  %v2217_v49 = vld [vmem:[%s3615_s4 + $0x78] sm:$0xf]  ;;  %v2403_v50 = vld [vmem:[%s3615_s4 + $0x80] sm:$0xf0]  ;;  %v2402_v54 = vld [vmem:[%s3615_s4 + $0x7c] sm:$0xf] }
 0x313   : > { %v2219_v60 = vld [vmem:[%s3615_s4 + $0x84] sm:$0xf0]  ;;  %v2225_v61 = vld [vmem:[%s3615_s4 + $0x80] sm:$0xf]  ;;  %v2404_v62 = vld [vmem:[%s3615_s4 + $0x88] sm:$0xf0]  ;;  %v2218_v2 = vor.u32 %v2403_v50, %v2217_v49 }
 0x314   : > { %v2222_v8 = vor.u32 %v2402_v54, %v2219_v60  ;;  %v2226_v9 = vor.u32 %v2404_v62, %v2225_v61  ;;  %v2205_v10 = vld [vmem:[%s3615_s4 + $0x60] sm:$0xf]  ;;  %v2400_v14 = vld [vmem:[%s3615_s4 + $0x68] sm:$0xf0]  ;;  %v2399_v21 = vld [vmem:[%s3615_s4 + $0x64] sm:$0xf] }
 0x315   : > { %1573 = vmatpush.bf16.msra.mxu0 %v2230_v57  ;;  %v2207_v22 = vld [vmem:[%s3615_s4 + $0x6c] sm:$0xf0]  ;;  %v2213_v23 = vld [vmem:[%s3615_s4 + $0x68] sm:$0xf]  ;;  %v2401_v27 = vld [vmem:[%s3615_s4 + $0x70] sm:$0xf0]  ;;  %v2206_v33 = vor.u32 %v2400_v14, %v2205_v10 }
 0x316   : > { %1587 = vmatpush.bf16.msra.mxu1 %v2234_v42  ;;  %1601 = vmatpush.bf16.msra.mxu2 %v2238_v48  ;;  %v2210_v34 = vor.u32 %v2399_v21, %v2207_v22  ;;  %v2214_v35 = vor.u32 %v2401_v27, %v2213_v23  ;;  %v2193_v39 = vld [vmem:[%s3615_s4 + $0x48] sm:$0xf]  ;;  %v2397_v43 = vld [vmem:[%s3615_s4 + $0x50] sm:$0xf0]  ;;  %v2396_v47 = vld [vmem:[%s3615_s4 + $0x4c] sm:$0xf]  ;;  %v1638_v27 = vpack.c.bf16 %v3389_v30, %v3386_v41 }
 0x317   : > { %v2195_v24 = vld [vmem:[%s3615_s4 + $0x54] sm:$0xf0]  ;;  %v2201_v51 = vld [vmem:[%s3615_s4 + $0x50] sm:$0xf]  ;;  %v2398_v56 = vld [vmem:[%s3615_s4 + $0x58] sm:$0xf0]  ;;  %v2194_v3 = vor.u32 %v2397_v43, %v2193_v39 }
 0x318   : > { %v2181_v4 = vld [vmem:[%s3615_s4 + $0x30] sm:$0xf]  ;;  %v2198_v5 = vor.u32 %v2396_v47, %v2195_v24  ;;  %v2202_v11 = vor.u32 %v2398_v56, %v2201_v51  ;;  %v2394_v15 = vld [vmem:[%s3615_s4 + $0x38] sm:$0xf0]  ;;  %v2393_v16 = vld [vmem:[%s3615_s4 + $0x34] sm:$0xf] }
 0x319   : > { %1574 = vmatpush.bf16.msra.mxu0 %v2218_v2  ;;  %v2183_v52 = vld [vmem:[%s3615_s4 + $0x3c] sm:$0xf0]  ;;  %v2189_v0 = vld [vmem:[%s3615_s4 + $0x38] sm:$0xf]  ;;  %v2395_v1 = vld [vmem:[%s3615_s4 + $0x40] sm:$0xf0]  ;;  %v2182_v7 = vor.u32 %v2394_v15, %v2181_v4 }
 0x31a   : > { %1588 = vmatpush.bf16.msra.mxu1 %v2222_v8  ;;  %1602 = vmatpush.bf16.msra.mxu2 %v2226_v9  ;;  %v2186_v32 = vor.u32 %v2393_v16, %v2183_v52  ;;  %v2190_v37 = vor.u32 %v2395_v1, %v2189_v0  ;;  %v2169_v53 = vld [vmem:[%s3615_s4 + $0x18] sm:$0xf]  ;;  %v2391_v45 = vld [vmem:[%s3615_s4 + $0x20] sm:$0xf0]  ;;  %v2390_v20 = vld [vmem:[%s3615_s4 + $0x1c] sm:$0xf] }
 0x31b   : > { %v2171_v28 = vld [vmem:[%s3615_s4 + $0x24] sm:$0xf0]  ;;  %v2177_v13 = vld [vmem:[%s3615_s4 + $0x20] sm:$0xf]  ;;  %v2392_v55 = vld [vmem:[%s3615_s4 + $0x28] sm:$0xf0]  ;;  %v2170_v18 = vor.u32 %v2391_v45, %v2169_v53 }
 0x31c   : > { %v2174_v12 = vor.u32 %v2390_v20, %v2171_v28  ;;  %v2178_v58 = vor.u32 %v2392_v55, %v2177_v13  ;;  %v2157_v31 = vld [vmem:[%s3615_s4] sm:$0xf]  ;;  %v2388_v25 = vld [vmem:[%s3615_s4 + $0x8] sm:$0xf0]  ;;  %v2387_v40 = vld [vmem:[%s3615_s4 + $0x4] sm:$0xf] }
 0x31d   : > { %1575 = vmatpush.bf16.msra.mxu0 %v2206_v33  ;;  %v2159_v6 = vld [vmem:[%s3615_s4 + $0xc] sm:$0xf0]  ;;  %v2165_v17 = vld [vmem:[%s3615_s4 + $0x8] sm:$0xf]  ;;  %v2389_v19 = vld [vmem:[%s3615_s4 + $0x10] sm:$0xf0]  ;;  %v2158_v36 = vor.u32 %v2388_v25, %v2157_v31 }
 0x31e   : > { %1589 = vmatpush.bf16.msra.mxu1 %v2210_v34  ;;  %1603 = vmatpush.bf16.msra.mxu2 %v2214_v35  ;;  %v2162_v26 = vor.u32 %v2387_v40, %v2159_v6  ;;  %v2166_v44 = vor.u32 %v2389_v19, %v2165_v17  ;;  %v3658_v29 = vld [vmem:[#allocation5_spill] sm:$0xff]  ;;  %v2418_v59 = vld [vmem:[%s3617_s6 + $0x38] sm:$0xff]  ;;  %v2417_v46 = vld [vmem:[%s3617_s6 + $0x30] sm:$0xff] }
 0x31f   : > { %v2426_v57 = vld [vmem:[%s3618_s7 + $0x38] sm:$0xff]  ;;  %v2425_v63 = vld [vmem:[%s3618_s7 + $0x30] sm:$0xff]  ;;  %v2416_v38 = vld [vmem:[%s3617_s6 + $0x28] sm:$0xff] }
 0x320   : > { %1720 = vmatpush.bf16.msra.mxu3 %v2426_v57  ;;  %v2424_v42 = vld [vmem:[%s3618_s7 + $0x28] sm:$0xff]  ;;  %v2415_v48 = vld [vmem:[%s3617_s6 + $0x20] sm:$0xff]  ;;  %v2414_v50 = vld [vmem:[%s3617_s6 + $0x18] sm:$0xff] }
 0x321   : > { %1576 = vmatpush.bf16.msra.mxu0 %v2194_v3  ;;  %v2423_v49 = vld [vmem:[%s3618_s7 + $0x20] sm:$0xff]  ;;  %v2422_v54 = vld [vmem:[%s3618_s7 + $0x18] sm:$0xff]  ;;  %v2413_v60 = vld [vmem:[%s3617_s6 + $0x10] sm:$0xff] }
 0x322   : > { %1590 = vmatpush.bf16.msra.mxu1 %v2198_v5  ;;  %1604 = vmatpush.bf16.msra.mxu2 %v2202_v11  ;;  %v1436_v61 = vld [vmem:[%s3616_s5] sm:$0x7]  ;;  %v2421_v62 = vld [vmem:[%s3618_s7 + $0x10] sm:$0xff]  ;;  %v2412_v8 = vld [vmem:[%s3617_s6 + $0x8] sm:$0xff] }
 0x323   : > { %v1438_v2 = vperm.slane %v1436_v61, 0  ;;  %v2420_v9 = vld [vmem:[%s3618_s7 + $0x8] sm:$0xff]  ;;  %v2411_v10 = vld [vmem:[%s3617_s6] sm:$0xff]  ;;  %v1439_v34 = vperm.slane %v1436_v61, 1  ;;  %v1440_v35 = vperm.slane %v1436_v61, 2 }
 0x324   : > { %1721 = vmatpush.bf16.msra.mxu3 %v2425_v63  ;;  %v2419_v23 = vld [vmem:[%s3618_s7] sm:$0xff] }
 0x325   : > { %1577 = vmatpush.bf16.msra.mxu0 %v2182_v7  ;;  %v2532_v19 = vld [vmem:[%s3619_s8] ss:$0 sm:$0xff] }
 0x326   : > { %1591 = vmatpush.bf16.msra.mxu1 %v2186_v32  ;;  %1605 = vmatpush.bf16.msra.mxu2 %v2190_v37 }
 0x328   : > { %1722 = vmatpush.bf16.msra.mxu3 %v2424_v42 }
 0x329   : > { %1578 = vmatpush.bf16.msra.mxu0 %v2170_v18 }
 0x32a   : > { %1592 = vmatpush.bf16.msra.mxu1 %v2174_v12  ;;  %1606 = vmatpush.bf16.msra.mxu2 %v2178_v58 }
 0x32c   : > { %1723 = vmatpush.bf16.msra.mxu3 %v2423_v49 }
 0x32d   : > { %1579 = vmatpush.bf16.msra.mxu0 %v2158_v36 }
 0x32e   : > { %1593 = vmatpush.bf16.msra.mxu1 %v2162_v26  ;;  %1607 = vmatpush.bf16.msra.mxu2 %v2166_v44 }
 0x330   : > { %1580 = vmatmul.bf16.vlgmr.msra.gmra.mxu0 %v3658_v29  ;;  %1724 = vmatpush.bf16.msra.mxu3 %v2422_v54 }
 0x331   : > { %1594 = vmatmul.bf16.vlgmr.msra.gmra.mxu1 %v3658_v29  ;;  %1608 = vmatmul.bf16.vlgmr.msra.gmra.mxu2 %v3658_v29 }
 0x332   : > { %1782 = vmatpush.bf16.msrb.mxu0 %v2418_v59 }
 0x334   : > { %1725 = vmatpush.bf16.msra.mxu3 %v2421_v62 }
 0x336   : > { %1783 = vmatpush.bf16.msrb.mxu0 %v2417_v46 }
 0x338   : > { %1726 = vmatpush.bf16.msra.mxu3 %v2420_v9 }
 0x33a   : > { %1784 = vmatpush.bf16.msrb.mxu0 %v2416_v38 }
 0x33c   : > { %1727 = vmatpush.bf16.msra.mxu3 %v2419_v23 }
 0x33e   : > { %1785 = vmatpush.bf16.msrb.mxu0 %v2415_v48 }
 0x342   : > { %1786 = vmatpush.bf16.msrb.mxu0 %v2414_v50 }
 0x346   : > { %1787 = vmatpush.bf16.msrb.mxu0 %v2413_v60 }
 0x34a   : > { %1788 = vmatpush.bf16.msrb.mxu0 %v2412_v8 }
 0x34e   : > { %1789 = vmatpush.bf16.msrb.mxu0 %v2411_v10 }
 0x351   : > { %1790 = vmatmul.bf16.vlgmr.msrb.gmra.mxu0 %v1638_v27 }
 0x3ad   : > { %v1581_v14 = vpop.f32.mrf.mxu0 }
 0x3ae   : > { %v1582_v21 = vadd.f32 %v1581_v14, %v1438_v2  ;;  %v1595_v22 = vpop.f32.mrf.mxu1 }
 0x3af   : > { %v1596_v39 = vadd.f32 %v1595_v22, %v1439_v34 }
 0x3b0   : > { %v1614_v33 = vmul.f32 0.5, %v1582_v21 }
 0x3b2   : > { %2533 = vtanh.f32 %v1614_v33 }
 0x3b3   : > { %2535 = vtanh.f32 %v1596_v39 }
 0x3b4   : > { %v1609_v43 = vpop.f32.mrf.mxu2 }
 0x3b5   : > { %v1610_v47 = vadd.f32 %v1609_v43, %v1440_v35  ;;  %v1583_v24 = vpop.f32.mrf.mxu0 }
 0x3b6   : > { %v1584_v51 = vadd.f32 %v1583_v24, %v1438_v2  ;;  %v1597_v56 = vpop.f32.mrf.mxu1 }
 0x3b7   : > { %v1624_v11 = vmul.f32 0.5, %v1610_v47  ;;  %v1598_v41 = vadd.f32 %v1597_v56, %v1439_v34 }
 0x3b8   : > { %v2534_v3 = vpop.eup %2533  ;;  %v1615_v4 = vmul.f32 0.5, %v1584_v51 }
 0x3b9   : > { %v1618_v5 = vadd.f32 1.0, %v2534_v3  ;;  %v2536_v52 = vpop.eup %2535 }
 0x3ba   : > { %2537 = vtanh.f32 %v1615_v4 }
 0x3bb   : > { %v1620_v15 = vmul.f32 0.5, %v1618_v5  ;;  %2539 = vtanh.f32 %v1624_v11 }
 0x3bc   : > { %v1611_v30 = vpop.f32.mrf.mxu2  ;;  %2541 = vtanh.f32 %v1598_v41 }
 0x3bd   : > { %v1612_v16 = vadd.f32 %v1611_v30, %v1440_v35  ;;  %v1632_v7 = vmul.f32 %v2536_v52, %v1620_v15 }
 0x3bf   : > { %v1625_v0 = vmul.f32 0.5, %v1612_v16 }
 0x3c0   : > { %v2538_v1 = vpop.eup %2537 }
 0x3c1   : > { %v1619_v32 = vadd.f32 1.0, %v2538_v1  ;;  %2543 = vtanh.f32 %v1625_v0  ;;  %v2540_v37 = vpop.eup %2539 }
 0x3c2   : > { %v2542_v45 = vpop.eup %2541  ;;  %2545 = vtanh.f32 %v1632_v7  ;;  %v1628_v28 = vadd.f32 1.0, %v2540_v37 }
 0x3c3   : > { %v1621_v53 = vmul.f32 0.5, %v1619_v32 }
 0x3c4   : > { %v1630_v18 = vmul.f32 0.5, %v1628_v28 }
 0x3c5   : > { %v1633_v20 = vmul.f32 %v2542_v45, %v1621_v53 }
 0x3c7   : > { %v2544_v13 = vpop.eup %2543  ;;  %2547 = vtanh.f32 %v1633_v20 }
 0x3c8   : > { %v1629_v55 = vadd.f32 1.0, %v2544_v13  ;;  %v2546_v12 = vpop.eup %2545 }
 0x3c9   : > { %v1636_v25 = vmul.f32 %v2546_v12, %v1630_v18 }
 0x3ca   : > { %v1631_v58 = vmul.f32 0.5, %v1629_v55 }
 0x3cd   : > { %v2548_v31 = vpop.eup %2547 }
 0x3ce   : > { %v1637_v40 = vmul.f32 %v2548_v31, %v1631_v58  ;;  %v1791_v17 = vpop.f32.mrf.mxu0 }
 0x3d0   : > { %v1655_v6 = vpack.c.bf16 %v1637_v40, %v1636_v25 }
 0x3d2   : > { %1728 = vmatmul.bf16.vlgmr.msra.gmra.mxu3 %v1655_v6 }
 0x3d6   : > { %v1793_v29 = vpop.f32.mrf.mxu0 }
 0x455   : > { %v1729_v36 = vpop.f32.mrf.mxu3 }
 0x456   : > { %v1792_v26 = vadd.f32 %v1791_v17, %v1729_v36 }
 0x458   : > { %v1800_v44 = vadd.f32 %v2532_v19, %v1792_v26 }
 0x45a   : > { %1802 = vst [vmem:[%s3620_s9] sm:$0xff] %v1800_v44 }
 0x45d   : > { %v1731_v59 = vpop.f32.mrf.mxu3 }
 0x45e   : > { %v1794_v57 = vadd.f32 %v1793_v29, %v1731_v59 }
 0x460   : > { %v1801_v46 = vadd.f32 %v2532_v19, %v1794_v57 }
 0x462   : > { %1803 = vst [vmem:[%s3620_s9 + $0x8] sm:$0xff] %v1801_v46 }
 0x463 PF: > { %s19_s11 = sadd.s32 1, %s2571_s11   ;;  %s3659_s30 = smov %s2567_s10 }
 0x464   : > { %p16_p7 = scmp.ge.s32.totalorder %s19_s11, 4   ;;  %s3660_s10 = smov %s3662_s12 }
 0x466   :  { %18 = sbr.rel (!%p16_p7) target bundleno = 2 (0x2), region = 98 }

</bundles_post_ra>
